<compile_context>
chip_gen: v7x
topology: tpu7x:2x2x1
jax: 0.10.0
libtpu: 0.0.40
codegen_flags: <defaults>
</compile_context>

<pallas_src>
import numpy as np

import jax
import jax.numpy as jnp
from jax import lax
from jax.experimental import pallas as pl
from jax.experimental.pallas import tpu as pltpu

# Geometry fixed by the module (MNIST 1x28x28 input).
KSIZE = 5
H0 = W0 = 28
H1 = W1 = 24            # conv1 output spatial
HP1 = WP1 = 12          # after pool1
H2 = W2 = 8             # conv2 output spatial
HP2 = WP2 = 4           # after pool2
C1, C1P = 20, 32        # conv1 channels (padded)
C2, C2P = 50, 64        # conv2 channels (padded)
F1, F1P = 500, 512      # fc1 features (padded)
NCLS, NCLSP = 10, 128   # classes (padded to one full lane group)

L1 = W1 * C1P           # 768: conv1 lane width, lane = ow*32 + c
LP1 = WP1 * C1P         # 384: pooled1 lane width
L2 = W2 * C2P           # 512: conv2 lane width, lane = ow*64 + c
LP2 = WP2 * C2P         # 256: pooled2 lane width

_VMEM_LIMIT = 32 * 1024 * 1024


# ----------------------------------------------------------------------------
# Fused whole-network kernel (one image per grid step)
# ----------------------------------------------------------------------------
def _net_kernel(x_ref, w1_ref, b1_ref, pr1_ref, pc1_ref,
                w2_ref, b2_ref, pr2_ref, pc2_ref,
                w3_ref, b3_ref, w4_ref, b4_ref,
                o_ref, p1_ref, p2_ref):
    bf16, f32 = jnp.bfloat16, jnp.float32

    # conv1 + bn1: 5 banded matmuls over kh -> (24, 768), lane = ow*32 + c
    o1 = jnp.dot(x_ref[0, 0:H1, :].astype(bf16), w1_ref[0],
                 preferred_element_type=f32)
    for kh in range(1, KSIZE):
        o1 = o1 + jnp.dot(x_ref[0, kh:kh + H1, :].astype(bf16), w1_ref[kh],
                          preferred_element_type=f32)
    a1 = jnp.maximum(o1 + b1_ref[...], 0.0)                    # (24, 768) f32

    # pool1 (2x2 avg) = row-pool @ a1 @ col/channel-pool -> (12, 384)
    pr = jnp.dot(pr1_ref[...], a1.astype(bf16), preferred_element_type=f32)
    p1_ref[...] = jnp.dot(pr.astype(bf16), pc1_ref[...],
                          preferred_element_type=f32)

    # conv2 (ternary) + bn2: 5 banded matmuls -> (8, 512), lane = ow*64 + co
    o2 = jnp.dot(p1_ref[0:H2, :].astype(bf16), w2_ref[0],
                 preferred_element_type=f32)
    for kh in range(1, KSIZE):
        o2 = o2 + jnp.dot(p1_ref[kh:kh + H2, :].astype(bf16), w2_ref[kh],
                          preferred_element_type=f32)
    a2 = jnp.maximum(o2 + b2_ref[...], 0.0)                    # (8, 512) f32

    # pool2 -> (4, 256), lane = w*64 + co
    pr = jnp.dot(pr2_ref[...], a2.astype(bf16), preferred_element_type=f32)
    p2_ref[...] = jnp.dot(pr.astype(bf16), pc2_ref[...],
                          preferred_element_type=f32)

    # fc1 (ternary) + bn3: contract the 4 pooled rows against per-row weights
    y3 = jnp.dot(p2_ref[0:1, :].astype(bf16), w3_ref[0],
                 preferred_element_type=f32)
    for h in range(1, HP2):
        y3 = y3 + jnp.dot(p2_ref[h:h + 1, :].astype(bf16), w3_ref[h],
                          preferred_element_type=f32)
    y3 = jnp.maximum(y3 + b3_ref[...], 0.0)                    # (1, 512) f32

    # fc2 (ternary) + bn4 + log_softmax (padded class lanes masked, f32)
    logits = jnp.dot(y3.astype(bf16), w4_ref[...],
                     preferred_element_type=f32) + b4_ref[...]  # (1, 128)
    lane = lax.broadcasted_iota(jnp.int32, logits.shape, 1)
    logits = jnp.where(lane < NCLS, logits, -1e30)
    m = jnp.max(logits, axis=-1, keepdims=True)
    sh = logits - m
    lse = jnp.log(jnp.sum(jnp.exp(sh), axis=-1, keepdims=True))
    o_ref[0] = (sh - lse).astype(o_ref.dtype)


def net_forward(prep, x):
    """x: (N, 1, 28, 28) float32 -> (N, 10) log-probabilities."""
    N = x.shape[0]
    xi = x.reshape(N, H0, W0)
    r3 = lambda i: (0, 0, 0)
    r2 = lambda i: (0, 0)
    out = pl.pallas_call(
        _net_kernel,
        out_shape=jax.ShapeDtypeStruct((N, 1, NCLSP), jnp.float32),
        grid=(N,),
        in_specs=[
            pl.BlockSpec((1, H0, W0), lambda i: (i, 0, 0)),   # image (streamed)
            pl.BlockSpec((KSIZE, H0, L1), r3),                # conv1 banded W
            pl.BlockSpec((1, L1), r2),                        # bn1 bias (tiled)
            pl.BlockSpec((HP1, H1), r2),                      # pool1 row matrix
            pl.BlockSpec((L1, LP1), r2),                      # pool1 col matrix
            pl.BlockSpec((KSIZE, LP1, L2), r3),               # conv2 banded W
            pl.BlockSpec((1, L2), r2),                        # bn2 bias (tiled)
            pl.BlockSpec((HP2, H2), r2),                      # pool2 row matrix
            pl.BlockSpec((L2, LP2), r2),                      # pool2 col matrix
            pl.BlockSpec((HP2, LP2, F1P), r3),                # fc1 per-row W
            pl.BlockSpec((1, F1P), r2),                       # bn3 bias
            pl.BlockSpec((F1P, NCLSP), r2),                   # fc2 W
            pl.BlockSpec((1, NCLSP), r2),                     # bn4 bias
        ],
        out_specs=pl.BlockSpec((1, 1, NCLSP), lambda i: (i, 0, 0)),
        scratch_shapes=[
            pltpu.VMEM((HP1, LP1), jnp.float32),              # pooled1 map
            pltpu.VMEM((HP2, LP2), jnp.float32),              # pooled2 map
        ],
        compiler_params=pltpu.CompilerParams(
            dimension_semantics=("parallel",),
            vmem_limit_bytes=_VMEM_LIMIT,
        ),
    )(xi, prep["w1"], prep["b1"], prep["pr1"], prep["pc1"],
      prep["w2"], prep["b2"], prep["pr2"], prep["pc2"],
      prep["w3"], prep["b3"], prep["w4"], prep["b4"])
    return out[:, 0, :NCLS]


# ----------------------------------------------------------------------------
# One-time parameter preparation (ternarize, fold BN, band/re-layout, pad)
# ----------------------------------------------------------------------------
def bn_fold(num_features, eps=1e-5):
    """Eval-mode BatchNorm (gamma=1, beta=0, mean=0, var=1) -> (scale, bias)."""
    gamma = np.ones(num_features, np.float32)
    beta = np.zeros(num_features, np.float32)
    mean = np.zeros(num_features, np.float32)
    var = np.ones(num_features, np.float32)
    scale = gamma / np.sqrt(var + eps)
    return scale, beta - mean * scale


def ternarize(w):
    """TWN-style weight ternarization: {-alpha, 0, +alpha}."""
    absw = np.abs(w)
    delta = 0.7 * absw.mean()
    mask = (absw > delta).astype(w.dtype)
    kept = max(float(mask.sum()), 1.0)
    alpha = float((absw * mask).sum()) / kept
    return (alpha * np.sign(w) * mask).astype(np.float32)


def _pool_mats(h_in, w_in, cpad):
    """2x2 avg pool as (row matrix, column/channel matrix) for the packed
    (row, w*cpad + c) activation layout."""
    pr = np.zeros((h_in // 2, h_in), np.float32)
    for i in range(h_in // 2):
        pr[i, 2 * i] = 0.5
        pr[i, 2 * i + 1] = 0.5
    pc = np.zeros((w_in * cpad, (w_in // 2) * cpad), np.float32)
    for w in range(w_in):
        for c in range(cpad):
            pc[w * cpad + c, (w // 2) * cpad + c] = 0.5
    return pr, pc


def init_params(key):
    k1, k2, k3, k4 = jax.random.split(key, 4)
    return {
        # PyTorch Conv2d weight layout: (Cout, Cin, KH, KW)
        "conv1_w": 0.1 * jax.random.normal(k1, (C1, 1, KSIZE, KSIZE), jnp.float32),
        "conv2_w": 0.1 * jax.random.normal(k2, (C2, C1, KSIZE, KSIZE), jnp.float32),
        # PyTorch Linear weight layout: (out_features, in_features)
        "fc1_w": 0.05 * jax.random.normal(k3, (F1, HP2 * WP2 * C2), jnp.float32),
        "fc2_w": 0.05 * jax.random.normal(k4, (NCLS, F1), jnp.float32),
    }


def prepare_params(params):
    s1, b1 = bn_fold(C1)
    s2, b2 = bn_fold(C2)
    s3, b3 = bn_fold(F1)
    s4, b4 = bn_fold(NCLS)

    # conv1 (full precision), BN1 scale folded, banded over kh: (5, 28, 768)
    # w1m[kh, j, ow*32 + c] = W1[c, 0, kh, j - ow] for 0 <= j-ow < 5
    w1 = np.asarray(params["conv1_w"], np.float32)[:, 0] * s1[:, None, None]
    w1m = np.zeros((KSIZE, W0, L1), np.float32)
    for kh in range(KSIZE):
        for kw in range(KSIZE):
            for ow in range(W1):
                w1m[kh, ow + kw, ow * C1P: ow * C1P + C1] = w1[:, kh, kw]

    # conv2 (ternary), BN2 scale folded, banded: (5, 384, 512)
    # w2m[kh, (ow+kw)*32 + ci, ow*64 + co] = W2[co, ci, kh, kw]
    w2 = ternarize(np.asarray(params["conv2_w"], np.float32))
    w2 = w2 * s2[:, None, None, None]
    w2m = np.zeros((KSIZE, LP1, L2), np.float32)
    for kh in range(KSIZE):
        for kw in range(KSIZE):
            for ow in range(W2):
                w2m[kh, (ow + kw) * C1P:(ow + kw) * C1P + C1,
                        ow * C2P: ow * C2P + C2] = w2[:, :, kh, kw].T

    # fc1 (ternary), BN3 scale folded: per pooled-row weight stack (4, 256, 512)
    # w3m[h, w*64 + c, n] = W3[n, c*16 + h*4 + w]  (matches NCHW flatten)
    w3 = ternarize(np.asarray(params["fc1_w"], np.float32)) * s3[:, None]
    w3r = np.transpose(w3.T.reshape(C2, HP2, WP2, F1), (1, 2, 0, 3))  # (h,w,c,n)
    w3m = np.zeros((HP2, WP2, C2P, F1P), np.float32)
    w3m[:, :, :C2, :F1] = w3r
    w3m = w3m.reshape(HP2, LP2, F1P)

    # fc2 (ternary), BN4 scale folded: (512, 128)
    w4 = ternarize(np.asarray(params["fc2_w"], np.float32)) * s4[:, None]
    w4m = np.zeros((F1P, NCLSP), np.float32)
    w4m[:F1, :NCLS] = w4.T

    pr1, pc1 = _pool_mats(H1, W1, C1P)
    pr2, pc2 = _pool_mats(H2, W2, C2P)

    def tile_bias(b, cpad, reps):
        return np.tile(np.pad(b, (0, cpad - b.shape[0])), reps)[None, :]

    return {
        "w1": jnp.asarray(w1m, jnp.bfloat16),
        "b1": jnp.asarray(tile_bias(b1, C1P, W1), jnp.float32),
        "pr1": jnp.asarray(pr1, jnp.bfloat16),
        "pc1": jnp.asarray(pc1, jnp.bfloat16),
        "w2": jnp.asarray(w2m, jnp.bfloat16),
        "b2": jnp.asarray(tile_bias(b2, C2P, W2), jnp.float32),
        "pr2": jnp.asarray(pr2, jnp.bfloat16),
        "pc2": jnp.asarray(pc2, jnp.bfloat16),
        "w3": jnp.asarray(w3m, jnp.bfloat16),
        "b3": jnp.asarray(np.pad(b3, (0, F1P - F1))[None, :], jnp.float32),
        "w4": jnp.asarray(w4m, jnp.bfloat16),
        "b4": jnp.asarray(np.pad(b4, (0, NCLSP - NCLS))[None, :], jnp.float32),
    }


# ----------------------------------------------------------------------------
# Plain-JAX f32 reference (same ternarization / BN-fold assumptions)
# ----------------------------------------------------------------------------
def net_reference(params, x):
    s1, b1 = bn_fold(C1)
    s2, b2 = bn_fold(C2)
    s3, b3 = bn_fold(F1)
    s4, b4 = bn_fold(NCLS)
    w1 = jnp.asarray(params["conv1_w"], jnp.float32)
    w2 = jnp.asarray(ternarize(np.asarray(params["conv2_w"], np.float32)))
    w3 = jnp.asarray(ternarize(np.asarray(params["fc1_w"], np.float32)))
    w4 = jnp.asarray(ternarize(np.asarray(params["fc2_w"], np.float32)))
    dn = ("NCHW", "OIHW", "NCHW")

    def pool(v):
        n, c, h, w = v.shape
        return v.reshape(n, c, h // 2, 2, w // 2, 2).mean(axis=(3, 5))

    y = lax.conv_general_dilated(x, w1, (1, 1), "VALID", dimension_numbers=dn)
    y = jnp.maximum(y * s1[None, :, None, None] + b1[None, :, None, None], 0.0)
    y = pool(y)
    y = lax.conv_general_dilated(y, w2, (1, 1), "VALID", dimension_numbers=dn)
    y = jnp.maximum(y * s2[None, :, None, None] + b2[None, :, None, None], 0.0)
    y = pool(y)
    y = y.reshape(y.shape[0], C2 * HP2 * WP2)
    y = jnp.maximum(y @ w3.T * s3[None, :] + b3[None, :], 0.0)
    y = y @ w4.T * s4[None, :] + b4[None, :]
    return jax.nn.log_softmax(y, axis=1)


if __name__ == "__main__":
    key = jax.random.PRNGKey(0)
    pkey, xkey = jax.random.split(key)
    params = init_params(pkey)
    prep = prepare_params(params)     # hoisted out of the per-batch forward
    x = jax.random.normal(xkey, (2, 1, H0, W0), jnp.float32)

    fwd = jax.jit(net_forward)
    out = jax.block_until_ready(fwd(prep, x))

    assert out.shape == (2, NCLS)
    # log_softmax rows must sum (in prob space) to ~1.
    assert jnp.allclose(jnp.sum(jnp.exp(out), axis=1), 1.0, atol=1e-4)
    # Match the plain-JAX f32 reference to within bf16 tolerance.
    ref = net_reference(params, x)
    max_diff = float(jnp.max(jnp.abs(out - ref)))
    assert max_diff < 5e-2, f"max |out - ref| = {max_diff}"
    print("KERNEL_OK")
</pallas_src>

<mosaic_0001>
module attributes {stable_mosaic.version = 11 : i64} {
  func.func @_net_kernel(%arg0: i32, %arg1: memref<1x28x28xf32, #tpu.memory_space<vmem>>, %arg2: memref<5x28x768xbf16, #tpu.memory_space<vmem>>, %arg3: memref<1x768xf32, #tpu.memory_space<vmem>>, %arg4: memref<12x24xbf16, #tpu.memory_space<vmem>>, %arg5: memref<768x384xbf16, #tpu.memory_space<vmem>>, %arg6: memref<5x384x512xbf16, #tpu.memory_space<vmem>>, %arg7: memref<1x512xf32, #tpu.memory_space<vmem>>, %arg8: memref<4x8xbf16, #tpu.memory_space<vmem>>, %arg9: memref<512x256xbf16, #tpu.memory_space<vmem>>, %arg10: memref<4x256x512xbf16, #tpu.memory_space<vmem>>, %arg11: memref<1x512xf32, #tpu.memory_space<vmem>>, %arg12: memref<512x128xbf16, #tpu.memory_space<vmem>>, %arg13: memref<1x128xf32, #tpu.memory_space<vmem>>, %arg14: memref<1x1x128xf32, #tpu.memory_space<vmem>>, %arg15: memref<12x384xf32, #tpu.memory_space<vmem>>, %arg16: memref<4x256xf32, #tpu.memory_space<vmem>>) attributes {dimension_semantics = [#tpu.dimension_semantics<parallel>], iteration_bounds = array<i64: 2>, scalar_prefetch = 0 : i64, scratch_operands = 2 : i64, tpu.core_type = #tpu.core_type<tc>, window_params = [{transform_indices = @transform_0, window_bounds = array<i64: 1, 28, 28>}, {pipeline_mode = #tpu.pipeline_mode<synchronous>, transform_indices = @transform_1, window_bounds = array<i64: 5, 28, 768>}, {pipeline_mode = #tpu.pipeline_mode<synchronous>, transform_indices = @transform_2, window_bounds = array<i64: 1, 768>}, {pipeline_mode = #tpu.pipeline_mode<synchronous>, transform_indices = @transform_3, window_bounds = array<i64: 12, 24>}, {pipeline_mode = #tpu.pipeline_mode<synchronous>, transform_indices = @transform_4, window_bounds = array<i64: 768, 384>}, {pipeline_mode = #tpu.pipeline_mode<synchronous>, transform_indices = @transform_5, window_bounds = array<i64: 5, 384, 512>}, {pipeline_mode = #tpu.pipeline_mode<synchronous>, transform_indices = @transform_6, window_bounds = array<i64: 1, 512>}, {pipeline_mode = #tpu.pipeline_mode<synchronous>, transform_indices = @transform_7, window_bounds = array<i64: 4, 8>}, {pipeline_mode = #tpu.pipeline_mode<synchronous>, transform_indices = @transform_8, window_bounds = array<i64: 512, 256>}, {pipeline_mode = #tpu.pipeline_mode<synchronous>, transform_indices = @transform_9, window_bounds = array<i64: 4, 256, 512>}, {pipeline_mode = #tpu.pipeline_mode<synchronous>, transform_indices = @transform_10, window_bounds = array<i64: 1, 512>}, {pipeline_mode = #tpu.pipeline_mode<synchronous>, transform_indices = @transform_11, window_bounds = array<i64: 512, 128>}, {pipeline_mode = #tpu.pipeline_mode<synchronous>, transform_indices = @transform_12, window_bounds = array<i64: 1, 128>}, {transform_indices = @transform_13, window_bounds = array<i64: 1, 1, 128>}]} {
    %c0 = arith.constant 0 : index
    %c0_0 = arith.constant 0 : index
    %c0_1 = arith.constant 0 : index
    %0 = vector.load %arg1[%c0, %c0_0, %c0_1] : memref<1x28x28xf32, #tpu.memory_space<vmem>>, vector<1x24x28xf32>
    %1 = vector.shape_cast %0 : vector<1x24x28xf32> to vector<24x28xf32>
    %2 = arith.truncf %1 : vector<24x28xf32> to vector<24x28xbf16>
    %c0_2 = arith.constant 0 : index
    %c0_3 = arith.constant 0 : index
    %c0_4 = arith.constant 0 : index
    %3 = vector.load %arg2[%c0_2, %c0_3, %c0_4] : memref<5x28x768xbf16, #tpu.memory_space<vmem>>, vector<1x28x768xbf16>
    %4 = vector.shape_cast %3 : vector<1x28x768xbf16> to vector<28x768xbf16>
    %cst = arith.constant dense<0.000000e+00> : vector<24x768xf32>
    %5 = tpu.matmul %2, %4, %cst {dimension_numbers = #tpu.dot_dimension_numbers<[1], [0], [0], [1], [0, 0, 1, 1], [], []>} : vector<24x28xbf16>, vector<28x768xbf16>, vector<24x768xf32> -> vector<24x768xf32>
    %c0_5 = arith.constant 0 : index
    %c1 = arith.constant 1 : index
    %c0_6 = arith.constant 0 : index
    %6 = vector.load %arg1[%c0_5, %c1, %c0_6] : memref<1x28x28xf32, #tpu.memory_space<vmem>>, vector<1x24x28xf32>
    %7 = vector.shape_cast %6 : vector<1x24x28xf32> to vector<24x28xf32>
    %8 = arith.truncf %7 : vector<24x28xf32> to vector<24x28xbf16>
    %c1_7 = arith.constant 1 : index
    %c0_8 = arith.constant 0 : index
    %c0_9 = arith.constant 0 : index
    %9 = vector.load %arg2[%c1_7, %c0_8, %c0_9] : memref<5x28x768xbf16, #tpu.memory_space<vmem>>, vector<1x28x768xbf16>
    %10 = vector.shape_cast %9 : vector<1x28x768xbf16> to vector<28x768xbf16>
    %cst_10 = arith.constant dense<0.000000e+00> : vector<24x768xf32>
    %11 = tpu.matmul %8, %10, %cst_10 {dimension_numbers = #tpu.dot_dimension_numbers<[1], [0], [0], [1], [0, 0, 1, 1], [], []>} : vector<24x28xbf16>, vector<28x768xbf16>, vector<24x768xf32> -> vector<24x768xf32>
    %12 = arith.addf %5, %11 : vector<24x768xf32>
    %c0_11 = arith.constant 0 : index
    %c2 = arith.constant 2 : index
    %c0_12 = arith.constant 0 : index
    %13 = vector.load %arg1[%c0_11, %c2, %c0_12] : memref<1x28x28xf32, #tpu.memory_space<vmem>>, vector<1x24x28xf32>
    %14 = vector.shape_cast %13 : vector<1x24x28xf32> to vector<24x28xf32>
    %15 = arith.truncf %14 : vector<24x28xf32> to vector<24x28xbf16>
    %c2_13 = arith.constant 2 : index
    %c0_14 = arith.constant 0 : index
    %c0_15 = arith.constant 0 : index
    %16 = vector.load %arg2[%c2_13, %c0_14, %c0_15] : memref<5x28x768xbf16, #tpu.memory_space<vmem>>, vector<1x28x768xbf16>
    %17 = vector.shape_cast %16 : vector<1x28x768xbf16> to vector<28x768xbf16>
    %cst_16 = arith.constant dense<0.000000e+00> : vector<24x768xf32>
    %18 = tpu.matmul %15, %17, %cst_16 {dimension_numbers = #tpu.dot_dimension_numbers<[1], [0], [0], [1], [0, 0, 1, 1], [], []>} : vector<24x28xbf16>, vector<28x768xbf16>, vector<24x768xf32> -> vector<24x768xf32>
    %19 = arith.addf %12, %18 : vector<24x768xf32>
    %c0_17 = arith.constant 0 : index
    %c3 = arith.constant 3 : index
    %c0_18 = arith.constant 0 : index
    %20 = vector.load %arg1[%c0_17, %c3, %c0_18] : memref<1x28x28xf32, #tpu.memory_space<vmem>>, vector<1x24x28xf32>
    %21 = vector.shape_cast %20 : vector<1x24x28xf32> to vector<24x28xf32>
    %22 = arith.truncf %21 : vector<24x28xf32> to vector<24x28xbf16>
    %c3_19 = arith.constant 3 : index
    %c0_20 = arith.constant 0 : index
    %c0_21 = arith.constant 0 : index
    %23 = vector.load %arg2[%c3_19, %c0_20, %c0_21] : memref<5x28x768xbf16, #tpu.memory_space<vmem>>, vector<1x28x768xbf16>
    %24 = vector.shape_cast %23 : vector<1x28x768xbf16> to vector<28x768xbf16>
    %cst_22 = arith.constant dense<0.000000e+00> : vector<24x768xf32>
    %25 = tpu.matmul %22, %24, %cst_22 {dimension_numbers = #tpu.dot_dimension_numbers<[1], [0], [0], [1], [0, 0, 1, 1], [], []>} : vector<24x28xbf16>, vector<28x768xbf16>, vector<24x768xf32> -> vector<24x768xf32>
    %26 = arith.addf %19, %25 : vector<24x768xf32>
    %c0_23 = arith.constant 0 : index
    %c4 = arith.constant 4 : index
    %c0_24 = arith.constant 0 : index
    %27 = vector.load %arg1[%c0_23, %c4, %c0_24] : memref<1x28x28xf32, #tpu.memory_space<vmem>>, vector<1x24x28xf32>
    %28 = vector.shape_cast %27 : vector<1x24x28xf32> to vector<24x28xf32>
    %29 = arith.truncf %28 : vector<24x28xf32> to vector<24x28xbf16>
    %c4_25 = arith.constant 4 : index
    %c0_26 = arith.constant 0 : index
    %c0_27 = arith.constant 0 : index
    %30 = vector.load %arg2[%c4_25, %c0_26, %c0_27] : memref<5x28x768xbf16, #tpu.memory_space<vmem>>, vector<1x28x768xbf16>
    %31 = vector.shape_cast %30 : vector<1x28x768xbf16> to vector<28x768xbf16>
    %cst_28 = arith.constant dense<0.000000e+00> : vector<24x768xf32>
    %32 = tpu.matmul %29, %31, %cst_28 {dimension_numbers = #tpu.dot_dimension_numbers<[1], [0], [0], [1], [0, 0, 1, 1], [], []>} : vector<24x28xbf16>, vector<28x768xbf16>, vector<24x768xf32> -> vector<24x768xf32>
    %33 = arith.addf %26, %32 : vector<24x768xf32>
    %c0_29 = arith.constant 0 : index
    %c0_30 = arith.constant 0 : index
    %34 = vector.load %arg3[%c0_29, %c0_30] : memref<1x768xf32, #tpu.memory_space<vmem>>, vector<1x768xf32>
    %35 = vector.broadcast %34 : vector<1x768xf32> to vector<24x768xf32>
    %36 = arith.addf %33, %35 : vector<24x768xf32>
    %cst_31 = arith.constant 0.000000e+00 : f32
    %37 = vector.broadcast %cst_31 : f32 to vector<24x768xf32>
    %38 = arith.maximumf %36, %37 : vector<24x768xf32>
    %c0_32 = arith.constant 0 : index
    %c0_33 = arith.constant 0 : index
    %39 = vector.load %arg4[%c0_32, %c0_33] : memref<12x24xbf16, #tpu.memory_space<vmem>>, vector<12x24xbf16>
    %40 = arith.truncf %38 : vector<24x768xf32> to vector<24x768xbf16>
    %cst_34 = arith.constant dense<0.000000e+00> : vector<12x768xf32>
    %41 = tpu.matmul %39, %40, %cst_34 {dimension_numbers = #tpu.dot_dimension_numbers<[1], [0], [0], [1], [0, 0, 1, 1], [], []>} : vector<12x24xbf16>, vector<24x768xbf16>, vector<12x768xf32> -> vector<12x768xf32>
    %42 = arith.truncf %41 : vector<12x768xf32> to vector<12x768xbf16>
    %c0_35 = arith.constant 0 : index
    %c0_36 = arith.constant 0 : index
    %43 = vector.load %arg5[%c0_35, %c0_36] : memref<768x384xbf16, #tpu.memory_space<vmem>>, vector<768x384xbf16>
    %cst_37 = arith.constant dense<0.000000e+00> : vector<12x384xf32>
    %44 = tpu.matmul %42, %43, %cst_37 {dimension_numbers = #tpu.dot_dimension_numbers<[1], [0], [0], [1], [0, 0, 1, 1], [], []>} : vector<12x768xbf16>, vector<768x384xbf16>, vector<12x384xf32> -> vector<12x384xf32>
    %c0_38 = arith.constant 0 : index
    %c0_39 = arith.constant 0 : index
    %45 = vector.load %arg15[%c0_38, %c0_39] : memref<12x384xf32, #tpu.memory_space<vmem>>, vector<12x384xf32>
    tpu.vector_store %arg15[%c0_38, %c0_39], %44 {strides = array<i32>} : memref<12x384xf32, #tpu.memory_space<vmem>>, vector<12x384xf32>,
    %c0_40 = arith.constant 0 : index
    %c0_41 = arith.constant 0 : index
    %46 = vector.load %arg15[%c0_40, %c0_41] : memref<12x384xf32, #tpu.memory_space<vmem>>, vector<8x384xf32>
    %47 = arith.truncf %46 : vector<8x384xf32> to vector<8x384xbf16>
    %c0_42 = arith.constant 0 : index
    %c0_43 = arith.constant 0 : index
    %c0_44 = arith.constant 0 : index
    %48 = vector.load %arg6[%c0_42, %c0_43, %c0_44] : memref<5x384x512xbf16, #tpu.memory_space<vmem>>, vector<1x384x512xbf16>
    %49 = vector.shape_cast %48 : vector<1x384x512xbf16> to vector<384x512xbf16>
    %cst_45 = arith.constant dense<0.000000e+00> : vector<8x512xf32>
    %50 = tpu.matmul %47, %49, %cst_45 {dimension_numbers = #tpu.dot_dimension_numbers<[1], [0], [0], [1], [0, 0, 1, 1], [], []>} : vector<8x384xbf16>, vector<384x512xbf16>, vector<8x512xf32> -> vector<8x512xf32>
    %c1_46 = arith.constant 1 : index
    %c0_47 = arith.constant 0 : index
    %51 = vector.load %arg15[%c1_46, %c0_47] : memref<12x384xf32, #tpu.memory_space<vmem>>, vector<8x384xf32>
    %52 = arith.truncf %51 : vector<8x384xf32> to vector<8x384xbf16>
    %c1_48 = arith.constant 1 : index
    %c0_49 = arith.constant 0 : index
    %c0_50 = arith.constant 0 : index
    %53 = vector.load %arg6[%c1_48, %c0_49, %c0_50] : memref<5x384x512xbf16, #tpu.memory_space<vmem>>, vector<1x384x512xbf16>
    %54 = vector.shape_cast %53 : vector<1x384x512xbf16> to vector<384x512xbf16>
    %cst_51 = arith.constant dense<0.000000e+00> : vector<8x512xf32>
    %55 = tpu.matmul %52, %54, %cst_51 {dimension_numbers = #tpu.dot_dimension_numbers<[1], [0], [0], [1], [0, 0, 1, 1], [], []>} : vector<8x384xbf16>, vector<384x512xbf16>, vector<8x512xf32> -> vector<8x512xf32>
    %56 = arith.addf %50, %55 : vector<8x512xf32>
    %c2_52 = arith.constant 2 : index
    %c0_53 = arith.constant 0 : index
    %57 = vector.load %arg15[%c2_52, %c0_53] : memref<12x384xf32, #tpu.memory_space<vmem>>, vector<8x384xf32>
    %58 = arith.truncf %57 : vector<8x384xf32> to vector<8x384xbf16>
    %c2_54 = arith.constant 2 : index
    %c0_55 = arith.constant 0 : index
    %c0_56 = arith.constant 0 : index
    %59 = vector.load %arg6[%c2_54, %c0_55, %c0_56] : memref<5x384x512xbf16, #tpu.memory_space<vmem>>, vector<1x384x512xbf16>
    %60 = vector.shape_cast %59 : vector<1x384x512xbf16> to vector<384x512xbf16>
    %cst_57 = arith.constant dense<0.000000e+00> : vector<8x512xf32>
    %61 = tpu.matmul %58, %60, %cst_57 {dimension_numbers = #tpu.dot_dimension_numbers<[1], [0], [0], [1], [0, 0, 1, 1], [], []>} : vector<8x384xbf16>, vector<384x512xbf16>, vector<8x512xf32> -> vector<8x512xf32>
    %62 = arith.addf %56, %61 : vector<8x512xf32>
    %c3_58 = arith.constant 3 : index
    %c0_59 = arith.constant 0 : index
    %63 = vector.load %arg15[%c3_58, %c0_59] : memref<12x384xf32, #tpu.memory_space<vmem>>, vector<8x384xf32>
    %64 = arith.truncf %63 : vector<8x384xf32> to vector<8x384xbf16>
    %c3_60 = arith.constant 3 : index
    %c0_61 = arith.constant 0 : index
    %c0_62 = arith.constant 0 : index
    %65 = vector.load %arg6[%c3_60, %c0_61, %c0_62] : memref<5x384x512xbf16, #tpu.memory_space<vmem>>, vector<1x384x512xbf16>
    %66 = vector.shape_cast %65 : vector<1x384x512xbf16> to vector<384x512xbf16>
    %cst_63 = arith.constant dense<0.000000e+00> : vector<8x512xf32>
    %67 = tpu.matmul %64, %66, %cst_63 {dimension_numbers = #tpu.dot_dimension_numbers<[1], [0], [0], [1], [0, 0, 1, 1], [], []>} : vector<8x384xbf16>, vector<384x512xbf16>, vector<8x512xf32> -> vector<8x512xf32>
    %68 = arith.addf %62, %67 : vector<8x512xf32>
    %c4_64 = arith.constant 4 : index
    %c0_65 = arith.constant 0 : index
    %69 = vector.load %arg15[%c4_64, %c0_65] : memref<12x384xf32, #tpu.memory_space<vmem>>, vector<8x384xf32>
    %70 = arith.truncf %69 : vector<8x384xf32> to vector<8x384xbf16>
    %c4_66 = arith.constant 4 : index
    %c0_67 = arith.constant 0 : index
    %c0_68 = arith.constant 0 : index
    %71 = vector.load %arg6[%c4_66, %c0_67, %c0_68] : memref<5x384x512xbf16, #tpu.memory_space<vmem>>, vector<1x384x512xbf16>
    %72 = vector.shape_cast %71 : vector<1x384x512xbf16> to vector<384x512xbf16>
    %cst_69 = arith.constant dense<0.000000e+00> : vector<8x512xf32>
    %73 = tpu.matmul %70, %72, %cst_69 {dimension_numbers = #tpu.dot_dimension_numbers<[1], [0], [0], [1], [0, 0, 1, 1], [], []>} : vector<8x384xbf16>, vector<384x512xbf16>, vector<8x512xf32> -> vector<8x512xf32>
    %74 = arith.addf %68, %73 : vector<8x512xf32>
    %c0_70 = arith.constant 0 : index
    %c0_71 = arith.constant 0 : index
    %75 = vector.load %arg7[%c0_70, %c0_71] : memref<1x512xf32, #tpu.memory_space<vmem>>, vector<1x512xf32>
    %76 = vector.broadcast %75 : vector<1x512xf32> to vector<8x512xf32>
    %77 = arith.addf %74, %76 : vector<8x512xf32>
    %cst_72 = arith.constant 0.000000e+00 : f32
    %78 = vector.broadcast %cst_72 : f32 to vector<8x512xf32>
    %79 = arith.maximumf %77, %78 : vector<8x512xf32>
    %c0_73 = arith.constant 0 : index
    %c0_74 = arith.constant 0 : index
    %80 = vector.load %arg8[%c0_73, %c0_74] : memref<4x8xbf16, #tpu.memory_space<vmem>>, vector<4x8xbf16>
    %81 = arith.truncf %79 : vector<8x512xf32> to vector<8x512xbf16>
    %cst_75 = arith.constant dense<0.000000e+00> : vector<4x512xf32>
    %82 = tpu.matmul %80, %81, %cst_75 {dimension_numbers = #tpu.dot_dimension_numbers<[1], [0], [0], [1], [0, 0, 1, 1], [], []>} : vector<4x8xbf16>, vector<8x512xbf16>, vector<4x512xf32> -> vector<4x512xf32>
    %83 = arith.truncf %82 : vector<4x512xf32> to vector<4x512xbf16>
    %c0_76 = arith.constant 0 : index
    %c0_77 = arith.constant 0 : index
    %84 = vector.load %arg9[%c0_76, %c0_77] : memref<512x256xbf16, #tpu.memory_space<vmem>>, vector<512x256xbf16>
    %cst_78 = arith.constant dense<0.000000e+00> : vector<4x256xf32>
    %85 = tpu.matmul %83, %84, %cst_78 {dimension_numbers = #tpu.dot_dimension_numbers<[1], [0], [0], [1], [0, 0, 1, 1], [], []>} : vector<4x512xbf16>, vector<512x256xbf16>, vector<4x256xf32> -> vector<4x256xf32>
    %c0_79 = arith.constant 0 : index
    %c0_80 = arith.constant 0 : index
    %86 = vector.load %arg16[%c0_79, %c0_80] : memref<4x256xf32, #tpu.memory_space<vmem>>, vector<4x256xf32>
    tpu.vector_store %arg16[%c0_79, %c0_80], %85 {strides = array<i32>} : memref<4x256xf32, #tpu.memory_space<vmem>>, vector<4x256xf32>,
    %c0_81 = arith.constant 0 : index
    %c0_82 = arith.constant 0 : index
    %87 = vector.load %arg16[%c0_81, %c0_82] : memref<4x256xf32, #tpu.memory_space<vmem>>, vector<1x256xf32>
    %88 = arith.truncf %87 : vector<1x256xf32> to vector<1x256xbf16>
    %c0_83 = arith.constant 0 : index
    %c0_84 = arith.constant 0 : index
    %c0_85 = arith.constant 0 : index
    %89 = vector.load %arg10[%c0_83, %c0_84, %c0_85] : memref<4x256x512xbf16, #tpu.memory_space<vmem>>, vector<1x256x512xbf16>
    %90 = vector.shape_cast %89 : vector<1x256x512xbf16> to vector<256x512xbf16>
    %cst_86 = arith.constant dense<0.000000e+00> : vector<1x512xf32>
    %91 = tpu.matmul %88, %90, %cst_86 {dimension_numbers = #tpu.dot_dimension_numbers<[1], [0], [0], [1], [0, 0, 1, 1], [], []>} : vector<1x256xbf16>, vector<256x512xbf16>, vector<1x512xf32> -> vector<1x512xf32>
    %c1_87 = arith.constant 1 : index
    %c0_88 = arith.constant 0 : index
    %92 = vector.load %arg16[%c1_87, %c0_88] : memref<4x256xf32, #tpu.memory_space<vmem>>, vector<1x256xf32>
    %93 = arith.truncf %92 : vector<1x256xf32> to vector<1x256xbf16>
    %c1_89 = arith.constant 1 : index
    %c0_90 = arith.constant 0 : index
    %c0_91 = arith.constant 0 : index
    %94 = vector.load %arg10[%c1_89, %c0_90, %c0_91] : memref<4x256x512xbf16, #tpu.memory_space<vmem>>, vector<1x256x512xbf16>
    %95 = vector.shape_cast %94 : vector<1x256x512xbf16> to vector<256x512xbf16>
    %cst_92 = arith.constant dense<0.000000e+00> : vector<1x512xf32>
    %96 = tpu.matmul %93, %95, %cst_92 {dimension_numbers = #tpu.dot_dimension_numbers<[1], [0], [0], [1], [0, 0, 1, 1], [], []>} : vector<1x256xbf16>, vector<256x512xbf16>, vector<1x512xf32> -> vector<1x512xf32>
    %97 = arith.addf %91, %96 : vector<1x512xf32>
    %c2_93 = arith.constant 2 : index
    %c0_94 = arith.constant 0 : index
    %98 = vector.load %arg16[%c2_93, %c0_94] : memref<4x256xf32, #tpu.memory_space<vmem>>, vector<1x256xf32>
    %99 = arith.truncf %98 : vector<1x256xf32> to vector<1x256xbf16>
    %c2_95 = arith.constant 2 : index
    %c0_96 = arith.constant 0 : index
    %c0_97 = arith.constant 0 : index
    %100 = vector.load %arg10[%c2_95, %c0_96, %c0_97] : memref<4x256x512xbf16, #tpu.memory_space<vmem>>, vector<1x256x512xbf16>
    %101 = vector.shape_cast %100 : vector<1x256x512xbf16> to vector<256x512xbf16>
    %cst_98 = arith.constant dense<0.000000e+00> : vector<1x512xf32>
    %102 = tpu.matmul %99, %101, %cst_98 {dimension_numbers = #tpu.dot_dimension_numbers<[1], [0], [0], [1], [0, 0, 1, 1], [], []>} : vector<1x256xbf16>, vector<256x512xbf16>, vector<1x512xf32> -> vector<1x512xf32>
    %103 = arith.addf %97, %102 : vector<1x512xf32>
    %c3_99 = arith.constant 3 : index
    %c0_100 = arith.constant 0 : index
    %104 = vector.load %arg16[%c3_99, %c0_100] : memref<4x256xf32, #tpu.memory_space<vmem>>, vector<1x256xf32>
    %105 = arith.truncf %104 : vector<1x256xf32> to vector<1x256xbf16>
    %c3_101 = arith.constant 3 : index
    %c0_102 = arith.constant 0 : index
    %c0_103 = arith.constant 0 : index
    %106 = vector.load %arg10[%c3_101, %c0_102, %c0_103] : memref<4x256x512xbf16, #tpu.memory_space<vmem>>, vector<1x256x512xbf16>
    %107 = vector.shape_cast %106 : vector<1x256x512xbf16> to vector<256x512xbf16>
    %cst_104 = arith.constant dense<0.000000e+00> : vector<1x512xf32>
    %108 = tpu.matmul %105, %107, %cst_104 {dimension_numbers = #tpu.dot_dimension_numbers<[1], [0], [0], [1], [0, 0, 1, 1], [], []>} : vector<1x256xbf16>, vector<256x512xbf16>, vector<1x512xf32> -> vector<1x512xf32>
    %109 = arith.addf %103, %108 : vector<1x512xf32>
    %c0_105 = arith.constant 0 : index
    %c0_106 = arith.constant 0 : index
    %110 = vector.load %arg11[%c0_105, %c0_106] : memref<1x512xf32, #tpu.memory_space<vmem>>, vector<1x512xf32>
    %111 = arith.addf %109, %110 : vector<1x512xf32>
    %cst_107 = arith.constant 0.000000e+00 : f32
    %112 = vector.broadcast %cst_107 : f32 to vector<1x512xf32>
    %113 = arith.maximumf %111, %112 : vector<1x512xf32>
    %114 = arith.truncf %113 : vector<1x512xf32> to vector<1x512xbf16>
    %c0_108 = arith.constant 0 : index
    %c0_109 = arith.constant 0 : index
    %115 = vector.load %arg12[%c0_108, %c0_109] : memref<512x128xbf16, #tpu.memory_space<vmem>>, vector<512x128xbf16>
    %cst_110 = arith.constant dense<0.000000e+00> : vector<1x128xf32>
    %116 = tpu.matmul %114, %115, %cst_110 {dimension_numbers = #tpu.dot_dimension_numbers<[1], [0], [0], [1], [0, 0, 1, 1], [], []>} : vector<1x512xbf16>, vector<512x128xbf16>, vector<1x128xf32> -> vector<1x128xf32>
    %c0_111 = arith.constant 0 : index
    %c0_112 = arith.constant 0 : index
    %117 = vector.load %arg13[%c0_111, %c0_112] : memref<1x128xf32, #tpu.memory_space<vmem>>, vector<1x128xf32>
    %118 = arith.addf %116, %117 : vector<1x128xf32>
    %119 = tpu.iota {dimensions = array<i32: 1>} : vector<1x128xi32>
    %c10_i32 = arith.constant 10 : i32
    %120 = vector.broadcast %c10_i32 : i32 to vector<1x128xi32>
    %121 = arith.cmpi slt, %119, %120 : vector<1x128xi32>
    %cst_113 = arith.constant -1.000000e+30 : f32
    %122 = vector.broadcast %cst_113 : f32 to vector<1x128xf32>
    %123 = arith.select %121, %118, %122 : vector<1x128xi1>, vector<1x128xf32>
    %cst_114 = arith.constant dense<0xFF800000> : vector<1xf32>
    %124 = vector.multi_reduction <maximumf>, %123, %cst_114 [1] : vector<1x128xf32> to vector<1xf32>
    %125 = vector.shape_cast %124 : vector<1xf32> to vector<1x1xf32>
    %126 = vector.broadcast %125 : vector<1x1xf32> to vector<1x128xf32>
    %127 = arith.subf %123, %126 : vector<1x128xf32>
    %128 = math.exp %127 : vector<1x128xf32>
    %cst_115 = arith.constant dense<0.000000e+00> : vector<1xf32>
    %129 = vector.multi_reduction <add>, %128, %cst_115 [1] : vector<1x128xf32> to vector<1xf32>
    %130 = vector.shape_cast %129 : vector<1xf32> to vector<1x1xf32>
    %131 = math.log %130 : vector<1x1xf32>
    %132 = vector.broadcast %131 : vector<1x1xf32> to vector<1x128xf32>
    %133 = arith.subf %127, %132 : vector<1x128xf32>
    %c0_116 = arith.constant 0 : index
    %c0_117 = arith.constant 0 : index
    %c0_118 = arith.constant 0 : index
    %134 = vector.load %arg14[%c0_116, %c0_117, %c0_118] : memref<1x1x128xf32, #tpu.memory_space<vmem>>, vector<1x1x128xf32>
    %135 = vector.shape_cast %134 : vector<1x1x128xf32> to vector<1x128xf32>
    %136 = vector.shape_cast %133 : vector<1x128xf32> to vector<1x1x128xf32>
    tpu.vector_store %arg14[%c0_116, %c0_117, %c0_118], %136 {strides = array<i32>} : memref<1x1x128xf32, #tpu.memory_space<vmem>>, vector<1x1x128xf32>,
    return
  }
  func.func @transform_0(%arg0: i32) -> (i32, i32, i32) {
    %c0_i32 = arith.constant 0 : i32
    %c0_i32_0 = arith.constant 0 : i32
    %c0_i32_1 = arith.constant 0 : i32
    return %arg0, %c0_i32, %c0_i32_0 : i32, i32, i32
  }
  func.func @transform_1(%arg0: i32) -> (i32, i32, i32) {
    %c0_i32 = arith.constant 0 : i32
    %c0_i32_0 = arith.constant 0 : i32
    %c0_i32_1 = arith.constant 0 : i32
    %c0_i32_2 = arith.constant 0 : i32
    return %c0_i32, %c0_i32_0, %c0_i32_1 : i32, i32, i32
  }
  func.func @transform_2(%arg0: i32) -> (i32, i32) {
    %c0_i32 = arith.constant 0 : i32
    %c0_i32_0 = arith.constant 0 : i32
    %c0_i32_1 = arith.constant 0 : i32
    return %c0_i32, %c0_i32_0 : i32, i32
  }
  func.func @transform_3(%arg0: i32) -> (i32, i32) {
    %c0_i32 = arith.constant 0 : i32
    %c0_i32_0 = arith.constant 0 : i32
    %c0_i32_1 = arith.constant 0 : i32
    return %c0_i32, %c0_i32_0 : i32, i32
  }
  func.func @transform_4(%arg0: i32) -> (i32, i32) {
    %c0_i32 = arith.constant 0 : i32
    %c0_i32_0 = arith.constant 0 : i32
    %c0_i32_1 = arith.constant 0 : i32
    return %c0_i32, %c0_i32_0 : i32, i32
  }
  func.func @transform_5(%arg0: i32) -> (i32, i32, i32) {
    %c0_i32 = arith.constant 0 : i32
    %c0_i32_0 = arith.constant 0 : i32
    %c0_i32_1 = arith.constant 0 : i32
    %c0_i32_2 = arith.constant 0 : i32
    return %c0_i32, %c0_i32_0, %c0_i32_1 : i32, i32, i32
  }
  func.func @transform_6(%arg0: i32) -> (i32, i32) {
    %c0_i32 = arith.constant 0 : i32
    %c0_i32_0 = arith.constant 0 : i32
    %c0_i32_1 = arith.constant 0 : i32
    return %c0_i32, %c0_i32_0 : i32, i32
  }
  func.func @transform_7(%arg0: i32) -> (i32, i32) {
    %c0_i32 = arith.constant 0 : i32
    %c0_i32_0 = arith.constant 0 : i32
    %c0_i32_1 = arith.constant 0 : i32
    return %c0_i32, %c0_i32_0 : i32, i32
  }
  func.func @transform_8(%arg0: i32) -> (i32, i32) {
    %c0_i32 = arith.constant 0 : i32
    %c0_i32_0 = arith.constant 0 : i32
    %c0_i32_1 = arith.constant 0 : i32
    return %c0_i32, %c0_i32_0 : i32, i32
  }
  func.func @transform_9(%arg0: i32) -> (i32, i32, i32) {
    %c0_i32 = arith.constant 0 : i32
    %c0_i32_0 = arith.constant 0 : i32
    %c0_i32_1 = arith.constant 0 : i32
    %c0_i32_2 = arith.constant 0 : i32
    return %c0_i32, %c0_i32_0, %c0_i32_1 : i32, i32, i32
  }
  func.func @transform_10(%arg0: i32) -> (i32, i32) {
    %c0_i32 = arith.constant 0 : i32
    %c0_i32_0 = arith.constant 0 : i32
    %c0_i32_1 = arith.constant 0 : i32
    return %c0_i32, %c0_i32_0 : i32, i32
  }
  func.func @transform_11(%arg0: i32) -> (i32, i32) {
    %c0_i32 = arith.constant 0 : i32
    %c0_i32_0 = arith.constant 0 : i32
    %c0_i32_1 = arith.constant 0 : i32
    return %c0_i32, %c0_i32_0 : i32, i32
  }
  func.func @transform_12(%arg0: i32) -> (i32, i32) {
    %c0_i32 = arith.constant 0 : i32
    %c0_i32_0 = arith.constant 0 : i32
    %c0_i32_1 = arith.constant 0 : i32
    return %c0_i32, %c0_i32_0 : i32, i32
  }
  func.func @transform_13(%arg0: i32) -> (i32, i32, i32) {
    %c0_i32 = arith.constant 0 : i32
    %c0_i32_0 = arith.constant 0 : i32
    %c0_i32_1 = arith.constant 0 : i32
    return %arg0, %c0_i32, %c0_i32_0 : i32, i32, i32
  }
}

</mosaic_0001>

<bundles_post_ra>
// kernel: net_forward.1
= control target key start
LH: loop header
LB: loop body
LE: loop exit
PB: predicated region body
PF: predicated region fallthrough
CT: control target
= control target key end

     0   :  { %s14634_s0 = inlined_call_operand.vmem [shape: f32[2,28,28], index: 0, kind: input, shape index: {}]   ;;  %s14635_s1 = inlined_call_operand.hbm [shape: bf16[5,28,768], index: 1, kind: input, shape index: {}]   ;;  %s14636_s2 = inlined_call_operand.hbm [shape: f32[1,768], index: 2, kind: input, shape index: {}]   ;;  %s14637_s3 = inlined_call_operand.hbm [shape: bf16[12,24], index: 3, kind: input, shape index: {}]   ;;  %s14638_s4 = inlined_call_operand.hbm [shape: bf16[768,384], index: 4, kind: input, shape index: {}]   ;;  %s14639_s5 = inlined_call_operand.hbm [shape: bf16[5,384,512], index: 5, kind: input, shape index: {}]   ;;  %s14640_s6 = inlined_call_operand.hbm [shape: f32[1,512], index: 6, kind: input, shape index: {}]   ;;  %s14641_s7 = inlined_call_operand.hbm [shape: bf16[4,8], index: 7, kind: input, shape index: {}]   ;;  %s14642_s8 = inlined_call_operand.hbm [shape: bf16[512,256], index: 8, kind: input, shape index: {}]   ;;  %s14643_s9 = inlined_call_operand.hbm [shape: bf16[4,256,512], index: 9, kind: input, shape index: {}]   ;;  %s14644_s10 = inlined_call_operand.hbm [shape: f32[1,512], index: 10, kind: input, shape index: {}]   ;;  %s14645_s11 = inlined_call_operand.hbm [shape: bf16[512,128], index: 11, kind: input, shape index: {}]   ;;  %s14646_s12 = inlined_call_operand.hbm [shape: f32[1,128], index: 12, kind: input, shape index: {}]   ;;  %s14647_s13 = inlined_call_operand.hbm [shape: f32[2,1,128], index: 13, kind: output, shape index: {}]  }
   0x1   :  { %14660 = sst [smem:[#allocation39_spill]] %s14636_s2 }
   0x2   :  { %14661 = sst [smem:[#allocation40_spill]] %s14638_s4 }
   0x3   :  { %14662 = sst [smem:[#allocation41_spill]] %s14647_s13 }
   0x4   :  { %18 = vsyncpa [#allocation5], 0 }
   0x5   :  { %19 = vsyncpa [#allocation8], 0 }
   0x6   :  { %20 = vsyncpa [#allocation11], 0 }
   0x7   :  { %21 = vsyncpa [#allocation14], 0 }
   0x8   :  { %22 = vsyncpa [#allocation17], 0 }
   0x9   :  { %23 = vsyncpa [#allocation20], 0 }
   0xa   :  { %24 = vsyncpa [#allocation23], 0 }
   0xb   :  { %25 = vsyncpa [#allocation6], 0 }
   0xc   :  { %27 = vsyncpa [#allocation6 + $0x1], 0  ;;  %s13818_s25 = smov 0   ;;  %s13820_s26 = smov 0  }
   0xd   :  { %s13822_s27 = smov 0   ;;  %s13824_s28 = smov 0  }
   0xe LB: > { %14663 = sst [smem:[#allocation33_spill]] %s13710_s25  ;;  %s13839_s29 = sadd.s32 4294967295, %s13722_s28   ;;  %s13722_s28 = sphi %s13824_s28, %s14699_s28   ;;  %s13718_s27 = sphi %s13822_s27, %s14701_s27   ;;  %s13714_s26 = sphi %s13820_s26, %s14703_s26   ;;  %s13710_s25 = sphi %s13818_s25, %s14702_s25  }
   0xf   : > { %14664 = sst [smem:[#allocation34_spill]] %s13718_s27  ;;  %s10310_s30 = sadd.s32 4294967294, %s13722_s28  }
  0x10   : > { %14665 = sst [smem:[#allocation35_spill]] %s13722_s28  ;;  %s13843_s14 = sadd.s32 1, %s13722_s28  }
  0x11   : > { %14666 = sst [smem:[#allocation36_spill]] %s13843_s14  ;;  %s318_s15 = sadd.s32 1, %s13718_s27 }
  0x12   : > { %s315_s16 = ssub.s32 %s13722_s28, %s13843_s14  ;;  %p328_p0 = scmp.ne.s32.totalorder %s13718_s27, %s13714_s26 }
  0x13   : > { %p316_p1 = scmp.eq.s32.totalorder %s315_s16, 0  ;;  %p329_p2 = scmp.eq.s32.totalorder %s13839_s29, 1 }
  0x14   : > { %p334_p3 = scmp.ne.s32.totalorder %s13714_s26, %s13710_s25  ;;  %p335_p4 = scmp.eq.s32.totalorder %s10310_s30, 1 }
  0x15   : > { %s13854_s17 = scalar_select %p316_p1, %s13718_s27, %s318_s15  }
  0x16   : > { %p13856_p5 = por %p329_p2, %p328_p0  ;;  %p13860_p6 = por %p335_p4, %p334_p3 }
  0x17   : > { %14667 = sst [smem:[#allocation37_spill]] %s13854_s17  ;;  %p10311_p7 = scmp.ge.s32.totalorder %s13722_s28, 1 }
  0x18   : > { %s14668_s18 = scalar_select %p13856_p5, 1, 0 }
  0x19   : > { %s14669_s19 = scalar_select %p13860_p6, 1, 0 }
  0x1a   : > { %p342_p8 = scmp.lt.s32.totalorder %s13722_s28, 3  ;;  %p14653_p9 = scmp.eq.s32.totalorder %s13839_s29, 0 }
  0x1b   : > { %14670 = sst [smem:[#allocation38_spill]] %s14669_s19  ;;  %s13724_s21 = smov [#allocation7]  }
  0x1c   : > { %p13867_p10 = pnand %p10311_p7, %p342_p8  ;;  %s368_s22 = sshll.u32 %s13724_s21, 4  ;;  %s369_s22 = int_to_ptr.vmem [resolvable:$true] %s368_s22 }
  0x1d   : > { %s13725_s23 = smov [#allocation10]   ;;  %s13726_s15 = smov [#allocation13]  }
  0x1e   : > { %s14671_s20 = scalar_select %p13867_p10, 1, 0 }
  0x1f   : > { %p11656_p11 = pneg %p13867_p10  ;;  %s391_s24 = sshll.u32 %s13725_s23, 4  ;;  %s13879_s24 = int_to_ptr.vmem [resolvable:$true] %s391_s24 }
  0x20   : > { %s13881_s16 = sshll.u32 %s13726_s15, 4  ;;  %s14673_s2 = sld [smem:[#allocation39_spill]]  ;;  %s419_s16 = int_to_ptr.vmem [resolvable:$true] %s13881_s16 }
  0x21   : > { %p13875_p12 = pnand %p14653_p9, %p11656_p11 }
  0x23   : > { %p13891_p0 = pneg %p13875_p12 }
  0x26   : > { %s13296_s21 = scalar_lea.hbm %s14673_s2, 96 }
  0x27   : > { %p13297_p13 = scmp.ne.s32.totalorder %s14673_s2, %s13296_s21  ;;  %p13303_p3 = scmp.lt.u32.totalorder %s13296_s21, %s14673_s2 }
  0x29   : > { %p13299_p1 = pnand %p13891_p0, %p13297_p13 }
  0x2b   : > { %p13300_p2 = pneg %p13299_p1 }
  0x2d   : > { %p13305_p4 = pnand %p13303_p3, %p13300_p2 }
  0x2f   : > { %13308 = shalt.err (!%p13305_p4)
}
  0x30   : > { %s13309_s27 = scalar_lea.vmem %s369_s22, 96  ;;  %p13317_p9 = scmp.lt.s32.totalorder %s369_s22, %s369_s22 }
  0x31   : > { %p13310_p7 = scmp.ne.s32.totalorder %s369_s22, %s13309_s27  ;;  %p13318_p6 = scmp.lt.s32.totalorder %s13309_s27, %s13309_s27 }
  0x33   : > { %p13312_p8 = pnand %p13310_p7, %p13891_p0  ;;  %p13319_p5 = por %p13318_p6, %p13317_p9 }
  0x35   : > { %p13313_p11 = pneg %p13312_p8 }
  0x37   : > { %p13320_p10 = pnand %p13319_p5, %p13313_p11 }
  0x39   : > { %13323 = shalt.err (!%p13320_p10)
}
  0x3a   : > { %11662 = dma.hbm_to_vmem [thread:$0]  (!%p13875_p12), %s14673_s2, 96, %s369_s22, [#allocation8]  }
  0x3b   : > { %s14675_s4 = sld [smem:[#allocation40_spill]] }
  0x41   : > { %s13324_s21 = scalar_lea.hbm %s14675_s4, 18432 }
  0x42   : > { %p13325_p13 = scmp.ne.s32.totalorder %s14675_s4, %s13324_s21  ;;  %p13331_p5 = scmp.lt.u32.totalorder %s13324_s21, %s14675_s4 }
  0x44   : > { %p13327_p1 = pnand %p13325_p13, %p13891_p0 }
  0x46   : > { %p13328_p6 = pneg %p13327_p1 }
  0x48   : > { %p13333_p9 = pnand %p13331_p5, %p13328_p6 }
  0x4a   : > { %13336 = shalt.err (!%p13333_p9)
}
  0x4b   : > { %s13337_s22 = scalar_lea.vmem %s13879_s24, 18432  ;;  %p13345_p4 = scmp.lt.s32.totalorder %s13879_s24, %s13879_s24 }
  0x4c   : > { %p13338_p10 = scmp.ne.s32.totalorder %s13879_s24, %s13337_s22  ;;  %p13346_p7 = scmp.lt.s32.totalorder %s13337_s22, %s13337_s22 }
  0x4e   : > { %p13340_p2 = pnand %p13338_p10, %p13891_p0  ;;  %p13347_p8 = por %p13346_p7, %p13345_p4 }
  0x50   : > { %p13341_p3 = pneg %p13340_p2 }
  0x52   : > { %p13348_p11 = pnand %p13347_p8, %p13341_p3 }
  0x54   : > { %13351 = shalt.err (!%p13348_p11)
}
  0x55   : > { %s13727_s28 = smov 192   ;;  %s13728_s13 = smov 12  }
  0x56   : > { %11668 = dma.hbm_to_vmem [thread:$0]  (!%p13875_p12), %s14675_s4, 18432, %s13879_s24, [#allocation11], %s13727_s28, %s13727_s28, %s13728_s13  }
  0x57   : > { %s13352_s21 = scalar_lea.hbm %s14640_s6, 64 }
  0x58   : > { %p13353_p13 = scmp.ne.s32.totalorder %s14640_s6, %s13352_s21  ;;  %p13359_p5 = scmp.lt.u32.totalorder %s13352_s21, %s14640_s6 }
  0x5a   : > { %p13355_p1 = pnand %p13353_p13, %p13891_p0 }
  0x5c   : > { %p13356_p6 = pneg %p13355_p1 }
  0x5e   : > { %p13361_p9 = pnand %p13359_p5, %p13356_p6 }
  0x60   : > { %13364 = shalt.err (!%p13361_p9)
}
  0x61   : > { %s13365_s14 = scalar_lea.vmem %s419_s16, 64  ;;  %p13373_p4 = scmp.lt.s32.totalorder %s419_s16, %s419_s16 }
  0x62   : > { %p13366_p10 = scmp.ne.s32.totalorder %s419_s16, %s13365_s14  ;;  %p13374_p7 = scmp.lt.s32.totalorder %s13365_s14, %s13365_s14 }
  0x64   : > { %p13368_p2 = pnand %p13366_p10, %p13891_p0  ;;  %p13375_p8 = por %p13374_p7, %p13373_p4 }
  0x66   : > { %p13369_p3 = pneg %p13368_p2 }
  0x68   : > { %p13376_p11 = pnand %p13375_p8, %p13369_p3 }
  0x6a   : > { %13379 = shalt.err (!%p13376_p11)
}
  0x6b   : > { %11674 = dma.hbm_to_vmem [thread:$0]  (!%p13875_p12), %s14640_s6, 64, %s419_s16, [#allocation14]  }
  0x6c   : > { %s13729_s2 = smov [#allocation16]   ;;  %s13380_s19 = scalar_lea.hbm %s14642_s8, 8192 }
  0x6d   : > { %s439_s13 = sshll.u32 %s13729_s2, 4  ;;  %p13381_p13 = scmp.ne.s32.totalorder %s14642_s8, %s13380_s19  ;;  %s440_s13 = int_to_ptr.vmem [resolvable:$true] %s439_s13 }
  0x6e   : > { %p13387_p5 = scmp.lt.u32.totalorder %s13380_s19, %s14642_s8 }
  0x6f   : > { %p13383_p1 = pnand %p13381_p13, %p13891_p0 }
  0x71   : > { %p13384_p6 = pneg %p13383_p1 }
  0x73   : > { %p13389_p9 = pnand %p13387_p5, %p13384_p6 }
  0x75   : > { %13392 = shalt.err (!%p13389_p9)
}
  0x76   : > { %s13393_s16 = scalar_lea.vmem %s440_s13, 8192  ;;  %p13401_p4 = scmp.lt.s32.totalorder %s440_s13, %s440_s13 }
  0x77   : > { %p13394_p10 = scmp.ne.s32.totalorder %s440_s13, %s13393_s16  ;;  %p13402_p7 = scmp.lt.s32.totalorder %s13393_s16, %s13393_s16 }
  0x79   : > { %p13396_p2 = pnand %p13394_p10, %p13891_p0  ;;  %p13403_p8 = por %p13402_p7, %p13401_p4 }
  0x7b   : > { %p13397_p3 = pneg %p13396_p2 }
  0x7d   : > { %p13404_p11 = pnand %p13403_p8, %p13397_p3 }
  0x7f   : > { %13407 = shalt.err (!%p13404_p11)
}
  0x80   : > { %s13730_s14 = smov 128   ;;  %s13731_s24 = smov 8  }
  0x81   : > { %11680 = dma.hbm_to_vmem [thread:$0]  (!%p13875_p12), %s14642_s8, 8192, %s440_s13, [#allocation17], %s13730_s14, %s13730_s14, %s13731_s24  }
  0x82   : > { %s13732_s17 = smov [#allocation19]   ;;  %s13733_s19 = smov [#allocation4]  }
  0x83   : > { %s466_s25 = sshll.u32 %s13732_s17, 4  ;;  %s354_s21 = sshll.u32 %s13733_s19, 4  ;;  %s467_s25 = int_to_ptr.vmem [resolvable:$true] %s466_s25  ;;  %s13967_s21 = int_to_ptr.vmem [resolvable:$true] %s354_s21 }
  0x84   : > { %s13408_s22 = scalar_lea.hbm %s14644_s10, 64 }
  0x85   : > { %p13409_p13 = scmp.ne.s32.totalorder %s14644_s10, %s13408_s22  ;;  %p13415_p5 = scmp.lt.u32.totalorder %s13408_s22, %s14644_s10 }
  0x87   : > { %p13411_p1 = pnand %p13409_p13, %p13891_p0 }
  0x89   : > { %p13412_p6 = pneg %p13411_p1 }
  0x8b   : > { %p13417_p9 = pnand %p13415_p5, %p13412_p6 }
  0x8d   : > { %13420 = shalt.err (!%p13417_p9)
}
  0x8e   : > { %s13421_s14 = scalar_lea.vmem %s467_s25, 64  ;;  %p13429_p4 = scmp.lt.s32.totalorder %s467_s25, %s467_s25 }
  0x8f   : > { %p13422_p10 = scmp.ne.s32.totalorder %s467_s25, %s13421_s14  ;;  %p13430_p7 = scmp.lt.s32.totalorder %s13421_s14, %s13421_s14 }
  0x91   : > { %p13424_p2 = pnand %p13422_p10, %p13891_p0  ;;  %p13431_p8 = por %p13430_p7, %p13429_p4 }
  0x93   : > { %p13425_p3 = pneg %p13424_p2 }
  0x95   : > { %p13432_p11 = pnand %p13431_p8, %p13425_p3 }
  0x97   : > { %13435 = shalt.err (!%p13432_p11)
}
  0x98   : > { %11686 = dma.hbm_to_vmem [thread:$0]  (!%p13875_p12), %s14644_s10, 64, %s467_s25, [#allocation20]  }
  0x99   : > { %s13436_s19 = scalar_lea.hbm %s14635_s1, 7680 }
  0x9a   : > { %p13437_p13 = scmp.ne.s32.totalorder %s14635_s1, %s13436_s19  ;;  %p13443_p5 = scmp.lt.u32.totalorder %s13436_s19, %s14635_s1 }
  0x9c   : > { %p13439_p1 = pnand %p13437_p13, %p13891_p0 }
  0x9e   : > { %p13440_p6 = pneg %p13439_p1 }
  0xa0   : > { %p13445_p9 = pnand %p13443_p5, %p13440_p6 }
  0xa2   : > { %13448 = shalt.err (!%p13445_p9)
}
  0xa3   : > { %s13449_s25 = scalar_lea.vmem %s13967_s21, 7680  ;;  %p13457_p4 = scmp.lt.s32.totalorder %s13967_s21, %s13967_s21 }
  0xa4   : > { %p13450_p10 = scmp.ne.s32.totalorder %s13967_s21, %s13449_s25  ;;  %p13458_p7 = scmp.lt.s32.totalorder %s13449_s25, %s13449_s25 }
  0xa6   : > { %p13452_p2 = pnand %p13450_p10, %p13891_p0  ;;  %p13459_p8 = por %p13458_p7, %p13457_p4 }
  0xa8   : > { %p13453_p3 = pneg %p13452_p2 }
  0xaa   : > { %p13460_p11 = pnand %p13459_p8, %p13453_p3 }
  0xac   : > { %13463 = shalt.err (!%p13460_p11)
}
  0xad   : > { %s13734_s28 = smov 384   ;;  %s13735_s13 = smov 24  }
  0xae   : > { %11659 = dma.hbm_to_vmem [thread:$0]  (!%p13875_p12), %s14635_s1, 7680, %s13967_s21, [#allocation5], %s13734_s28, %s13734_s28, %s13735_s13  }
  0xaf   : > { %s13736_s24 = smov [#allocation9]   ;;  %s13464_s15 = scalar_lea.hbm %s14637_s3, 128 }
  0xb0   : > { %s378_s2 = sshll.u32 %s13736_s24, 4  ;;  %p13465_p13 = scmp.ne.s32.totalorder %s14637_s3, %s13464_s15  ;;  %s379_s2 = int_to_ptr.vmem [resolvable:$true] %s378_s2 }
  0xb1   : > { %p13471_p5 = scmp.lt.u32.totalorder %s13464_s15, %s14637_s3 }
  0xb2   : > { %p13467_p1 = pnand %p13465_p13, %p13891_p0 }
  0xb4   : > { %p13468_p6 = pneg %p13467_p1 }
  0xb6   : > { %p13473_p9 = pnand %p13471_p5, %p13468_p6 }
  0xb8   : > { %13476 = shalt.err (!%p13473_p9)
}
  0xb9   : > { %s13477_s21 = scalar_lea.vmem %s379_s2, 128  ;;  %p13485_p4 = scmp.lt.s32.totalorder %s379_s2, %s379_s2 }
  0xba   : > { %p13478_p10 = scmp.ne.s32.totalorder %s379_s2, %s13477_s21  ;;  %p13486_p7 = scmp.lt.s32.totalorder %s13477_s21, %s13477_s21 }
  0xbc   : > { %p13480_p2 = pnand %p13478_p10, %p13891_p0  ;;  %p13487_p8 = por %p13486_p7, %p13485_p4 }
  0xbe   : > { %p13481_p3 = pneg %p13480_p2 }
  0xc0   : > { %p13488_p11 = pnand %p13487_p8, %p13481_p3 }
  0xc2   : > { %13491 = shalt.err (!%p13488_p11)
}
  0xc3   : > { %s14658_s28 = smov 64   ;;  %s14659_s13 = smov 4  }
  0xc4   : > { %11665 = dma.hbm_to_vmem [thread:$0]  (!%p13875_p12), %s14637_s3, 128, %s379_s2, [#allocation8], %s14658_s28, %s14658_s28, %s14659_s13  }
  0xc5   : > { %s13739_s24 = smov [#allocation12]   ;;  %s13492_s27 = scalar_lea.hbm %s14639_s5, 61440 }
  0xc6   : > { %s404_s17 = sshll.u32 %s13739_s24, 4  ;;  %p13493_p13 = scmp.ne.s32.totalorder %s14639_s5, %s13492_s27  ;;  %s405_s17 = int_to_ptr.vmem [resolvable:$true] %s404_s17 }
  0xc7   : > { %p13499_p5 = scmp.lt.u32.totalorder %s13492_s27, %s14639_s5 }
  0xc8   : > { %p13495_p1 = pnand %p13493_p13, %p13891_p0 }
  0xca   : > { %p13496_p6 = pneg %p13495_p1 }
  0xcc   : > { %p13501_p9 = pnand %p13499_p5, %p13496_p6 }
  0xce   : > { %13504 = shalt.err (!%p13501_p9)
}
  0xcf   : > { %s13505_s2 = scalar_lea.vmem %s405_s17, 61440  ;;  %p13513_p4 = scmp.lt.s32.totalorder %s405_s17, %s405_s17 }
  0xd0   : > { %p13506_p10 = scmp.ne.s32.totalorder %s405_s17, %s13505_s2  ;;  %p13514_p7 = scmp.lt.s32.totalorder %s13505_s2, %s13505_s2 }
  0xd2   : > { %p13508_p2 = pnand %p13506_p10, %p13891_p0  ;;  %p13515_p8 = por %p13514_p7, %p13513_p4 }
  0xd4   : > { %p13509_p3 = pneg %p13508_p2 }
  0xd6   : > { %p13516_p11 = pnand %p13515_p8, %p13509_p3 }
  0xd8   : > { %13519 = shalt.err (!%p13516_p11)
}
  0xd9   : > { %s13740_s14 = smov 256   ;;  %s13741_s4 = smov 16  }
  0xda   : > { %11671 = dma.hbm_to_vmem [thread:$0]  (!%p13875_p12), %s14639_s5, 61440, %s405_s17, [#allocation11], %s13740_s14, %s13740_s14, %s13741_s4  }
  0xdb   : > { %s13742_s15 = smov [#allocation15]   ;;  %s13743_s22 = smov [#allocation18]  }
  0xdc   : > { %s429_s27 = sshll.u32 %s13742_s15, 4  ;;  %s452_s16 = sshll.u32 %s13743_s22, 4  ;;  %s430_s27 = int_to_ptr.vmem [resolvable:$true] %s429_s27  ;;  %s14052_s16 = int_to_ptr.vmem [resolvable:$true] %s452_s16 }
  0xdd   : > { %s13520_s2 = scalar_lea.hbm %s14641_s7, 32 }
  0xde   : > { %p13521_p13 = scmp.ne.s32.totalorder %s14641_s7, %s13520_s2  ;;  %p13527_p5 = scmp.lt.u32.totalorder %s13520_s2, %s14641_s7 }
  0xe0   : > { %p13523_p1 = pnand %p13521_p13, %p13891_p0 }
  0xe2   : > { %p13524_p6 = pneg %p13523_p1 }
  0xe4   : > { %p13529_p9 = pnand %p13527_p5, %p13524_p6 }
  0xe6   : > { %13532 = shalt.err (!%p13529_p9)
}
  0xe7   : > { %s13533_s19 = scalar_lea.vmem %s430_s27, 32  ;;  %p13541_p4 = scmp.lt.s32.totalorder %s430_s27, %s430_s27 }
  0xe8   : > { %p13534_p10 = scmp.ne.s32.totalorder %s430_s27, %s13533_s19  ;;  %p13542_p7 = scmp.lt.s32.totalorder %s13533_s19, %s13533_s19 }
  0xea   : > { %p13536_p2 = pnand %p13534_p10, %p13891_p0  ;;  %p13543_p8 = por %p13542_p7, %p13541_p4 }
  0xec   : > { %p13537_p3 = pneg %p13536_p2 }
  0xee   : > { %p13544_p11 = pnand %p13543_p8, %p13537_p3 }
  0xf0   : > { %13547 = shalt.err (!%p13544_p11)
}
  0xf1   : > { %11677 = dma.hbm_to_vmem [thread:$0]  (!%p13875_p12), %s14641_s7, 32, %s430_s27, [#allocation14]  }
  0xf2   : > { %s13548_s25 = scalar_lea.hbm %s14643_s9, 32768 }
  0xf3   : > { %p13549_p13 = scmp.ne.s32.totalorder %s14643_s9, %s13548_s25  ;;  %p13555_p5 = scmp.lt.u32.totalorder %s13548_s25, %s14643_s9 }
  0xf5   : > { %p13551_p1 = pnand %p13549_p13, %p13891_p0 }
  0xf7   : > { %p13552_p6 = pneg %p13551_p1 }
  0xf9   : > { %p13557_p9 = pnand %p13555_p5, %p13552_p6 }
  0xfb   : > { %13560 = shalt.err (!%p13557_p9)
}
  0xfc   : > { %s13561_s27 = scalar_lea.vmem %s14052_s16, 32768  ;;  %p13569_p4 = scmp.lt.s32.totalorder %s14052_s16, %s14052_s16 }
  0xfd   : > { %p13562_p10 = scmp.ne.s32.totalorder %s14052_s16, %s13561_s27  ;;  %p13570_p7 = scmp.lt.s32.totalorder %s13561_s27, %s13561_s27 }
  0xff   : > { %p13564_p2 = pnand %p13562_p10, %p13891_p0  ;;  %p13571_p8 = por %p13570_p7, %p13569_p4 }
 0x101   : > { %p13565_p3 = pneg %p13564_p2 }
 0x103   : > { %p13572_p11 = pnand %p13571_p8, %p13565_p3 }
 0x105   : > { %13575 = shalt.err (!%p13572_p11)
}
 0x106   : > { %11683 = dma.hbm_to_vmem [thread:$0]  (!%p13875_p12), %s14643_s9, 32768, %s14052_s16, [#allocation17], %s13740_s14, %s13740_s14, %s13741_s4  }
 0x107   : > { %s13744_s13 = smov [#allocation21]   ;;  %s13745_s22 = smov [#allocation22]  }
 0x108   : > { %s476_s15 = sshll.u32 %s13744_s13, 4  ;;  %s490_s25 = sshll.u32 %s13745_s22, 4  ;;  %s477_s15 = int_to_ptr.vmem [resolvable:$true] %s476_s15  ;;  %s14098_s25 = int_to_ptr.vmem [resolvable:$true] %s490_s25 }
 0x109   : > { %s13576_s24 = scalar_lea.hbm %s14645_s11, 4096 }
 0x10a   : > { %p13577_p13 = scmp.ne.s32.totalorder %s14645_s11, %s13576_s24  ;;  %p13583_p5 = scmp.lt.u32.totalorder %s13576_s24, %s14645_s11 }
 0x10c   : > { %p13579_p1 = pnand %p13577_p13, %p13891_p0 }
 0x10e   : > { %p13580_p6 = pneg %p13579_p1 }
 0x110   : > { %p13585_p9 = pnand %p13583_p5, %p13580_p6 }
 0x112   : > { %13588 = shalt.err (!%p13585_p9)
}
 0x113   : > { %s13589_s4 = scalar_lea.vmem %s477_s15, 4096  ;;  %p13597_p4 = scmp.lt.s32.totalorder %s477_s15, %s477_s15 }
 0x114   : > { %p13590_p10 = scmp.ne.s32.totalorder %s477_s15, %s13589_s4  ;;  %p13598_p7 = scmp.lt.s32.totalorder %s13589_s4, %s13589_s4 }
 0x116   : > { %p13592_p2 = pnand %p13590_p10, %p13891_p0  ;;  %p13599_p8 = por %p13598_p7, %p13597_p4 }
 0x118   : > { %p13593_p3 = pneg %p13592_p2 }
 0x11a   : > { %p13600_p11 = pnand %p13599_p8, %p13593_p3 }
 0x11c   : > { %13603 = shalt.err (!%p13600_p11)
}
 0x11d   : > { %s14676_s16 = smov 4   ;;  %s14677_s28 = smov 64  }
 0x11e   : > { %11689 = dma.hbm_to_vmem [thread:$0]  (!%p13875_p12), %s14645_s11, 4096, %s477_s15, [#allocation20], %s14677_s28, %s14677_s28, %s14676_s16  }
 0x11f   : > { %s13604_s24 = scalar_lea.hbm %s14646_s12, 16 }
 0x120   : > { %p13605_p13 = scmp.ne.s32.totalorder %s14646_s12, %s13604_s24  ;;  %p13611_p5 = scmp.lt.u32.totalorder %s13604_s24, %s14646_s12 }
 0x122   : > { %p13607_p1 = pnand %p13605_p13, %p13891_p0 }
 0x124   : > { %p13608_p6 = pneg %p13607_p1 }
 0x126   : > { %p13613_p9 = pnand %p13611_p5, %p13608_p6 }
 0x128   : > { %13616 = shalt.err (!%p13613_p9)
}
 0x129   : > { %s13617_s15 = scalar_lea.vmem %s14098_s25, 16  ;;  %s13624_s4 = scalar_lea.vmem %s14098_s25, 32 }
 0x12a   : > { %p13618_p10 = scmp.ne.s32.totalorder %s14098_s25, %s13617_s15  ;;  %p13625_p4 = scmp.lt.s32.totalorder %s14098_s25, %s14098_s25 }
 0x12b   : > { %p13626_p7 = scmp.lt.s32.totalorder %s13624_s4, %s13617_s15 }
 0x12c   : > { %p13620_p2 = pnand %p13618_p10, %p13891_p0 }
 0x12d   : > { %p13627_p8 = por %p13626_p7, %p13625_p4 }
 0x12e   : > { %p13621_p3 = pneg %p13620_p2 }
 0x130   : > { %p13628_p11 = pnand %p13627_p8, %p13621_p3 }
 0x132   : > { %13631 = shalt.err (!%p13628_p11)
}
 0x133   : > { %11692 = dma.hbm_to_vmem [thread:$0]  (!%p13875_p12), %s14646_s12, 16, %s14098_s25, [#allocation23]  }
 0x134   : > { %p14678_p13 = scmp.ne.s32.totalorder %s14671_s20, 0 }
 0x135   : > { %p14679_p0 = scmp.eq.s32.totalorder (!%p14678_p13), %s13839_s29, 0 }
 0x136   : > { %511 = sbr.rel (%p14678_p13) target bundleno = 3430 (0xd66), region = 72 }
 0x13d   : > { %13677 = dma.done.wait (%p14679_p0), [#allocation5], 7680   ;;  %p14680_p1 = pmov %p14679_p0 }
 0x13e   : > { %p14681_p6 = pmov %p14679_p0 }
 0x13f   : > { %13679 = vsyncadd (%p14680_p1), [#allocation5], 4294959616 }
 0x140   : > { %13681 = dma.done.wait (%p14681_p6), [#allocation8], 224   ;;  %p14682_p5 = pmov %p14679_p0 }
 0x141   : > { %p14683_p9 = pmov %p14679_p0 }
 0x142   : > { %13683 = vsyncadd (%p14682_p5), [#allocation8], 4294967072 }
 0x143   : > { %13685 = dma.done.wait (%p14683_p9), [#allocation11], 79872   ;;  %p14684_p12 = pmov %p14679_p0 }
 0x144   : > { %p14685_p10 = pmov %p14679_p0 }
 0x145   : > { %13687 = vsyncadd (%p14684_p12), [#allocation11], 4294887424 }
 0x146   : > { %13689 = dma.done.wait (%p14685_p10), [#allocation14], 96   ;;  %p14686_p2 = pmov %p14679_p0 }
 0x147   : > { %p14687_p3 = pmov %p14679_p0 }
 0x148   : > { %13691 = vsyncadd (%p14686_p2), [#allocation14], 4294967200 }
 0x149   : > { %13693 = dma.done.wait (%p14687_p3), [#allocation17], 40960   ;;  %p14688_p4 = pmov %p14679_p0 }
 0x14a   : > { %p14689_p7 = pmov %p14679_p0 }
 0x14b   : > { %13695 = vsyncadd (%p14688_p4), [#allocation17], 4294926336 }
 0x14c   : > { %13697 = dma.done.wait (%p14689_p7), [#allocation20], 4160   ;;  %p14690_p8 = pmov %p14679_p0 }
 0x14d   : > { %p14691_p11 = pmov %p14679_p0 }
 0x14e   : > { %13699 = vsyncadd (%p14690_p8), [#allocation20], 4294963136 }
 0x14f   : > { %13701 = dma.done.wait (%p14691_p11), [#allocation23], 16   ;;  %p14692_p13 = pmov %p14679_p0 }
 0x150   : > { %p598_p0 = scmp.lt.s32.totalorder %s13839_s29, 1  ;;  %v13746_v0 = vmov 0   ;;  %v11777_v1 = vld [vmem:[#allocation4 + $0x64] ss:$24 sps:$4 sm:$0xff]   ;;  %v11779_v2 = vld [vmem:[#allocation4 + $0x60] ss:$24 sps:$4 sm:$0xff]  }
 0x151   : > { %13703 = vsyncadd (%p14692_p13), [#allocation23], 4294967280  ;;  %751 = vmatprep.mubr.bf16.mxu0 %v13746_v0  ;;  %802 = vmatprep.mubr.bf16.mxu1 %v13746_v0  ;;  %vm700_vm0 = vcmask 1045504   ;;  %v11780_v3 = vld [vmem:[#allocation4 + $0x94] ss:$24 sps:$4 sm:$0x3f]  }
 0x152   : > { %s599_s20 = scalar_select %p598_p0, %s13839_s29, 1  ;;  %719 = vmatprep.subr.bf16.mxu0 %v11777_v1  ;;  %v11782_v4 = vld [vmem:[#allocation4 + $0x90] ss:$24 sps:$4 sm:$0x3f]   ;;  %v11785_v8 = vld [vmem:[#allocation4 + $0x74] ss:$24 sps:$4 sm:$0xff]  }
 0x153   : > { %720 = vmatpush1.bf16.msra.mxu0 %v11779_v2  ;;  %v702_v7 = vsel %vm700_vm0, %v11782_v4, 0  ;;  %v11783_v10 = vld [vmem:[#allocation4 + $0x70] ss:$24 sps:$4 sm:$0xff]   ;;  %vm693_vm1 = vcmask 228352   ;;  %v11791_v15 = vld [vmem:[#allocation4 + $0x4] ss:$24 sps:$4 sm:$0xff]  }
 0x154   : > { %s11435_s30 = sshll.u32 %s599_s20, 5  ;;  %10352 = vmatprep.subr.msk.bf16.mxu0 %vm700_vm0, %v11780_v3  ;;  %v11786_v11 = vld [vmem:[#allocation4 + $0xa4] ss:$24 sps:$4 sm:$0x3f]   ;;  %v11806_v18 = vld [vmem:[#allocation4 + $0x68] ss:$24 sps:$4 sm:$0xff]  }
 0x155   : > { %s14182_s13 = scalar_lea.vmem %s14634_s0, %s11435_s30  ;;  %v11788_v12 = vld [vmem:[#allocation4 + $0xa0] ss:$24 sps:$4 sm:$0x3f]   ;;  %v11804_v17 = vld [vmem:[#allocation4 + $0x6c] ss:$24 sps:$4 sm:$0xff]   ;;  %vm1995_vm2 = vcmask 1043456  }
 0x156   : > { %v621_v5 = vld [vmem:[%s14182_s13 + $0x1] sm:$0xff]  ;;  %v622_v6 = vld [vmem:[%s14182_s13 + $0x9] sm:$0xff]  ;;  %v623_v13 = vld [vmem:[%s14182_s13 + $0x11] sm:$0xff]  ;;  %v714_v14 = vsel %vm700_vm0, %v11788_v12, 0  ;;  %770 = vmatprep.subr.bf16.mxu1 %v11804_v17  ;;  %vm1991_vm3 = vcmask 195584   ;;  %vm7229_vm4 = vcmask 64512  }
 0x157   : > { %v624_v9 = vpack.c.bf16 %v622_v6, %v621_v5  ;;  %722 = vmatpush1.bf16.msra.mxu0 %v702_v7  ;;  %v625_v16 = vpack.c.bf16 %v623_v13, %v623_v13  ;;  %v11807_v19 = vld [vmem:[#allocation4 + $0x9c] ss:$24 sps:$4 sm:$0x3f]   ;;  %v11809_v20 = vld [vmem:[#allocation4 + $0x98] ss:$24 sps:$4 sm:$0x3f]   ;;  %771 = vmatpush1.bf16.msra.mxu1 %v11806_v18 }
 0x158   : > { %821 = vmatprep.subr.bf16.mxu0 %v11785_v8  ;;  %10355 = vmatprep.subr.msk.bf16.mxu1 %vm700_vm0, %v11807_v19  ;;  %v708_v21 = vsel %vm700_vm0, %v11809_v20, 0  ;;  %v11789_v22 = vld [vmem:[#allocation4] ss:$24 sps:$4 sm:$0xff]   ;;  %v11818_v23 = vld [vmem:[#allocation4 + $0xc] ss:$24 sps:$4 sm:$0xff]   ;;  %v605_v34 = vld [vmem:[%s14182_s13 + $0x8] sm:$0xff] }
 0x159   : > { %v11792_v24 = vld [vmem:[#allocation4 + $0x34] ss:$24 sps:$4 sm:$0x3f]   ;;  %v11794_v25 = vld [vmem:[#allocation4 + $0x30] ss:$24 sps:$4 sm:$0x3f]  }
 0x15a   : > { %10353 = vmatmul.mubr.msk.bf16.vlgmr.msra.gmra.mrb[0].mxu0 %vm693_vm1, %v624_v9  ;;  %v11816_v26 = vld [vmem:[#allocation4 + $0x8] ss:$24 sps:$4 sm:$0xff]   ;;  %v11819_v27 = vld [vmem:[#allocation4 + $0x3c] ss:$24 sps:$4 sm:$0x3f]   ;;  %v933_v29 = vsel %vm700_vm0, %v11794_v25, 0 }
 0x15b   : > { %822 = vmatpush1.bf16.msra.mxu0 %v11783_v10  ;;  %761 = vmatprep.mubr.bf16.mxu0 %v13746_v0  ;;  %v11821_v28 = vld [vmem:[#allocation4 + $0x38] ss:$24 sps:$4 sm:$0x3f]   ;;  %v11797_v30 = vld [vmem:[#allocation4 + $0x14] ss:$24 sps:$4 sm:$0xff]   ;;  %vm10111_vm6 = vcmask 1040384  }
 0x15c   : > { %10358 = vmatprep.subr.msk.bf16.mxu0 %vm700_vm0, %v11786_v11  ;;  %773 = vmatpush1.bf16.msra.mxu1 %v708_v21  ;;  %v939_v31 = vsel %vm700_vm0, %v11821_v28, 0  ;;  %v11830_v32 = vld [vmem:[#allocation4 + $0xcc] ss:$24 sps:$4 sm:$0xff]   ;;  %v11795_v36 = vld [vmem:[#allocation4 + $0x10] ss:$24 sps:$4 sm:$0xff]   ;;  %v606_v42 = vld [vmem:[%s14182_s13 + $0x10] sm:$0xff] }
 0x15d   : > { %1001 = vmatprep.subr.bf16.mxu1 %v11818_v23  ;;  %v604_v33 = vld [vmem:[%s14182_s13] sm:$0xff]  ;;  %v11798_v37 = vld [vmem:[#allocation4 + $0x44] ss:$24 sps:$4 sm:$0x3f]   ;;  %v608_v45 = vpack.c.bf16 %v606_v42, %v606_v42  ;;  %v1104_v49 = vld [vmem:[%s14182_s13 + $0xa] sm:$0xff]  ;;  %s596_s22 = sand.u32 1, %s13714_s26  }
 0x15e   : > { %v607_v35 = vpack.c.bf16 %v605_v34, %v604_v33  ;;  %v11800_v38 = vld [vmem:[#allocation4 + $0x40] ss:$24 sps:$4 sm:$0x3f]   ;;  %v11831_v40 = vld [vmem:[#allocation4 + $0xfc] ss:$24 sps:$4 sm:$0x3f]  }
 0x15f   : > { %824 = vmatpush1.bf16.msra.mxu0 %v714_v14  ;;  %10356 = vmatmul.mubr.msk.bf16.vlgmr.msra.gmra.mrb[0].mxu1 %vm693_vm1, %v624_v9  ;;  %v11828_v39 = vld [vmem:[#allocation4 + $0xc8] ss:$24 sps:$4 sm:$0xff]   ;;  %v11833_v41 = vld [vmem:[#allocation4 + $0xf8] ss:$24 sps:$4 sm:$0x3f]   ;;  %v945_v43 = vsel %vm700_vm0, %v11800_v38, 0 }
 0x160   : > { %950 = vmatprep.subr.bf16.mxu0 %v11791_v15  ;;  %812 = vmatprep.mubr.bf16.mxu1 %v13746_v0  ;;  %v11803_v44 = vld [vmem:[#allocation4 + $0xc4] ss:$24 sps:$4 sm:$0xff]   ;;  %v1188_v46 = vsel %vm700_vm0, %v11833_v41, 0  ;;  %v1103_v48 = vld [vmem:[%s14182_s13 + $0x2] sm:$0xff]  ;;  %v11801_v50 = vld [vmem:[#allocation4 + $0xc0] ss:$24 sps:$4 sm:$0xff]  }
 0x161   : > { %1002 = vmatpush1.bf16.msra.mxu1 %v11816_v26  ;;  %v11842_v47 = vld [vmem:[#allocation4 + $0x12c] ss:$24 sps:$4 sm:$0xff]   ;;  %v11812_v52 = vld [vmem:[#allocation4 + $0xf0] ss:$24 sps:$4 sm:$0x3f]   ;;  %v1106_v54 = vpack.c.bf16 %v1104_v49, %v1103_v48  ;;  %v1105_v58 = vld [vmem:[%s14182_s13 + $0x12] sm:$0xff] }
 0x162   : > { %10354 = vmatmul.mubr.msk.bf16.gmra.mrb[4].mxu0 %vm693_vm1, %v625_v16  ;;  %10376 = vmatprep.subr.msk.bf16.mxu1 %vm700_vm0, %v11819_v27  ;;  %v11810_v51 = vld [vmem:[#allocation4 + $0xf4] ss:$24 sps:$4 sm:$0x3f]   ;;  %v11840_v53 = vld [vmem:[#allocation4 + $0x128] ss:$24 sps:$4 sm:$0xff]   ;;  %v1182_v59 = vsel %vm700_vm0, %v11812_v52, 0  ;;  %v1107_v62 = vpack.c.bf16 %v1105_v58, %v1105_v58 }
 0x163   : > { %853 = vmatprep.mubr.bf16.mxu0 %v13746_v0  ;;  %v11843_v55 = vld [vmem:[#allocation4 + $0x15c] ss:$24 sps:$4 sm:$0x3f]   ;;  %v11845_v56 = vld [vmem:[#allocation4 + $0x158] ss:$24 sps:$4 sm:$0x3f]  }
 0x164   : > { %v11815_v57 = vld [vmem:[#allocation4 + $0xd4] ss:$24 sps:$4 sm:$0xff]   ;;  %v1455_v60 = vsel %vm700_vm0, %v11845_v56, 0  ;;  %v11813_v2 = vld [vmem:[#allocation4 + $0xd0] ss:$24 sps:$4 sm:$0xff]   ;;  %v1372_v10 = vld [vmem:[%s14182_s13 + $0x13] sm:$0xff] }
 0x165   : > { %1004 = vmatpush1.bf16.msra.mxu1 %v939_v31  ;;  %v11854_v61 = vld [vmem:[#allocation4 + $0x18c] ss:$24 sps:$4 sm:$0xff]   ;;  %v1371_v1 = vld [vmem:[%s14182_s13 + $0xb] sm:$0xff]  ;;  %v11852_v5 = vld [vmem:[#allocation4 + $0x188] ss:$24 sps:$4 sm:$0xff]   ;;  %v1374_v13 = vpack.c.bf16 %v1372_v10, %v1372_v10  ;;  %s11432_s21 = sshll.u32 %s13839_s29, 4 }
 0x166   : > { %1250 = vmatprep.subr.bf16.mxu1 %v11830_v32  ;;  %v1370_v63 = vld [vmem:[%s14182_s13 + $0x3] sm:$0xff]  ;;  %v11822_v3 = vld [vmem:[#allocation4 + $0x104] ss:$24 sps:$4 sm:$0x3f]   ;;  %v1638_v15 = vld [vmem:[%s14182_s13 + $0xc] sm:$0xff]  ;;  %s597_s2 = scalar_lea.vmem [#allocation24], %s596_s22 }
 0x167   : > { %10357 = vmatmul.mubr.msk.bf16.gmra.mrb[4].mxu1 %vm693_vm1, %v625_v16  ;;  %v11824_v4 = vld [vmem:[#allocation4 + $0x100] ss:$24 sps:$4 sm:$0x3f]   ;;  %v1373_v6 = vpack.c.bf16 %v1371_v1, %v1370_v63  ;;  %v11855_v7 = vld [vmem:[#allocation4 + $0x1bc] ss:$24 sps:$4 sm:$0x3f]  }
 0x168   : > { %1033 = vmatprep.mubr.bf16.mxu1 %v13746_v0  ;;  %v11857_v8 = vld [vmem:[#allocation4 + $0x1b8] ss:$24 sps:$4 sm:$0x3f]   ;;  %v1194_v11 = vsel %vm700_vm0, %v11824_v4, 0  ;;  %v11839_v20 = vld [vmem:[#allocation4 + $0x134] ss:$24 sps:$4 sm:$0xff]  }
 0x169   : > { %v1722_v12 = vsel %vm700_vm0, %v11857_v8, 0  ;;  %v1637_v14 = vld [vmem:[%s14182_s13 + $0x4] sm:$0xff]  ;;  %v1639_v21 = vld [vmem:[%s14182_s13 + $0x14] sm:$0xff]  ;;  %s10138_s24 = sshll.u32 %s597_s2, 4  ;;  %s14693_s19 = sld [smem:[#allocation41_spill]]  ;;  %s14594_s24 = int_to_ptr.vmem [resolvable:$true] %s10138_s24 }
 0x16a   : > { %10359 = vmatmul.mubr.msk.bf16.vlgmr.msra.gmra.mrb[8].mxu0 %vm693_vm1, %v624_v9  ;;  %v11827_v9 = vld [vmem:[#allocation4 + $0x124] ss:$24 sps:$4 sm:$0xff]   ;;  %v11834_v17 = vld [vmem:[#allocation4 + $0x154] ss:$24 sps:$4 sm:$0x3f]   ;;  %v1640_v19 = vpack.c.bf16 %v1638_v15, %v1637_v14  ;;  %v1641_v23 = vpack.c.bf16 %v1639_v21, %v1639_v21  ;;  %s10126_s15 = scalar_lea.sflag [#allocation6], %s596_s22 }
 0x16b   : > { %951 = vmatpush1.bf16.msra.mxu0 %v11789_v22  ;;  %863 = vmatprep.mubr.bf16.mxu0 %v13746_v0  ;;  %v11836_v18 = vld [vmem:[#allocation4 + $0x150] ss:$24 sps:$4 sm:$0x3f]   ;;  %v11846_v25 = vld [vmem:[#allocation4 + $0x164] ss:$24 sps:$4 sm:$0x3f]  }
 0x16c   : > { %10373 = vmatprep.subr.msk.bf16.mxu0 %vm700_vm0, %v11792_v24  ;;  %v1449_v22 = vsel %vm700_vm0, %v11836_v18, 0  ;;  %v11837_v24 = vld [vmem:[#allocation4 + $0x130] ss:$24 sps:$4 sm:$0xff]   ;;  %v11848_v26 = vld [vmem:[#allocation4 + $0x160] ss:$24 sps:$4 sm:$0x3f]  }
 0x16d   : > { %v11851_v27 = vld [vmem:[#allocation4 + $0x184] ss:$24 sps:$4 sm:$0xff]   ;;  %v1461_v28 = vsel %vm700_vm0, %v11848_v26, 0  ;;  %v11860_v31 = vld [vmem:[#allocation4 + $0x1b0] ss:$24 sps:$4 sm:$0x3f]  }
 0x16e   : > { %v11863_v32 = vld [vmem:[#allocation4 + $0x194] ss:$24 sps:$4 sm:$0xff]   ;;  %v1716_v33 = vsel %vm700_vm0, %v11860_v31, 0  ;;  %v11861_v34 = vld [vmem:[#allocation4 + $0x190] ss:$24 sps:$4 sm:$0xff]   ;;  %s13632_s4 = scalar_lea.vmem %s14594_s24, 16 }
 0x16f   : > { %953 = vmatpush1.bf16.msra.mxu0 %v933_v29  ;;  %10377 = vmatmul.mubr.msk.bf16.vlgmr.msra.gmra.mrb[0].mxu1 %vm693_vm1, %v607_v35  ;;  %v11849_v29 = vld [vmem:[#allocation4 + $0x180] ss:$24 sps:$4 sm:$0xff]   ;;  %s14592_s14 = scalar_lea.hbm %s14693_s19, %s11432_s21  ;;  %p13633_p1 = scmp.ne.s32.totalorder %s14594_s24, %s13632_s4 }
 0x170   : > { %1052 = vmatprep.subr.bf16.mxu0 %v11797_v30  ;;  %1043 = vmatprep.mubr.bf16.mxu1 %v13746_v0  ;;  %v11858_v30 = vld [vmem:[#allocation4 + $0x1b4] ss:$24 sps:$4 sm:$0x3f]   ;;  %v11900_v18 = vld [vmem:[#allocation10 + $0xe0] ss:$12 sps:$4 sm:$0xff]   ;;  %p14694_p6 = scmp.ne.s32.totalorder %s14668_s18, 0 }
 0x171   : > { %1251 = vmatpush1.bf16.msra.mxu1 %v11828_v39  ;;  %v11896_v14 = vld [vmem:[#allocation10 + $0x8] ss:$12 sps:$4 sm:$0xff]   ;;  %v11901_v31 = vld [vmem:[#allocation10 + $0x20] ss:$12 sps:$4 sm:$0xff]   ;;  %s13747_s29 = smov [#allocation24]  }
 0x172   : > { %10360 = vmatmul.mubr.msk.bf16.gmra.mrb[12].mxu0 %vm693_vm1, %v625_v16  ;;  %10397 = vmatprep.subr.msk.bf16.mxu1 %vm700_vm0, %v11831_v40  ;;  %v11825_v16 = vld [vmem:[#allocation4 + $0x120] ss:$24 sps:$4 sm:$0xff]   ;;  %p13634_p5 = pnand %p13633_p1, %p14694_p6  ;;  %s13636_s16 = sshll.u32 %s13747_s29, 4  ;;  %s13637_s16 = int_to_ptr.vmem [resolvable:$false] %s13636_s16 }
 0x173   : > { %982 = vmatprep.mubr.bf16.mxu0 %v13746_v0  ;;  %s13638_s28 = scalar_lea.vmem %s13637_s16, 32  ;;  %p13639_p12 = scmp.lt.s32.totalorder %s14594_s24, %s13637_s16 }
 0x174   : > { %p13635_p9 = pneg %p13634_p5  ;;  %p13640_p10 = scmp.lt.s32.totalorder %s13638_s28, %s13632_s4 }
 0x175   : > { %1253 = vmatpush1.bf16.msra.mxu1 %v1188_v46 }
 0x176   : > { %1517 = vmatprep.subr.bf16.mxu1 %v11842_v47  ;;  %p13641_p2 = por %p13640_p10, %p13639_p12 }
 0x177   : > { %10378 = vmatmul.mubr.msk.bf16.gmra.mrb[8].mxu1 %vm693_vm1, %v608_v45 }
 0x178   : > { %1282 = vmatprep.mubr.bf16.mxu1 %v13746_v0  ;;  %p13642_p3 = pnand %p13641_p2, %p13635_p9 }
 0x17a   : > { %10374 = vmatmul.mubr.msk.bf16.vlgmr.msra.gmra.mrb[0].mxu0 %vm693_vm1, %v607_v35 }
 0x17b   : > { %1053 = vmatpush1.bf16.msra.mxu0 %v11795_v36  ;;  %992 = vmatprep.mubr.bf16.mxu0 %v13746_v0  ;;  %v11866_v36 = vld [vmem:[#allocation4 + $0x1c0] ss:$24 sps:$4 sm:$0x3f]  }
 0x17c   : > { %10379 = vmatprep.subr.msk.bf16.mxu0 %vm700_vm0, %v11798_v37  ;;  %v1728_v37 = vsel %vm700_vm0, %v11866_v36, 0 }
 0x17f   : > { %1055 = vmatpush1.bf16.msra.mxu0 %v945_v43  ;;  %10398 = vmatmul.mubr.msk.bf16.vlgmr.msra.gmra.mrb[0].mxu1 %vm693_vm1, %v1106_v54 }
 0x180   : > { %1199 = vmatprep.subr.bf16.mxu0 %v11803_v44  ;;  %1292 = vmatprep.mubr.bf16.mxu1 %v13746_v0 }
 0x181   : > { %1518 = vmatpush1.bf16.msra.mxu1 %v11840_v53 }
 0x182   : > { %10375 = vmatmul.mubr.msk.bf16.gmra.mrb[16].mxu0 %vm693_vm1, %v608_v45  ;;  %10418 = vmatprep.subr.msk.bf16.mxu1 %vm700_vm0, %v11843_v55 }
 0x183   : > { %1084 = vmatprep.mubr.bf16.mxu0 %v13746_v0 }
 0x185   : > { %1520 = vmatpush1.bf16.msra.mxu1 %v1455_v60 }
 0x186   : > { %1784 = vmatprep.subr.bf16.mxu1 %v11854_v61 }
 0x187   : > { %10399 = vmatmul.mubr.msk.bf16.gmra.mrb[12].mxu1 %vm693_vm1, %v1107_v62 }
 0x188   : > { %1549 = vmatprep.mubr.bf16.mxu1 %v13746_v0 }
 0x18a   : > { %10380 = vmatmul.mubr.msk.bf16.vlgmr.msra.gmra.mrb[8].mxu0 %vm693_vm1, %v607_v35  ;;  %v11864_v35 = vld [vmem:[#allocation4 + $0x1c4] ss:$24 sps:$4 sm:$0x3f]  }
 0x18b   : > { %1200 = vmatpush1.bf16.msra.mxu0 %v11801_v50  ;;  %1094 = vmatprep.mubr.bf16.mxu0 %v13746_v0 }
 0x18c   : > { %10394 = vmatprep.subr.msk.bf16.mxu0 %vm700_vm0, %v11810_v51 }
 0x18f   : > { %1202 = vmatpush1.bf16.msra.mxu0 %v1182_v59  ;;  %10419 = vmatmul.mubr.msk.bf16.vlgmr.msra.gmra.mrb[0].mxu1 %vm693_vm1, %v1373_v6 }
 0x190   : > { %1301 = vmatprep.subr.bf16.mxu0 %v11815_v57  ;;  %1559 = vmatprep.mubr.bf16.mxu1 %v13746_v0 }
 0x191   : > { %1785 = vmatpush1.bf16.msra.mxu1 %v11852_v5 }
 0x192   : > { %10381 = vmatmul.mubr.msk.bf16.gmra.mrb[20].mxu0 %vm693_vm1, %v608_v45  ;;  %10439 = vmatprep.subr.msk.bf16.mxu1 %vm700_vm0, %v11855_v7 }
 0x193   : > { %1231 = vmatprep.mubr.bf16.mxu0 %v13746_v0 }
 0x195   : > { %1787 = vmatpush1.bf16.msra.mxu1 %v1722_v12  ;;  %v11895_v12 = vld [vmem:[#allocation10 + $0xc8] ss:$12 sps:$4 sm:$0xff]  }
 0x197   : > { %10420 = vmatmul.mubr.msk.bf16.gmra.mrb[16].mxu1 %vm693_vm1, %v1374_v13 }
 0x198   : > { %1816 = vmatprep.mubr.bf16.mxu1 %v13746_v0 }
 0x19a   : > { %10395 = vmatmul.mubr.msk.bf16.vlgmr.msra.gmra.mrb[0].mxu0 %vm693_vm1, %v1106_v54 }
 0x19b   : > { %1302 = vmatpush1.bf16.msra.mxu0 %v11813_v2  ;;  %1241 = vmatprep.mubr.bf16.mxu0 %v13746_v0 }
 0x19c   : > { %10400 = vmatprep.subr.msk.bf16.mxu0 %vm700_vm0, %v11822_v3 }
 0x19f   : > { %1304 = vmatpush1.bf16.msra.mxu0 %v1194_v11  ;;  %10440 = vmatmul.mubr.msk.bf16.vlgmr.msra.gmra.mrb[0].mxu1 %vm693_vm1, %v1640_v19  ;;  %v1906_v11 = vlaneseq }
 0x1a0   : > { %1466 = vmatprep.subr.bf16.mxu0 %v11827_v9  ;;  %1826 = vmatprep.mubr.bf16.mxu1 %v13746_v0 }
 0x1a2   : > { %10396 = vmatmul.mubr.msk.bf16.gmra.mrb[24].mxu0 %vm693_vm1, %v1107_v62 }
 0x1a3   : > { %1333 = vmatprep.mubr.bf16.mxu0 %v13746_v0 }
 0x1a7   : > { %10441 = vmatmul.mubr.msk.bf16.gmra.mrb[20].mxu1 %vm693_vm1, %v1641_v23 }
 0x1a8   : > { %2046 = vmatprep.mubr.bf16.mxu1 %v13746_v0 }
 0x1aa   : > { %10401 = vmatmul.mubr.msk.bf16.vlgmr.msra.gmra.mrb[8].mxu0 %vm693_vm1, %v1106_v54 }
 0x1ab   : > { %1467 = vmatpush1.bf16.msra.mxu0 %v11825_v16  ;;  %1343 = vmatprep.mubr.bf16.mxu0 %v13746_v0 }
 0x1ac   : > { %10415 = vmatprep.subr.msk.bf16.mxu0 %vm700_vm0, %v11834_v17  ;;  %v14295_v17 = vld [vmem:[#allocation7] sm:$0x3f] }
 0x1af   : > { %1469 = vmatpush1.bf16.msra.mxu0 %v1449_v22 }
 0x1b0   : > { %1568 = vmatprep.subr.bf16.mxu0 %v11839_v20 }
 0x1b2   : > { %10402 = vmatmul.mubr.msk.bf16.gmra.mrb[28].mxu0 %vm693_vm1, %v1107_v62 }
 0x1b3   : > { %1498 = vmatprep.mubr.bf16.mxu0 %v13746_v0 }
 0x1ba   : > { %10416 = vmatmul.mubr.msk.bf16.vlgmr.msra.gmra.mrb[0].mxu0 %vm693_vm1, %v1373_v6 }
 0x1bb   : > { %1569 = vmatpush1.bf16.msra.mxu0 %v11837_v24  ;;  %1508 = vmatprep.mubr.bf16.mxu0 %v13746_v0 }
 0x1bc   : > { %10421 = vmatprep.subr.msk.bf16.mxu0 %vm700_vm0, %v11846_v25 }
 0x1bf   : > { %1571 = vmatpush1.bf16.msra.mxu0 %v1461_v28 }
 0x1c0   : > { %1733 = vmatprep.subr.bf16.mxu0 %v11851_v27 }
 0x1c2   : > { %10417 = vmatmul.mubr.msk.bf16.gmra.mrb[32].mxu0 %vm693_vm1, %v1374_v13 }
 0x1c3   : > { %1600 = vmatprep.mubr.bf16.mxu0 %v13746_v0 }
 0x1ca   : > { %10422 = vmatmul.mubr.msk.bf16.vlgmr.msra.gmra.mrb[8].mxu0 %vm693_vm1, %v1373_v6 }
 0x1cb   : > { %1734 = vmatpush1.bf16.msra.mxu0 %v11849_v29  ;;  %1610 = vmatprep.mubr.bf16.mxu0 %v13746_v0 }
 0x1cc   : > { %10436 = vmatprep.subr.msk.bf16.mxu0 %vm700_vm0, %v11858_v30 }
 0x1cf   : > { %1736 = vmatpush1.bf16.msra.mxu0 %v1716_v33 }
 0x1d0   : > { %1835 = vmatprep.subr.bf16.mxu0 %v11863_v32  ;;  %v11905_v32 = vld [vmem:[#allocation10 + $0xf8] ss:$12 sps:$4 sm:$0xff]  }
 0x1d2   : > { %10423 = vmatmul.mubr.msk.bf16.gmra.mrb[36].mxu0 %vm693_vm1, %v1374_v13  ;;  %v14293_v13 = vshrl.u32 %v1906_v11, 7 }
 0x1d3   : > { %1765 = vmatprep.mubr.bf16.mxu0 %v13746_v0 }
 0x1d4   : > { %v14303_v28 = vsub.s32 3, %v14293_v13 }
 0x1da   : > { %10437 = vmatmul.mubr.msk.bf16.vlgmr.msra.gmra.mrb[0].mxu0 %vm693_vm1, %v1640_v19 }
 0x1db   : > { %1775 = vmatprep.mubr.bf16.mxu0 %v13746_v0  ;;  %1836 = vmatpush1.bf16.msra.mxu0 %v11861_v34  ;;  %v14311_v34 = vrot.slane %v14295_v17, %v14303_v28 }
 0x1dc   : > { %10442 = vmatprep.subr.msk.bf16.mxu0 %vm700_vm0, %v11864_v35  ;;  %v11906_v35 = vld [vmem:[#allocation10 + $0x38] ss:$12 sps:$4 sm:$0xff]  }
 0x1df   : > { %1838 = vmatpush1.bf16.msra.mxu0 %v1728_v37  ;;  %v11910_v37 = vld [vmem:[#allocation10 + $0x110] ss:$12 sps:$4 sm:$0xff]  }
 0x1e0   : > { %11436 = vmatprep.subr.bf16.mxu0 %v11895_v12 }
 0x1e2   : > { %10438 = vmatmul.mubr.msk.bf16.gmra.mrb[40].mxu0 %vm693_vm1, %v1641_v23 }
 0x1e3   : > { %1867 = vmatprep.mubr.bf16.mxu0 %v13746_v0 }
 0x1ea   : > { %10443 = vmatmul.mubr.msk.bf16.vlgmr.msra.gmra.mrb[8].mxu0 %vm693_vm1, %v1640_v19 }
 0x1eb   : > { %1877 = vmatprep.mubr.bf16.mxu0 %v13746_v0  ;;  %11437 = vmatpush3.bf16.msra.mxu0 %v11896_v14 }
 0x1ec   : > { %11438 = vmatprep.subr.bf16.mxu0 %v11900_v18 }
 0x1ef   : > { %11439 = vmatpush3.bf16.msra.mxu0 %v11901_v31 }
 0x1f0   : > { %11440 = vmatprep.subr.bf16.mxu0 %v11905_v32 }
 0x1f2   : > { %10444 = vmatmul.mubr.msk.bf16.gmra.mrb[44].mxu0 %vm693_vm1, %v1641_v23  ;;  %v14300_v23 = vsub.s32 2, %v14293_v13 }
 0x1f3   : > { %11441 = vmatpush3.bf16.msra.mxu0 %v11906_v35 }
 0x1f4   : > { %v14307_v33 = vrot.slane %v14295_v17, %v14300_v23  ;;  %11442 = vmatprep.subr.bf16.mxu0 %v11910_v37 }
 0x235   : > { %v763_v38 = vpop.f32.mrb[4].mxu0 }
 0x236   : > { %v765_v39 = vpop.f32.mrb[5].mxu0 }
 0x237   : > { %v767_v40 = vpop.f32.mrb[6].mxu0 }
 0x238   : > { %v768_v41 = vpop.f32.mrb[7].mxu0 }
 0x23a   : > { %v814_v43 = vpop.f32.mrb[4].mxu1 }
 0x23b   : > { %v816_v45 = vpop.f32.mrb[5].mxu1 }
 0x23c   : > { %v818_v47 = vpop.f32.mrb[6].mxu1 }
 0x23d   : > { %v819_v49 = vpop.f32.mrb[7].mxu1 }
 0x245   : > { %v865_v42 = vpop.f32.mrb[12].mxu0 }
 0x246   : > { %v867_v44 = vpop.f32.mrb[13].mxu0 }
 0x247   : > { %v869_v46 = vpop.f32.mrb[14].mxu0 }
 0x248   : > { %v870_v48 = vpop.f32.mrb[15].mxu0 }
 0x249   : > { %v11915_v48 = vld [vmem:[#allocation10 + $0x128] ss:$12 sps:$4 sm:$0xff]  }
 0x24a   : > { %v1045_v51 = vpop.f32.mrb[8].mxu1 }
 0x24b   : > { %v1046_v54 = vadd.f32 %v1045_v51, %v814_v43  ;;  %v1047_v55 = vpop.f32.mrb[9].mxu1 }
 0x24c   : > { %v1048_v58 = vadd.f32 %v1047_v55, %v816_v45  ;;  %v1049_v59 = vpop.f32.mrb[10].mxu1  ;;  %v11911_v45 = vld [vmem:[#allocation10 + $0x50] ss:$12 sps:$4 sm:$0xff]  }
 0x24d   : > { %v1050_v61 = vpop.f32.mrb[11].mxu1  ;;  %11443 = vmatpush3.bf16.msra.mxu0 %v11911_v45 }
 0x24e   : > { %11444 = vmatprep.subr.bf16.mxu0 %v11915_v48 }
 0x255   : > { %v994_v50 = vpop.f32.mrb[16].mxu0 }
 0x256   : > { %v995_v52 = vadd.f32 %v994_v50, %v763_v38  ;;  %v996_v53 = vpop.f32.mrb[17].mxu0 }
 0x257   : > { %v997_v56 = vadd.f32 %v996_v53, %v765_v39  ;;  %v998_v57 = vpop.f32.mrb[18].mxu0 }
 0x258   : > { %v999_v60 = vpop.f32.mrb[19].mxu0 }
 0x25a   : > { %v1294_v63 = vpop.f32.mrb[12].mxu1 }
 0x25b   : > { %v1366_v3 = vadd.f32 %v1294_v63, %v1046_v54  ;;  %v1296_v4 = vpop.f32.mrb[13].mxu1 }
 0x25c   : > { %v1367_v7 = vadd.f32 %v1296_v4, %v1048_v58  ;;  %v1298_v8 = vpop.f32.mrb[14].mxu1 }
 0x25d   : > { %v1299_v10 = vpop.f32.mrb[15].mxu1  ;;  %v11926_v8 = vld [vmem:[#allocation10 + $0x98] ss:$12 sps:$4 sm:$0xff]  }
 0x265   : > { %v1096_v62 = vpop.f32.mrb[20].mxu0 }
 0x266   : > { %v14288_v1 = vadd.f32 %v1096_v62, %v865_v42  ;;  %v1098_v2 = vpop.f32.mrb[21].mxu0 }
 0x267   : > { %v14290_v5 = vadd.f32 %v1098_v2, %v867_v44  ;;  %v1100_v6 = vpop.f32.mrb[22].mxu0 }
 0x268   : > { %v1101_v9 = vpop.f32.mrb[23].mxu0  ;;  %v11921_v6 = vld [vmem:[#allocation10 + $0x80] ss:$12 sps:$4 sm:$0xff]  }
 0x26a   : > { %v1561_v16 = vpop.f32.mrb[16].mxu1 }
 0x26b   : > { %v1633_v21 = vadd.f32 %v1561_v16, %v1366_v3  ;;  %v1563_v22 = vpop.f32.mrb[17].mxu1 }
 0x26c   : > { %v1634_v26 = vadd.f32 %v1563_v22, %v1367_v7  ;;  %v1565_v27 = vpop.f32.mrb[18].mxu1  ;;  %v11925_v7 = vld [vmem:[#allocation10 + $0x158] ss:$12 sps:$4 sm:$0xff]  }
 0x26d   : > { %v1566_v30 = vpop.f32.mrb[19].mxu1 }
 0x272   : > { %v1818_v36 = vpop.f32.mrb[0].mxu1 }
 0x273   : > { %v1938_v38 = vadd.f32 %v14307_v33, %v1818_v36  ;;  %v1820_v39 = vpop.f32.mrb[1].mxu1 }
 0x274   : > { %v1939_v40 = vadd.f32 %v14311_v34, %v1820_v39  ;;  %v1822_v41 = vpop.f32.mrb[2].mxu1 }
 0x275   : > { %v1243_v15 = vpop.f32.mrb[24].mxu0  ;;  %v1956_v42 = vmax.f32 %v1938_v38, 0.0  ;;  %v1944_v43 = vadd.f32 %v14307_v33, %v1822_v41  ;;  %v1824_v44 = vpop.f32.mrb[3].mxu1 }
 0x276   : > { %v14297_v19 = vadd.f32 %v1243_v15, %v995_v52  ;;  %v1245_v20 = vpop.f32.mrb[25].mxu0  ;;  %v1957_v46 = vmax.f32 %v1939_v40, 0.0  ;;  %v1945_v47 = vadd.f32 %v14311_v34, %v1824_v44  ;;  %v11916_v52 = vld [vmem:[#allocation10 + $0x68] ss:$12 sps:$4 sm:$0xff]  }
 0x277   : > { %v1365_v24 = vadd.f32 %v1245_v20, %v997_v56  ;;  %v1247_v25 = vpop.f32.mrb[26].mxu0  ;;  %v1962_v49 = vmax.f32 %v1944_v43, 0.0  ;;  %v11920_v56 = vld [vmem:[#allocation10 + $0x140] ss:$12 sps:$4 sm:$0xff]   ;;  %11445 = vmatpush3.bf16.msra.mxu0 %v11916_v52  ;;  %v14327_v20 = vsub.s32 0, %v14293_v13 }
 0x278   : > { %v1248_v29 = vpop.f32.mrb[27].mxu0  ;;  %v1963_v50 = vmax.f32 %v1945_v47, 0.0  ;;  %11446 = vmatprep.subr.bf16.mxu0 %v11920_v56  ;;  %v14332_v25 = vsub.s32 1, %v14293_v13  ;;  %v1924_v47 = vsub.s32 4, %v14293_v13 }
 0x279   : > { %v14317_v51 = vpack.c.bf16 %v1962_v49, %v1956_v42 }
 0x27a   : > { %v14319_v54 = vpack.c.bf16 %v1963_v50, %v1957_v46  ;;  %v1828_v55 = vpop.f32.mrb[20].mxu1  ;;  %v1928_v50 = vsub.s32 5, %v14293_v13  ;;  %v11867_v13 = vld [vmem:[#allocation9] sm:$0x3f]  }
 0x27b   : > { %v1900_v59 = vadd.f32 %v1828_v55, %v1633_v21  ;;  %v1830_v60 = vpop.f32.mrb[21].mxu1  ;;  %11447 = vmatpush3.bf16.msra.mxu0 %v11921_v6 }
 0x27c   : > { %v1901_v63 = vadd.f32 %v1830_v60, %v1634_v26  ;;  %v1832_v2 = vpop.f32.mrb[22].mxu1  ;;  %11448 = vmatprep.subr.bf16.mxu0 %v11925_v7 }
 0x27d   : > { %v1833_v4 = vpop.f32.mrb[23].mxu1 }
 0x27e   : > { %v1951_v56 = vadd.f32 %v14311_v34, %v1901_v63 }
 0x27f   : > { %11449 = vmatpush3.bf16.msra.mxu0 %v11926_v8 }
 0x280   : > { %v1969_v4 = vmax.f32 %v1951_v56, 0.0  ;;  %v11894_v56 = vld [vmem:[#allocation10 + $0xc4] ss:$12 sps:$4 sm:$0xff]  }
 0x285   : > { %v1345_v53 = vpop.f32.mrb[28].mxu0 }
 0x286   : > { %v1368_v57 = vadd.f32 %v1345_v53, %v14288_v1  ;;  %v1347_v58 = vpop.f32.mrb[29].mxu0 }
 0x287   : > { %v1369_v61 = vadd.f32 %v1347_v58, %v14290_v5  ;;  %v1349_v62 = vpop.f32.mrb[30].mxu0  ;;  %v1925_v58 = vrot.slane %v14295_v17, %v1924_v47  ;;  %v11880_v47 = vld [vmem:[#allocation10 + $0x60] ss:$12 sps:$4 sm:$0xff]  }
 0x288   : > { %v1350_v3 = vpop.f32.mrb[31].mxu0  ;;  %v1929_v62 = vrot.slane %v14295_v17, %v1928_v50  ;;  %v11888_v50 = vld [vmem:[#allocation10 + $0x94] ss:$12 sps:$4 sm:$0xff]  }
 0x295   : > { %v1510_v9 = vpop.f32.mrb[32].mxu0 }
 0x296   : > { %v1631_v1 = vadd.f32 %v1510_v9, %v14297_v19  ;;  %v1512_v10 = vpop.f32.mrb[33].mxu0  ;;  %v1909_v19 = vrot.slane %v14295_v17, %v14327_v20 }
 0x297   : > { %v1632_v12 = vadd.f32 %v1512_v10, %v1365_v24  ;;  %v1514_v14 = vpop.f32.mrb[34].mxu0  ;;  %v1913_v24 = vrot.slane %v14295_v17, %v14332_v25  ;;  %v1983_v17 = vpack.c.bf16 %v1969_v4, %v1969_v4  ;;  %v11914_v4 = vld [vmem:[#allocation10 + $0x124] ss:$12 sps:$4 sm:$0xff]  }
 0x298   : > { %v1515_v15 = vpop.f32.mrb[35].mxu0 }
 0x2a5   : > { %v1612_v5 = vpop.f32.mrb[36].mxu0 }
 0x2a6   : > { %v14324_v16 = vadd.f32 %v1612_v5, %v1368_v57  ;;  %v1614_v18 = vpop.f32.mrb[37].mxu0 }
 0x2a7   : > { %v14329_v21 = vadd.f32 %v1614_v18, %v1369_v61  ;;  %v1616_v22 = vpop.f32.mrb[38].mxu0  ;;  %v1950_v61 = vadd.f32 %v14307_v33, %v1900_v59 }
 0x2a8   : > { %v1617_v26 = vpop.f32.mrb[39].mxu0 }
 0x2ad   : > { %v1767_v27 = vpop.f32.mrb[0].mxu0 }
 0x2ae   : > { %v1936_v29 = vadd.f32 %v1909_v19, %v1767_v27  ;;  %v1769_v30 = vpop.f32.mrb[1].mxu0 }
 0x2af   : > { %v1937_v31 = vadd.f32 %v1913_v24, %v1769_v30  ;;  %v1771_v32 = vpop.f32.mrb[2].mxu0 }
 0x2b0   : > { %v1942_v35 = vadd.f32 %v1909_v19, %v1771_v32  ;;  %v1773_v36 = vpop.f32.mrb[3].mxu0  ;;  %v1954_v38 = vmax.f32 %v1936_v29, 0.0 }
 0x2b1   : > { %v1943_v37 = vadd.f32 %v1913_v24, %v1773_v36  ;;  %v1955_v40 = vmax.f32 %v1937_v31, 0.0 }
 0x2b2   : > { %v1960_v39 = vmax.f32 %v1942_v35, 0.0 }
 0x2b3   : > { %v1961_v41 = vmax.f32 %v1943_v37, 0.0  ;;  %v11870_v37 = vld [vmem:[#allocation10 + $0x4] ss:$12 sps:$4 sm:$0xff]  }
 0x2b4   : > { %v1974_v42 = vpack.c.bf16 %v1960_v39, %v1954_v38  ;;  %v11868_v39 = vld [vmem:[#allocation10] ss:$12 sps:$4 sm:$0xff]  }
 0x2b5   : > { %v1975_v43 = vpack.c.bf16 %v1961_v41, %v1955_v40  ;;  %v1777_v44 = vpop.f32.mrb[40].mxu0  ;;  %v11873_v40 = vld [vmem:[#allocation10 + $0x1c] ss:$12 sps:$4 sm:$0xff]   ;;  %v11871_v41 = vld [vmem:[#allocation10 + $0x18] ss:$12 sps:$4 sm:$0xff]  }
 0x2b6   : > { %v1898_v45 = vadd.f32 %v1777_v44, %v1631_v1  ;;  %v1779_v46 = vpop.f32.mrb[41].mxu0  ;;  %v1968_v1 = vmax.f32 %v1950_v61, 0.0  ;;  %v11879_v44 = vld [vmem:[#allocation10 + $0x4c] ss:$12 sps:$4 sm:$0xff]   ;;  %v11904_v61 = vld [vmem:[#allocation10 + $0xf4] ss:$12 sps:$4 sm:$0xff]  }
 0x2b7   : > { %v1899_v48 = vadd.f32 %v1779_v46, %v1632_v12  ;;  %v1781_v49 = vpop.f32.mrb[42].mxu0  ;;  %2014 = vmatprep.subr.bf16.mxu1 %v1975_v43  ;;  %v11874_v43 = vld [vmem:[#allocation10 + $0x30] ss:$12 sps:$4 sm:$0xff]  }
 0x2b8   : > { %v1948_v52 = vadd.f32 %v1909_v19, %v1898_v45  ;;  %v1782_v53 = vpop.f32.mrb[43].mxu0  ;;  %2015 = vmatpush1.bf16.msra.mxu1 %v1974_v42  ;;  %v1982_v15 = vpack.c.bf16 %v1968_v1, %v1968_v1  ;;  %v11876_v42 = vld [vmem:[#allocation10 + $0x34] ss:$12 sps:$4 sm:$0xff]   ;;  %v11882_v46 = vld [vmem:[#allocation10 + $0x64] ss:$12 sps:$4 sm:$0xff]  }
 0x2b9   : > { %v1949_v55 = vadd.f32 %v1913_v24, %v1899_v48  ;;  %v11877_v45 = vld [vmem:[#allocation10 + $0x48] ss:$12 sps:$4 sm:$0xff]   ;;  %v11883_v49 = vld [vmem:[#allocation10 + $0x78] ss:$12 sps:$4 sm:$0xff]  }
 0x2ba   : > { %v1966_v57 = vmax.f32 %v1948_v52, 0.0  ;;  %v2003_v29 = vsel %vm1995_vm2, %v1982_v15, 0  ;;  %v11885_v48 = vld [vmem:[#allocation10 + $0x7c] ss:$12 sps:$4 sm:$0xff]   ;;  %v11891_v53 = vld [vmem:[#allocation10 + $0xac] ss:$12 sps:$4 sm:$0xff]  }
 0x2bb   : > { %v1967_v60 = vmax.f32 %v1949_v55, 0.0  ;;  %v11886_v52 = vld [vmem:[#allocation10 + $0x90] ss:$12 sps:$4 sm:$0xff]   ;;  %v11889_v55 = vld [vmem:[#allocation10 + $0xa8] ss:$12 sps:$4 sm:$0xff]  }
 0x2bc   : > { %v1980_v2 = vpack.c.bf16 %v1966_v57, %v1966_v57  ;;  %v11892_v57 = vld [vmem:[#allocation10 + $0xc0] ss:$12 sps:$4 sm:$0xff]  }
 0x2bd   : > { %v1981_v3 = vpack.c.bf16 %v1967_v60, %v1967_v60  ;;  %v1869_v6 = vpop.f32.mrb[8].mxu0  ;;  %v11897_v60 = vld [vmem:[#allocation10 + $0xd8] ss:$12 sps:$4 sm:$0xff]  }
 0x2be   : > { %v1940_v7 = vadd.f32 %v1925_v58, %v1869_v6  ;;  %v1871_v8 = vpop.f32.mrb[9].mxu0  ;;  %v1997_v9 = vsel %vm1995_vm2, %v1980_v2, 0  ;;  %v11909_v2 = vld [vmem:[#allocation10 + $0x10c] ss:$12 sps:$4 sm:$0xff]  }
 0x2bf   : > { %v1941_v34 = vadd.f32 %v1929_v62, %v1871_v8  ;;  %v1873_v63 = vpop.f32.mrb[10].mxu0  ;;  %10446 = vmatprep.subr.msk.bf16.mxu1 %vm1995_vm2, %v1981_v3  ;;  %v11907_v3 = vld [vmem:[#allocation10 + $0x108] ss:$12 sps:$4 sm:$0xff]   ;;  %v11912_v6 = vld [vmem:[#allocation10 + $0x120] ss:$12 sps:$4 sm:$0xff]  }
 0x2c0   : > { %v1946_v10 = vadd.f32 %v1925_v58, %v1873_v63  ;;  %v1875_v12 = vpop.f32.mrb[11].mxu0  ;;  %2017 = vmatpush1.bf16.msra.mxu1 %v1997_v9  ;;  %v1958_v59 = vmax.f32 %v1940_v7, 0.0  ;;  %v11917_v7 = vld [vmem:[#allocation10 + $0x138] ss:$12 sps:$4 sm:$0xff]   ;;  %v11924_v8 = vld [vmem:[#allocation10 + $0x154] ss:$12 sps:$4 sm:$0xff]  }
 0x2c1   : > { %v1947_v33 = vadd.f32 %v1929_v62, %v1875_v12  ;;  %2057 = vmatprep.subr.bf16.mxu1 %v14319_v54  ;;  %v1959_v5 = vmax.f32 %v1941_v34, 0.0  ;;  %v11922_v9 = vld [vmem:[#allocation10 + $0x150] ss:$12 sps:$4 sm:$0xff]   ;;  %v11929_v1 = vld [vmem:[#allocation10 + $0x16c] ss:$12 sps:$4 sm:$0xff]  }
 0x2c2   : > { %v1964_v14 = vmax.f32 %v1946_v10, 0.0  ;;  %v11930_v34 = vld [vmem:[#allocation10 + $0x170] ss:$12 sps:$4 sm:$0xff]   ;;  %v11927_v63 = vld [vmem:[#allocation10 + $0x168] ss:$12 sps:$4 sm:$0xff]  }
 0x2c3   : > { %v1965_v18 = vmax.f32 %v1947_v33, 0.0  ;;  %10447 = vmatmul.mubr.msk.bf16.vlgmr.msra.gmra.mrb[24].mxu1 %vm1991_vm3, %v11867_v13  ;;  %v11931_v10 = vld [vmem:[#allocation10 + $0xb0] ss:$12 sps:$4 sm:$0xff]   ;;  %11450 = vmatprep.subr.bf16.mxu0 %v11930_v34  ;;  %v11980_v34 = vld [vmem:[#allocation10 + $0x3e0] ss:$12 sps:$4 sm:$0xff]  }
 0x2c4   : > { %v1978_v22 = vpack.c.bf16 %v1964_v14, %v1958_v59  ;;  %2058 = vmatpush1.bf16.msra.mxu1 %v14317_v51  ;;  %2089 = vmatprep.mubr.bf16.mxu1 %v13746_v0  ;;  %v11934_v12 = vld [vmem:[#allocation10 + $0x184] ss:$12 sps:$4 sm:$0xff]  }
 0x2c5   : > { %v1979_v26 = vpack.c.bf16 %v1965_v18, %v1959_v5  ;;  %v1879_v19 = vpop.f32.mrb[44].mxu0  ;;  %10448 = vmatprep.subr.msk.bf16.mxu1 %vm1995_vm2, %v1983_v17  ;;  %11451 = vmatpush3.bf16.msra.mxu0 %v11931_v10  ;;  %v11935_v17 = vld [vmem:[#allocation10 + $0x248] ss:$12 sps:$4 sm:$0xff]   ;;  %v11981_v10 = vld [vmem:[#allocation10 + $0x320] ss:$12 sps:$4 sm:$0xff]  }
 0x2c6   : > { %v1902_v24 = vadd.f32 %v1879_v19, %v14324_v16  ;;  %v1881_v27 = vpop.f32.mrb[45].mxu0  ;;  %11458 = vmatprep.subr.bf16.mxu0 %v11935_v17  ;;  %v11939_v19 = vld [vmem:[#allocation10 + $0x19c] ss:$12 sps:$4 sm:$0xff]   ;;  %v11985_v17 = vld [vmem:[#allocation10 + $0x3f8] ss:$12 sps:$4 sm:$0xff]  }
 0x2c7   : > { %v1903_v54 = vadd.f32 %v1881_v27, %v14329_v21  ;;  %v1883_v30 = vpop.f32.mrb[46].mxu0  ;;  %v11937_v27 = vld [vmem:[#allocation10 + $0x198] ss:$12 sps:$4 sm:$0xff]  }
 0x2c8   : > { %v1952_v31 = vadd.f32 %v1925_v58, %v1902_v24  ;;  %2060 = vmatpush1.bf16.msra.mxu1 %v2003_v29  ;;  %v1884_v32 = vpop.f32.mrb[47].mxu0  ;;  %v11899_v58 = vld [vmem:[#allocation10 + $0xdc] ss:$12 sps:$4 sm:$0xff]   ;;  %v11940_v24 = vld [vmem:[#allocation10 + $0x260] ss:$12 sps:$4 sm:$0xff]  }
 0x2c9   : > { %v1953_v35 = vadd.f32 %v1929_v62, %v1903_v54  ;;  %2100 = vmatprep.subr.bf16.mxu1 %v1979_v26  ;;  %v11902_v62 = vld [vmem:[#allocation10 + $0xf0] ss:$12 sps:$4 sm:$0xff]   ;;  %v11936_v26 = vld [vmem:[#allocation10 + $0x188] ss:$12 sps:$4 sm:$0xff]   ;;  %v11941_v54 = vld [vmem:[#allocation10 + $0x1a0] ss:$12 sps:$4 sm:$0xff]  }
 0x2ca   : > { %v1970_v51 = vmax.f32 %v1952_v31, 0.0  ;;  %v11944_v30 = vld [vmem:[#allocation10 + $0x1b4] ss:$12 sps:$4 sm:$0xff]   ;;  %v11945_v31 = vld [vmem:[#allocation10 + $0x278] ss:$12 sps:$4 sm:$0xff]  }
 0x2cb   : > { %v1971_v36 = vmax.f32 %v1953_v35, 0.0  ;;  %10449 = vmatmul.mubr.msk.bf16.vlgmr.msra.gmra.mrb[28].mxu1 %vm1991_vm3, %v11867_v13 }
 0x2cc   : > { %v1984_v38 = vpack.c.bf16 %v1970_v51, %v1970_v51  ;;  %2101 = vmatpush1.bf16.msra.mxu1 %v1978_v22  ;;  %2132 = vmatprep.mubr.bf16.mxu1 %v13746_v0  ;;  %v11932_v22 = vld [vmem:[#allocation10 + $0x180] ss:$12 sps:$4 sm:$0xff]  }
 0x2cd   : > { %v1985_v16 = vpack.c.bf16 %v1971_v36, %v1971_v36 }
 0x2ce   : > { %v2009_v21 = vsel %vm1995_vm2, %v1984_v38, 0  ;;  %v11946_v38 = vld [vmem:[#allocation10 + $0x1b8] ss:$12 sps:$4 sm:$0xff]  }
 0x2cf   : > { %10450 = vmatprep.subr.msk.bf16.mxu1 %vm1995_vm2, %v1985_v16 }
 0x2d0   : > { %2103 = vmatpush1.bf16.msra.mxu1 %v2009_v21  ;;  %v11949_v21 = vld [vmem:[#allocation10 + $0x1cc] ss:$12 sps:$4 sm:$0xff]  }
 0x2d1   : > { %3109 = vmatprep.subr.bf16.mxu1 %v11870_v37  ;;  %v11942_v37 = vld [vmem:[#allocation10 + $0x1b0] ss:$12 sps:$4 sm:$0xff]  }
 0x2d3   : > { %10451 = vmatmul.mubr.msk.bf16.vlgmr.msra.gmra.mrb[32].mxu1 %vm1991_vm3, %v11867_v13  ;;  %v11919_v13 = vld [vmem:[#allocation10 + $0x13c] ss:$12 sps:$4 sm:$0xff]  }
 0x2d4   : > { %3110 = vmatpush1.bf16.msra.mxu1 %v11868_v39  ;;  %v11950_v39 = vld [vmem:[#allocation10 + $0x290] ss:$12 sps:$4 sm:$0xff]  }
 0x2d5   : > { %3111 = vmatprep.subr.bf16.mxu1 %v11873_v40  ;;  %v11947_v40 = vld [vmem:[#allocation10 + $0x1c8] ss:$12 sps:$4 sm:$0xff]  }
 0x2d8   : > { %3112 = vmatpush1.bf16.msra.mxu1 %v11871_v41  ;;  %v11951_v41 = vld [vmem:[#allocation10 + $0x1d0] ss:$12 sps:$4 sm:$0xff]  }
 0x2d9   : > { %3113 = vmatprep.subr.bf16.mxu1 %v11876_v42 }
 0x2dc   : > { %3114 = vmatpush1.bf16.msra.mxu1 %v11874_v43  ;;  %v11954_v43 = vld [vmem:[#allocation10 + $0x1e4] ss:$12 sps:$4 sm:$0xff]  }
 0x2dd   : > { %3115 = vmatprep.subr.bf16.mxu1 %v11879_v44  ;;  %v11955_v44 = vld [vmem:[#allocation10 + $0x2a8] ss:$12 sps:$4 sm:$0xff]  }
 0x2e0   : > { %3116 = vmatpush1.bf16.msra.mxu1 %v11877_v45 }
 0x2e1   : > { %3117 = vmatprep.subr.bf16.mxu1 %v11882_v46 }
 0x2e4   : > { %3118 = vmatpush1.bf16.msra.mxu1 %v11880_v47 }
 0x2e5   : > { %3119 = vmatprep.subr.bf16.mxu1 %v11885_v48 }
 0x2e8   : > { %3120 = vmatpush1.bf16.msra.mxu1 %v11883_v49  ;;  %v11952_v49 = vld [vmem:[#allocation10 + $0x1e0] ss:$12 sps:$4 sm:$0xff]  }
 0x2e9   : > { %3121 = vmatprep.subr.bf16.mxu1 %v11888_v50  ;;  %v11956_v50 = vld [vmem:[#allocation10 + $0x1e8] ss:$12 sps:$4 sm:$0xff]  }
 0x2ec   : > { %3122 = vmatpush1.bf16.msra.mxu1 %v11886_v52 }
 0x2ed   : > { %3123 = vmatprep.subr.bf16.mxu1 %v11891_v53  ;;  %v11959_v53 = vld [vmem:[#allocation10 + $0x1fc] ss:$12 sps:$4 sm:$0xff]  }
 0x2f0   : > { %3124 = vmatpush1.bf16.msra.mxu1 %v11889_v55  ;;  %v11960_v55 = vld [vmem:[#allocation10 + $0x2c0] ss:$12 sps:$4 sm:$0xff]  }
 0x2f1   : > { %3125 = vmatprep.subr.bf16.mxu1 %v11894_v56  ;;  %v11957_v56 = vld [vmem:[#allocation10 + $0x1f8] ss:$12 sps:$4 sm:$0xff]  }
 0x2f4   : > { %3126 = vmatpush1.bf16.msra.mxu1 %v11892_v57  ;;  %v11961_v57 = vld [vmem:[#allocation10 + $0x200] ss:$12 sps:$4 sm:$0xff]  }
 0x2f5   : > { %3127 = vmatprep.subr.bf16.mxu1 %v11899_v58  ;;  %v11964_v58 = vld [vmem:[#allocation10 + $0x214] ss:$12 sps:$4 sm:$0xff]  }
 0x2f8   : > { %3128 = vmatpush1.bf16.msra.mxu1 %v11897_v60  ;;  %v11965_v60 = vld [vmem:[#allocation10 + $0x2d8] ss:$12 sps:$4 sm:$0xff]  }
 0x2f9   : > { %3129 = vmatprep.subr.bf16.mxu1 %v11904_v61  ;;  %v11962_v61 = vld [vmem:[#allocation10 + $0x210] ss:$12 sps:$4 sm:$0xff]  }
 0x2fc   : > { %3130 = vmatpush1.bf16.msra.mxu1 %v11902_v62  ;;  %v11966_v62 = vld [vmem:[#allocation10 + $0x218] ss:$12 sps:$4 sm:$0xff]  }
 0x2fd   : > { %3131 = vmatprep.subr.bf16.mxu1 %v11909_v2  ;;  %v11969_v2 = vld [vmem:[#allocation10 + $0x22c] ss:$12 sps:$4 sm:$0xff]  }
 0x300   : > { %3132 = vmatpush1.bf16.msra.mxu1 %v11907_v3  ;;  %v11970_v3 = vld [vmem:[#allocation10 + $0x2f0] ss:$12 sps:$4 sm:$0xff]  }
 0x301   : > { %3133 = vmatprep.subr.bf16.mxu1 %v11914_v4  ;;  %v11967_v4 = vld [vmem:[#allocation10 + $0x228] ss:$12 sps:$4 sm:$0xff]  }
 0x304   : > { %3134 = vmatpush1.bf16.msra.mxu1 %v11912_v6  ;;  %v11971_v6 = vld [vmem:[#allocation10 + $0x230] ss:$12 sps:$4 sm:$0xff]  }
 0x305   : > { %3135 = vmatprep.subr.bf16.mxu1 %v11919_v13  ;;  %v11974_v13 = vld [vmem:[#allocation10 + $0x244] ss:$12 sps:$4 sm:$0xff]  }
 0x308   : > { %3136 = vmatpush1.bf16.msra.mxu1 %v11917_v7  ;;  %v11975_v7 = vld [vmem:[#allocation10 + $0x3c8] ss:$12 sps:$4 sm:$0xff]  }
 0x309   : > { %3137 = vmatprep.subr.bf16.mxu1 %v11924_v8  ;;  %v11972_v8 = vld [vmem:[#allocation10 + $0x240] ss:$12 sps:$4 sm:$0xff]  }
 0x30c   : > { %3138 = vmatpush1.bf16.msra.mxu1 %v11922_v9  ;;  %v11976_v9 = vld [vmem:[#allocation10 + $0x308] ss:$12 sps:$4 sm:$0xff]  }
 0x30d   : > { %3139 = vmatprep.subr.bf16.mxu1 %v11929_v1  ;;  %v11979_v1 = vld [vmem:[#allocation10 + $0x25c] ss:$12 sps:$4 sm:$0xff]  }
 0x310   : > { %3140 = vmatpush1.bf16.msra.mxu1 %v11927_v63  ;;  %v11977_v63 = vld [vmem:[#allocation10 + $0x258] ss:$12 sps:$4 sm:$0xff]  }
 0x311   : > { %3152 = vmatprep.subr.bf16.mxu1 %v11934_v12  ;;  %v11984_v12 = vld [vmem:[#allocation10 + $0x274] ss:$12 sps:$4 sm:$0xff]  }
 0x396   : > { %v2048_v33 = vpop.f32.mrb[24].mxu1 }
 0x397   : > { %v2050_v59 = vpop.f32.mrb[25].mxu1 }
 0x398   : > { %v2052_v14 = vpop.f32.mrb[26].mxu1 }
 0x399   : > { %v2143_v15 = vpack.c.bf16 %v2052_v14, %v2048_v33  ;;  %v2054_v5 = vpop.f32.mrb[27].mxu1  ;;  %v11982_v33 = vld [vmem:[#allocation10 + $0x270] ss:$12 sps:$4 sm:$0xff]   ;;  %v11989_v14 = vld [vmem:[#allocation10 + $0x28c] ss:$12 sps:$4 sm:$0xff]  }
 0x39a   : > { %v2144_v18 = vpack.c.bf16 %v2054_v5, %v2050_v59  ;;  %v11986_v59 = vld [vmem:[#allocation10 + $0x338] ss:$12 sps:$4 sm:$0xff]   ;;  %v11987_v5 = vld [vmem:[#allocation10 + $0x288] ss:$12 sps:$4 sm:$0xff]  }
 0x39c   : > { %3141 = vmatprep.mubr.bf16.mxu1 %v2144_v18  ;;  %3270 = vmatprep.mubr.bf16.mxu0 %v2144_v18  ;;  %v11991_v18 = vld [vmem:[#allocation10 + $0x350] ss:$12 sps:$4 sm:$0xff]  }
 0x39d   : > { %3142 = vmatmul.mubr.bf16.vlgmr.msra.gmra.mrb[36].mxu1 %v2143_v15  ;;  %3271 = vmatmul.mubr.bf16.vlgmr.msra.gmra.mrb[48].mxu0 %v2143_v15  ;;  %v11990_v15 = vld [vmem:[#allocation10 + $0x410] ss:$12 sps:$4 sm:$0xff]  }
 0x39e   : > { %3153 = vmatpush1.bf16.msra.mxu1 %v11932_v22  ;;  %11459 = vmatpush3.bf16.msra.mxu0 %v11936_v26  ;;  %v2091_v29 = vpop.f32.mrb[28].mxu1  ;;  %v11994_v22 = vld [vmem:[#allocation10 + $0x2a4] ss:$12 sps:$4 sm:$0xff]   ;;  %v11995_v26 = vld [vmem:[#allocation10 + $0x428] ss:$12 sps:$4 sm:$0xff]  }
 0x39f   : > { %3154 = vmatprep.subr.bf16.mxu1 %v11939_v19  ;;  %11460 = vmatprep.subr.bf16.mxu0 %v11940_v24  ;;  %v2093_v32 = vpop.f32.mrb[29].mxu1  ;;  %v11992_v19 = vld [vmem:[#allocation10 + $0x2a0] ss:$12 sps:$4 sm:$0xff]   ;;  %v11996_v24 = vld [vmem:[#allocation10 + $0x368] ss:$12 sps:$4 sm:$0xff]  }
 0x3a0   : > { %v2095_v35 = vpop.f32.mrb[30].mxu1 }
 0x3a1   : > { %v14359_v51 = vpack.c.bf16 %v2095_v35, %v2091_v29  ;;  %v2097_v36 = vpop.f32.mrb[31].mxu1  ;;  %v11997_v29 = vld [vmem:[#allocation10 + $0x2b8] ss:$12 sps:$4 sm:$0xff]   ;;  %v12002_v35 = vld [vmem:[#allocation10 + $0x2d0] ss:$12 sps:$4 sm:$0xff]  }
 0x3a2   : > { %3155 = vmatpush1.bf16.msra.mxu1 %v11937_v27  ;;  %11461 = vmatpush3.bf16.msra.mxu0 %v11941_v54  ;;  %v2146_v16 = vpack.c.bf16 %v2097_v36, %v2093_v32  ;;  %v11999_v27 = vld [vmem:[#allocation10 + $0x2bc] ss:$12 sps:$4 sm:$0xff]   ;;  %v12000_v54 = vld [vmem:[#allocation10 + $0x440] ss:$12 sps:$4 sm:$0xff]   ;;  %v12005_v32 = vld [vmem:[#allocation10 + $0x458] ss:$12 sps:$4 sm:$0xff]  }
 0x3a3   : > { %3156 = vmatprep.subr.bf16.mxu1 %v11944_v30  ;;  %11462 = vmatprep.subr.bf16.mxu0 %v11945_v31  ;;  %v12001_v30 = vld [vmem:[#allocation10 + $0x380] ss:$12 sps:$4 sm:$0xff]   ;;  %v12006_v36 = vld [vmem:[#allocation10 + $0x398] ss:$12 sps:$4 sm:$0xff]  }
 0x3a4   : > { %3311 = vmatprep.mubr.bf16.mxu0 %v2146_v16  ;;  %3184 = vmatprep.mubr.bf16.mxu1 %v2146_v16  ;;  %v12004_v31 = vld [vmem:[#allocation10 + $0x2d4] ss:$12 sps:$4 sm:$0xff]  }
 0x3a5   : > { %v12007_v16 = vld [vmem:[#allocation10 + $0x2e8] ss:$12 sps:$4 sm:$0xff]  }
 0x3a6   : > { %3157 = vmatpush1.bf16.msra.mxu1 %v11942_v37  ;;  %11463 = vmatpush3.bf16.msra.mxu0 %v11946_v38  ;;  %v2134_v42 = vpop.f32.mrb[32].mxu1  ;;  %v12009_v37 = vld [vmem:[#allocation10 + $0x2ec] ss:$12 sps:$4 sm:$0xff]   ;;  %v12010_v38 = vld [vmem:[#allocation10 + $0x470] ss:$12 sps:$4 sm:$0xff]  }
 0x3a7   : > { %3158 = vmatprep.subr.bf16.mxu1 %v11949_v21  ;;  %11464 = vmatprep.subr.bf16.mxu0 %v11950_v39  ;;  %v2136_v45 = vpop.f32.mrb[33].mxu1  ;;  %v12011_v21 = vld [vmem:[#allocation10 + $0x3b0] ss:$12 sps:$4 sm:$0xff]  }
 0x3a8   : > { %v2138_v46 = vpop.f32.mrb[34].mxu1  ;;  %v12014_v39 = vld [vmem:[#allocation10 + $0x304] ss:$12 sps:$4 sm:$0xff]  }
 0x3a9   : > { %v14361_v47 = vpack.c.bf16 %v2138_v46, %v2134_v42  ;;  %v2140_v48 = vpop.f32.mrb[35].mxu1  ;;  %v12015_v42 = vld [vmem:[#allocation10 + $0x318] ss:$12 sps:$4 sm:$0xff]   ;;  %v12021_v46 = vld [vmem:[#allocation10 + $0x348] ss:$12 sps:$4 sm:$0xff]  }
 0x3aa   : > { %3159 = vmatpush1.bf16.msra.mxu1 %v11947_v40  ;;  %11465 = vmatpush3.bf16.msra.mxu0 %v11951_v41  ;;  %v14363_v52 = vpack.c.bf16 %v2140_v48, %v2136_v45  ;;  %v12012_v40 = vld [vmem:[#allocation10 + $0x300] ss:$12 sps:$4 sm:$0xff]   ;;  %v12017_v41 = vld [vmem:[#allocation10 + $0x31c] ss:$12 sps:$4 sm:$0xff]   ;;  %v12026_v48 = vld [vmem:[#allocation10 + $0x364] ss:$12 sps:$4 sm:$0xff]  }
 0x3ab   : > { %3160 = vmatprep.subr.bf16.mxu1 %v11954_v43  ;;  %11466 = vmatprep.subr.bf16.mxu0 %v11955_v44  ;;  %v12020_v43 = vld [vmem:[#allocation10 + $0x334] ss:$12 sps:$4 sm:$0xff]   ;;  %v12018_v44 = vld [vmem:[#allocation10 + $0x330] ss:$12 sps:$4 sm:$0xff]   ;;  %v12023_v45 = vld [vmem:[#allocation10 + $0x34c] ss:$12 sps:$4 sm:$0xff]  }
 0x3ae   : > { %3161 = vmatpush1.bf16.msra.mxu1 %v11952_v49  ;;  %11467 = vmatpush3.bf16.msra.mxu0 %v11956_v50  ;;  %v12024_v49 = vld [vmem:[#allocation10 + $0x360] ss:$12 sps:$4 sm:$0xff]   ;;  %v12027_v50 = vld [vmem:[#allocation10 + $0x378] ss:$12 sps:$4 sm:$0xff]  }
 0x3af   : > { %3162 = vmatprep.subr.bf16.mxu1 %v11959_v53  ;;  %11468 = vmatprep.subr.bf16.mxu0 %v11960_v55  ;;  %v12032_v53 = vld [vmem:[#allocation10 + $0x394] ss:$12 sps:$4 sm:$0xff]   ;;  %v12035_v55 = vld [vmem:[#allocation10 + $0x3ac] ss:$12 sps:$4 sm:$0xff]  }
 0x3b2   : > { %3163 = vmatpush1.bf16.msra.mxu1 %v11957_v56  ;;  %11469 = vmatpush3.bf16.msra.mxu0 %v11961_v57  ;;  %v12033_v56 = vld [vmem:[#allocation10 + $0x3a8] ss:$12 sps:$4 sm:$0xff]   ;;  %v12038_v57 = vld [vmem:[#allocation10 + $0x3c4] ss:$12 sps:$4 sm:$0xff]  }
 0x3b3   : > { %3164 = vmatprep.subr.bf16.mxu1 %v11964_v58  ;;  %11470 = vmatprep.subr.bf16.mxu0 %v11965_v60  ;;  %v12036_v58 = vld [vmem:[#allocation10 + $0x3c0] ss:$12 sps:$4 sm:$0xff]   ;;  %v12041_v60 = vld [vmem:[#allocation10 + $0x3dc] ss:$12 sps:$4 sm:$0xff]  }
 0x3b6   : > { %3165 = vmatpush1.bf16.msra.mxu1 %v11962_v61  ;;  %11471 = vmatpush3.bf16.msra.mxu0 %v11966_v62  ;;  %v12039_v61 = vld [vmem:[#allocation10 + $0x3d8] ss:$12 sps:$4 sm:$0xff]   ;;  %v12044_v62 = vld [vmem:[#allocation10 + $0x3f4] ss:$12 sps:$4 sm:$0xff]  }
 0x3b7   : > { %3166 = vmatprep.subr.bf16.mxu1 %v11969_v2  ;;  %11472 = vmatprep.subr.bf16.mxu0 %v11970_v3  ;;  %v12042_v2 = vld [vmem:[#allocation10 + $0x3f0] ss:$12 sps:$4 sm:$0xff]   ;;  %v12047_v3 = vld [vmem:[#allocation10 + $0x40c] ss:$12 sps:$4 sm:$0xff]  }
 0x3ba   : > { %3167 = vmatpush1.bf16.msra.mxu1 %v11967_v4  ;;  %11473 = vmatpush3.bf16.msra.mxu0 %v11971_v6  ;;  %v12045_v4 = vld [vmem:[#allocation10 + $0x408] ss:$12 sps:$4 sm:$0xff]   ;;  %v12050_v6 = vld [vmem:[#allocation10 + $0x424] ss:$12 sps:$4 sm:$0xff]  }
 0x3bb   : > { %3168 = vmatprep.subr.bf16.mxu1 %v11974_v13  ;;  %11480 = vmatprep.subr.bf16.mxu0 %v11975_v7  ;;  %v12048_v13 = vld [vmem:[#allocation10 + $0x420] ss:$12 sps:$4 sm:$0xff]   ;;  %v12053_v7 = vld [vmem:[#allocation10 + $0x43c] ss:$12 sps:$4 sm:$0xff]  }
 0x3bd   : > { %3312 = vmatmul.mubr.bf16.vlgmr.msra.gmra.mrb[52].mxu0 %v14359_v51 }
 0x3be   : > { %3169 = vmatpush1.bf16.msra.mxu1 %v11972_v8  ;;  %11481 = vmatpush3.bf16.msra.mxu0 %v11976_v9  ;;  %v12051_v8 = vld [vmem:[#allocation10 + $0x438] ss:$12 sps:$4 sm:$0xff]   ;;  %v12056_v9 = vld [vmem:[#allocation10 + $0x454] ss:$12 sps:$4 sm:$0xff]  }
 0x3bf   : > { %3170 = vmatprep.subr.bf16.mxu1 %v11979_v1  ;;  %11482 = vmatprep.subr.bf16.mxu0 %v11980_v34  ;;  %v12054_v1 = vld [vmem:[#allocation10 + $0x450] ss:$12 sps:$4 sm:$0xff]   ;;  %v12059_v34 = vld [vmem:[#allocation10 + $0x46c] ss:$12 sps:$4 sm:$0xff]  }
 0x3c0   : > { %3352 = vmatprep.mubr.bf16.mxu0 %v14363_v52 }
 0x3c2   : > { %3171 = vmatpush1.bf16.msra.mxu1 %v11977_v63  ;;  %11483 = vmatpush3.bf16.msra.mxu0 %v11981_v10  ;;  %v12057_v63 = vld [vmem:[#allocation10 + $0x468] ss:$12 sps:$4 sm:$0xff]  }
 0x3c3   : > { %3172 = vmatprep.subr.bf16.mxu1 %v11984_v12  ;;  %11484 = vmatprep.subr.bf16.mxu0 %v11985_v17  ;;  %v12062_v10 = vld [vmem:[#allocation12 + $0x504] ss:$16 sps:$4 sm:$0xff]   ;;  %v12060_v12 = vld [vmem:[#allocation12 + $0x500] ss:$16 sps:$4 sm:$0xff]  }
 0x3c4   : > { %v12065_v17 = vld [vmem:[#allocation12 + $0x524] ss:$16 sps:$4 sm:$0xff]  }
 0x3c6   : > { %3173 = vmatpush1.bf16.msra.mxu1 %v11982_v33  ;;  %11485 = vmatpush3.bf16.msra.mxu0 %v11986_v59  ;;  %v12063_v33 = vld [vmem:[#allocation12 + $0x520] ss:$16 sps:$4 sm:$0xff]   ;;  %v12068_v59 = vld [vmem:[#allocation12 + $0x544] ss:$16 sps:$4 sm:$0xff]  }
 0x3c7   : > { %3174 = vmatprep.subr.bf16.mxu1 %v11989_v14  ;;  %11486 = vmatprep.subr.bf16.mxu0 %v11990_v15  ;;  %v12066_v14 = vld [vmem:[#allocation12 + $0x540] ss:$16 sps:$4 sm:$0xff]   ;;  %v12071_v15 = vld [vmem:[#allocation12 + $0x564] ss:$16 sps:$4 sm:$0xff]  }
 0x3ca   : > { %3175 = vmatpush1.bf16.msra.mxu1 %v11987_v5  ;;  %11487 = vmatpush3.bf16.msra.mxu0 %v11991_v18  ;;  %v12069_v5 = vld [vmem:[#allocation12 + $0x560] ss:$16 sps:$4 sm:$0xff]   ;;  %v12074_v18 = vld [vmem:[#allocation12 + $0x584] ss:$16 sps:$4 sm:$0xff]  }
 0x3cb   : > { %3176 = vmatprep.subr.bf16.mxu1 %v11994_v22  ;;  %11488 = vmatprep.subr.bf16.mxu0 %v11995_v26  ;;  %v12072_v22 = vld [vmem:[#allocation12 + $0x580] ss:$16 sps:$4 sm:$0xff]  }
 0x3cc   : > { %v12075_v26 = vld [vmem:[#allocation12 + $0x5a0] ss:$16 sps:$4 sm:$0xff]  }
 0x3ce   : > { %3177 = vmatpush1.bf16.msra.mxu1 %v11992_v19  ;;  %11489 = vmatpush3.bf16.msra.mxu0 %v11996_v24  ;;  %v12080_v19 = vld [vmem:[#allocation12 + $0x5c4] ss:$16 sps:$4 sm:$0xff]   ;;  %v12084_v24 = vld [vmem:[#allocation12 + $0x300] ss:$16 sps:$4 sm:$0xff]  }
 0x3cf   : > { %3178 = vmatprep.subr.bf16.mxu1 %v11999_v27  ;;  %11490 = vmatprep.subr.bf16.mxu0 %v12000_v54  ;;  %v12086_v27 = vld [vmem:[#allocation12 + $0x304] ss:$16 sps:$4 sm:$0xff]  }
 0x3d0   : > { %v12092_v54 = vld [vmem:[#allocation12 + $0x324] ss:$16 sps:$4 sm:$0xff]  }
 0x3d2   : > { %3179 = vmatpush1.bf16.msra.mxu1 %v11997_v29  ;;  %11491 = vmatpush3.bf16.msra.mxu0 %v12001_v30  ;;  %v12078_v29 = vld [vmem:[#allocation12 + $0x5c0] ss:$16 sps:$4 sm:$0xff]   ;;  %v12083_v30 = vld [vmem:[#allocation12 + $0x5e4] ss:$16 sps:$4 sm:$0xff]  }
 0x3d3   : > { %3180 = vmatprep.subr.bf16.mxu1 %v12004_v31  ;;  %11492 = vmatprep.subr.bf16.mxu0 %v12005_v32  ;;  %v12090_v31 = vld [vmem:[#allocation12 + $0x320] ss:$16 sps:$4 sm:$0xff]  }
 0x3d4   : > { %v12081_v32 = vld [vmem:[#allocation12 + $0x5e0] ss:$16 sps:$4 sm:$0xff]  }
 0x3d6   : > { %3181 = vmatpush1.bf16.msra.mxu1 %v12002_v35  ;;  %11493 = vmatpush3.bf16.msra.mxu0 %v12006_v36  ;;  %v12089_v35 = vld [vmem:[#allocation12 + $0x50c] ss:$16 sps:$4 sm:$0xff]   ;;  %v12096_v36 = vld [vmem:[#allocation12 + $0x340] ss:$16 sps:$4 sm:$0xff]  }
 0x3d7   : > { %3182 = vmatprep.subr.bf16.mxu1 %v12009_v37  ;;  %11494 = vmatprep.subr.bf16.mxu0 %v12010_v38  ;;  %v12098_v37 = vld [vmem:[#allocation12 + $0x344] ss:$16 sps:$4 sm:$0xff]   ;;  %v12102_v38 = vld [vmem:[#allocation12 + $0x360] ss:$16 sps:$4 sm:$0xff]  }
 0x3da   : > { %3183 = vmatpush1.bf16.msra.mxu1 %v12007_v16  ;;  %11495 = vmatpush3.bf16.msra.mxu0 %v12011_v21  ;;  %v12104_v16 = vld [vmem:[#allocation12 + $0x364] ss:$16 sps:$4 sm:$0xff]   ;;  %v12108_v21 = vld [vmem:[#allocation12 + $0x380] ss:$16 sps:$4 sm:$0xff]  }
 0x3db   : > { %3195 = vmatprep.subr.bf16.mxu1 %v12014_v39  ;;  %4079 = vmatprep.subr.bf16.mxu0 %v12086_v27  ;;  %v12110_v39 = vld [vmem:[#allocation12 + $0x384] ss:$16 sps:$4 sm:$0xff]  }
 0x3dd   : > { %3185 = vmatmul.mubr.bf16.vlgmr.msra.gmra.mrb[36].mxu1 %v14359_v51  ;;  %3353 = vmatmul.mubr.bf16.vlgmr.msra.gmra.mrb[56].mxu0 %v14361_v47  ;;  %v12029_v51 = vld [vmem:[#allocation10 + $0x37c] ss:$12 sps:$4 sm:$0xff]  }
 0x3de   : > { %3196 = vmatpush1.bf16.msra.mxu1 %v12012_v40  ;;  %3227 = vmatprep.mubr.bf16.mxu1 %v14363_v52  ;;  %v12030_v52 = vld [vmem:[#allocation10 + $0x390] ss:$12 sps:$4 sm:$0xff]  }
 0x3df   : > { %3197 = vmatprep.subr.bf16.mxu1 %v12017_v41  ;;  %4080 = vmatpush1.bf16.msra.mxu0 %v12084_v24  ;;  %v12114_v40 = vld [vmem:[#allocation12 + $0x3a0] ss:$16 sps:$4 sm:$0xff]   ;;  %v12116_v41 = vld [vmem:[#allocation12 + $0x3a4] ss:$16 sps:$4 sm:$0xff]  }
 0x3e0   : > { %4081 = vmatprep.subr.bf16.mxu0 %v12092_v54 }
 0x3e2   : > { %3198 = vmatpush1.bf16.msra.mxu1 %v12015_v42  ;;  %v12120_v42 = vld [vmem:[#allocation12 + $0x3c0] ss:$16 sps:$4 sm:$0xff]  }
 0x3e3   : > { %3199 = vmatprep.subr.bf16.mxu1 %v12020_v43  ;;  %4082 = vmatpush1.bf16.msra.mxu0 %v12090_v31  ;;  %v12122_v43 = vld [vmem:[#allocation12 + $0x3c4] ss:$16 sps:$4 sm:$0xff]  }
 0x3e4   : > { %4083 = vmatprep.subr.bf16.mxu0 %v12098_v37  ;;  %v12095_v37 = vld [vmem:[#allocation12 + $0x52c] ss:$16 sps:$4 sm:$0xff]  }
 0x3e6   : > { %3200 = vmatpush1.bf16.msra.mxu1 %v12018_v44  ;;  %v12126_v44 = vld [vmem:[#allocation12 + $0x3e0] ss:$16 sps:$4 sm:$0xff]  }
 0x3e7   : > { %3201 = vmatprep.subr.bf16.mxu1 %v12023_v45  ;;  %4084 = vmatpush1.bf16.msra.mxu0 %v12096_v36  ;;  %v12128_v45 = vld [vmem:[#allocation12 + $0x3e4] ss:$16 sps:$4 sm:$0xff]  }
 0x3e8   : > { %4085 = vmatprep.subr.bf16.mxu0 %v12104_v16  ;;  %v12101_v16 = vld [vmem:[#allocation12 + $0x54c] ss:$16 sps:$4 sm:$0xff]  }
 0x3ea   : > { %3202 = vmatpush1.bf16.msra.mxu1 %v12021_v46  ;;  %v12132_v46 = vld [vmem:[#allocation12 + $0x400] ss:$16 sps:$4 sm:$0xff]  }
 0x3eb   : > { %3203 = vmatprep.subr.bf16.mxu1 %v12026_v48  ;;  %4086 = vmatpush1.bf16.msra.mxu0 %v12102_v38  ;;  %v12134_v48 = vld [vmem:[#allocation12 + $0x404] ss:$16 sps:$4 sm:$0xff]   ;;  %v12093_v38 = vld [vmem:[#allocation12 + $0x528] ss:$16 sps:$4 sm:$0xff]  }
 0x3ec   : > { %4087 = vmatprep.subr.bf16.mxu0 %v12110_v39  ;;  %v12107_v39 = vld [vmem:[#allocation12 + $0x56c] ss:$16 sps:$4 sm:$0xff]  }
 0x3ee   : > { %3204 = vmatpush1.bf16.msra.mxu1 %v12024_v49  ;;  %v12140_v49 = vld [vmem:[#allocation12 + $0x424] ss:$16 sps:$4 sm:$0xff]  }
 0x3ef   : > { %3205 = vmatprep.subr.bf16.mxu1 %v12029_v51  ;;  %4088 = vmatpush1.bf16.msra.mxu0 %v12108_v21  ;;  %v12138_v51 = vld [vmem:[#allocation12 + $0x420] ss:$16 sps:$4 sm:$0xff]   ;;  %v12099_v21 = vld [vmem:[#allocation12 + $0x548] ss:$16 sps:$4 sm:$0xff]  }
 0x3f0   : > { %4089 = vmatprep.subr.bf16.mxu0 %v12116_v41  ;;  %v12113_v41 = vld [vmem:[#allocation12 + $0x58c] ss:$16 sps:$4 sm:$0xff]  }
 0x3f2   : > { %3206 = vmatpush1.bf16.msra.mxu1 %v12027_v50  ;;  %v12144_v50 = vld [vmem:[#allocation12 + $0x440] ss:$16 sps:$4 sm:$0xff]  }
 0x3f3   : > { %3207 = vmatprep.subr.bf16.mxu1 %v12032_v53  ;;  %4090 = vmatpush1.bf16.msra.mxu0 %v12114_v40  ;;  %v12146_v53 = vld [vmem:[#allocation12 + $0x444] ss:$16 sps:$4 sm:$0xff]   ;;  %v12105_v40 = vld [vmem:[#allocation12 + $0x568] ss:$16 sps:$4 sm:$0xff]  }
 0x3f4   : > { %4091 = vmatprep.subr.bf16.mxu0 %v12122_v43  ;;  %v12119_v43 = vld [vmem:[#allocation12 + $0x5ac] ss:$16 sps:$4 sm:$0xff]  }
 0x3f6   : > { %3208 = vmatpush1.bf16.msra.mxu1 %v12030_v52  ;;  %v12152_v52 = vld [vmem:[#allocation12 + $0x464] ss:$16 sps:$4 sm:$0xff]  }
 0x3f7   : > { %3209 = vmatprep.subr.bf16.mxu1 %v12035_v55  ;;  %4092 = vmatpush1.bf16.msra.mxu0 %v12120_v42  ;;  %v12111_v42 = vld [vmem:[#allocation12 + $0x588] ss:$16 sps:$4 sm:$0xff]  }
 0x3f8   : > { %4093 = vmatprep.subr.bf16.mxu0 %v12128_v45  ;;  %v12125_v45 = vld [vmem:[#allocation12 + $0x5cc] ss:$16 sps:$4 sm:$0xff]  }
 0x3fa   : > { %3210 = vmatpush1.bf16.msra.mxu1 %v12033_v56  ;;  %v12150_v56 = vld [vmem:[#allocation12 + $0x460] ss:$16 sps:$4 sm:$0xff]  }
 0x3fb   : > { %3211 = vmatprep.subr.bf16.mxu1 %v12038_v57  ;;  %4094 = vmatpush1.bf16.msra.mxu0 %v12126_v44  ;;  %v12117_v44 = vld [vmem:[#allocation12 + $0x5a8] ss:$16 sps:$4 sm:$0xff]  }
 0x3fc   : > { %4095 = vmatprep.subr.bf16.mxu0 %v12134_v48  ;;  %v12131_v48 = vld [vmem:[#allocation12 + $0x5ec] ss:$16 sps:$4 sm:$0xff]  }
 0x3fe   : > { %3212 = vmatpush1.bf16.msra.mxu1 %v12036_v58 }
 0x3ff   : > { %3213 = vmatprep.subr.bf16.mxu1 %v12041_v60  ;;  %4096 = vmatpush1.bf16.msra.mxu0 %v12132_v46  ;;  %v12123_v46 = vld [vmem:[#allocation12 + $0x5c8] ss:$16 sps:$4 sm:$0xff]  }
 0x400   : > { %4097 = vmatprep.subr.bf16.mxu0 %v12140_v49  ;;  %v12129_v49 = vld [vmem:[#allocation12 + $0x5e8] ss:$16 sps:$4 sm:$0xff]  }
 0x402   : > { %3214 = vmatpush1.bf16.msra.mxu1 %v12039_v61 }
 0x403   : > { %3215 = vmatprep.subr.bf16.mxu1 %v12044_v62  ;;  %4098 = vmatpush1.bf16.msra.mxu0 %v12138_v51  ;;  %v12158_v62 = vld [vmem:[#allocation12 + $0x484] ss:$16 sps:$4 sm:$0xff]  }
 0x404   : > { %4099 = vmatprep.subr.bf16.mxu0 %v12146_v53  ;;  %v12137_v51 = vld [vmem:[#allocation12 + $0x4] ss:$16 sps:$4 sm:$0xff]  }
 0x405   : > { %v12143_v53 = vld [vmem:[#allocation12 + $0x24] ss:$16 sps:$4 sm:$0xff]  }
 0x406   : > { %3216 = vmatpush1.bf16.msra.mxu1 %v12042_v2 }
 0x407   : > { %3217 = vmatprep.subr.bf16.mxu1 %v12047_v3  ;;  %4100 = vmatpush1.bf16.msra.mxu0 %v12144_v50  ;;  %v12156_v3 = vld [vmem:[#allocation12 + $0x480] ss:$16 sps:$4 sm:$0xff]  }
 0x408   : > { %4101 = vmatprep.subr.bf16.mxu0 %v12152_v52  ;;  %v12135_v50 = vld [vmem:[#allocation12] ss:$16 sps:$4 sm:$0xff]  }
 0x409   : > { %v12141_v52 = vld [vmem:[#allocation12 + $0x20] ss:$16 sps:$4 sm:$0xff]  }
 0x40a   : > { %3218 = vmatpush1.bf16.msra.mxu1 %v12045_v4  ;;  %v12162_v4 = vld [vmem:[#allocation12 + $0x4a0] ss:$16 sps:$4 sm:$0xff]  }
 0x40b   : > { %3219 = vmatprep.subr.bf16.mxu1 %v12050_v6  ;;  %4102 = vmatpush1.bf16.msra.mxu0 %v12150_v56  ;;  %v12164_v6 = vld [vmem:[#allocation12 + $0x4a4] ss:$16 sps:$4 sm:$0xff]   ;;  %v12147_v56 = vld [vmem:[#allocation12 + $0x40] ss:$16 sps:$4 sm:$0xff]  }
 0x40c   : > { %4103 = vmatprep.subr.bf16.mxu0 %v12158_v62 }
 0x40e   : > { %3220 = vmatpush1.bf16.msra.mxu1 %v12048_v13  ;;  %v12168_v13 = vld [vmem:[#allocation12 + $0x4c0] ss:$16 sps:$4 sm:$0xff]  }
 0x40f   : > { %3221 = vmatprep.subr.bf16.mxu1 %v12053_v7  ;;  %4104 = vmatpush1.bf16.msra.mxu0 %v12156_v3  ;;  %v12170_v7 = vld [vmem:[#allocation12 + $0x4c4] ss:$16 sps:$4 sm:$0xff]  }
 0x410   : > { %4105 = vmatprep.subr.bf16.mxu0 %v12164_v6  ;;  %v12159_v6 = vld [vmem:[#allocation12 + $0x80] ss:$16 sps:$4 sm:$0xff]  }
 0x412   : > { %3222 = vmatpush1.bf16.msra.mxu1 %v12051_v8  ;;  %v12174_v8 = vld [vmem:[#allocation12 + $0x4e0] ss:$16 sps:$4 sm:$0xff]  }
 0x413   : > { %3223 = vmatprep.subr.bf16.mxu1 %v12056_v9  ;;  %4106 = vmatpush1.bf16.msra.mxu0 %v12162_v4  ;;  %v12176_v9 = vld [vmem:[#allocation12 + $0x4e4] ss:$16 sps:$4 sm:$0xff]  }
 0x414   : > { %4107 = vmatprep.subr.bf16.mxu0 %v12170_v7  ;;  %v12165_v7 = vld [vmem:[#allocation12 + $0xa0] ss:$16 sps:$4 sm:$0xff]  }
 0x416   : > { %3224 = vmatpush1.bf16.msra.mxu1 %v12054_v1  ;;  %v12182_v1 = vld [vmem:[#allocation12 + $0x30c] ss:$16 sps:$4 sm:$0xff]  }
 0x417   : > { %3225 = vmatprep.subr.bf16.mxu1 %v12059_v34  ;;  %4108 = vmatpush1.bf16.msra.mxu0 %v12168_v13  ;;  %v12167_v13 = vld [vmem:[#allocation12 + $0xa4] ss:$16 sps:$4 sm:$0xff]  }
 0x418   : > { %4109 = vmatprep.subr.bf16.mxu0 %v12176_v9 }
 0x41a   : > { %3226 = vmatpush1.bf16.msra.mxu1 %v12057_v63 }
 0x41b   : > { %4120 = vmatprep.subr.bf16.mxu1 %v12062_v10  ;;  %4110 = vmatpush1.bf16.msra.mxu0 %v12174_v8  ;;  %v12173_v8 = vld [vmem:[#allocation12 + $0xc4] ss:$16 sps:$4 sm:$0xff]  }
 0x41c   : > { %4161 = vmatprep.subr.bf16.mxu0 %v12182_v1 }
 0x41d   : > { %3228 = vmatmul.mubr.bf16.vlgmr.msra.gmra.mrb[36].mxu1 %v14361_v47  ;;  %v12077_v47 = vld [vmem:[#allocation12 + $0x5a4] ss:$16 sps:$4 sm:$0xff]  }
 0x41e   : > { %4121 = vmatpush1.bf16.msra.mxu1 %v12060_v12  ;;  %4152 = vmatprep.mubr.bf16.mxu1 %v13746_v0 }
 0x41f   : > { %4122 = vmatprep.subr.bf16.mxu1 %v12065_v17 }
 0x422   : > { %4123 = vmatpush1.bf16.msra.mxu1 %v12063_v33 }
 0x423   : > { %4124 = vmatprep.subr.bf16.mxu1 %v12068_v59 }
 0x426   : > { %4125 = vmatpush1.bf16.msra.mxu1 %v12066_v14 }
 0x427   : > { %4126 = vmatprep.subr.bf16.mxu1 %v12071_v15 }
 0x42a   : > { %4127 = vmatpush1.bf16.msra.mxu1 %v12069_v5 }
 0x42b   : > { %4128 = vmatprep.subr.bf16.mxu1 %v12074_v18 }
 0x42e   : > { %4129 = vmatpush1.bf16.msra.mxu1 %v12072_v22 }
 0x42f   : > { %4130 = vmatprep.subr.bf16.mxu1 %v12077_v47 }
 0x432   : > { %4131 = vmatpush1.bf16.msra.mxu1 %v12075_v26 }
 0x433   : > { %4132 = vmatprep.subr.bf16.mxu1 %v12080_v19 }
 0x436   : > { %4133 = vmatpush1.bf16.msra.mxu1 %v12078_v29 }
 0x437   : > { %4134 = vmatprep.subr.bf16.mxu1 %v12083_v30 }
 0x43a   : > { %4135 = vmatpush1.bf16.msra.mxu1 %v12081_v32 }
 0x43b   : > { %4202 = vmatprep.subr.bf16.mxu1 %v12089_v35  ;;  %v12087_v35 = vld [vmem:[#allocation12 + $0x508] ss:$16 sps:$4 sm:$0xff]  }
 0x470   : > { %v11452_v55 = vpop.f32.mrb[48].mxu0 }
 0x471   : > { %v11453_v57 = vpop.f32.mrb[49].mxu0 }
 0x472   : > { %v11454_v58 = vadd.f32 %v11453_v57, %v11452_v55  ;;  %v11455_v60 = vpop.f32.mrb[50].mxu0  ;;  %v12149_v55 = vld [vmem:[#allocation12 + $0x44] ss:$16 sps:$4 sm:$0xff]  }
 0x473   : > { %v11456_v61 = vpop.f32.mrb[51].mxu0  ;;  %v12155_v57 = vld [vmem:[#allocation12 + $0x64] ss:$16 sps:$4 sm:$0xff]  }
 0x474   : > { %v11457_v2 = vadd.f32 %v11456_v61, %v11455_v60  ;;  %v12153_v61 = vld [vmem:[#allocation12 + $0x60] ss:$16 sps:$4 sm:$0xff]  }
 0x490   : > { %v11474_v34 = vpop.f32.mrb[52].mxu0 }
 0x491   : > { %v11475_v63 = vpop.f32.mrb[53].mxu0 }
 0x492   : > { %v11476_v10 = vadd.f32 %v11475_v63, %v11474_v34  ;;  %v11477_v12 = vpop.f32.mrb[54].mxu0 }
 0x493   : > { %v11478_v17 = vpop.f32.mrb[55].mxu0 }
 0x494   : > { %v3314_v33 = vadd.f32 %v11476_v10, %v11454_v58  ;;  %v11479_v59 = vadd.f32 %v11478_v17, %v11477_v12  ;;  %v12171_v17 = vld [vmem:[#allocation12 + $0xc0] ss:$16 sps:$4 sm:$0xff]  }
 0x496   : > { %v3317_v14 = vadd.f32 %v11479_v59, %v11457_v2  ;;  %v12161_v2 = vld [vmem:[#allocation12 + $0x84] ss:$16 sps:$4 sm:$0xff]  }
 0x497   : > { %v12179_v59 = vld [vmem:[#allocation12 + $0xe4] ss:$16 sps:$4 sm:$0xff]  }
 0x4b0   : > { %v11496_v15 = vpop.f32.mrb[56].mxu0 }
 0x4b1   : > { %v11497_v5 = vpop.f32.mrb[57].mxu0 }
 0x4b2   : > { %v11498_v18 = vadd.f32 %v11497_v5, %v11496_v15  ;;  %v11499_v22 = vpop.f32.mrb[58].mxu0 }
 0x4b3   : > { %v11500_v26 = vpop.f32.mrb[59].mxu0 }
 0x4b4   : > { %v14372_v47 = vadd.f32 %v11498_v18, %v3314_v33  ;;  %v11501_v19 = vadd.f32 %v11500_v26, %v11499_v22  ;;  %v12177_v22 = vld [vmem:[#allocation12 + $0xe0] ss:$16 sps:$4 sm:$0xff]  }
 0x4b6   : > { %3363 = vst [vmem:[#allocation2 + $0x10] sm:$0xff] %v14372_v47  ;;  %v3358_v24 = vadd.f32 %v11501_v19, %v3317_v14 }
 0x4b8   : > { %3366 = vst [vmem:[#allocation2 + $0x28] sm:$0xf] %v3358_v24  ;;  %v12180_v24 = vld [vmem:[#allocation12 + $0x308] ss:$16 sps:$4 sm:$0xff]  }
 0x4bd   : > { %v3471_v27 = vld [vmem:[#allocation2 + $0x10] sm:$0xfe] }
 0x4bf   : > { %v3474_v54 = vld [vmem:[#allocation2 + $0x28] sm:$0x1] }
 0x4c0   : > { %v3477_v29 = vpack.c.bf16 %v3474_v54, %v3471_v27  ;;  %v12185_v54 = vld [vmem:[#allocation12 + $0x104] ss:$16 sps:$4 sm:$0xff]  }
 0x4c2   : > { %v3592_v30 = vshll.u32 %v3477_v29, 16  ;;  %v3590_v31 = vshrl.u32 %v3477_v29, 16  ;;  %v12188_v29 = vld [vmem:[#allocation12 + $0x32c] ss:$16 sps:$4 sm:$0xff]  }
 0x4c4   : > { %v3594_v32 = vrot.slane %v3592_v30, 1  ;;  %v12183_v30 = vld [vmem:[#allocation12 + $0x100] ss:$16 sps:$4 sm:$0xff]  }
 0x4c6   : > { %v3595_v36 = vor.u32 %v3594_v32, %v3590_v31  ;;  %v12186_v31 = vld [vmem:[#allocation12 + $0x328] ss:$16 sps:$4 sm:$0xff]   ;;  %v12191_v32 = vld [vmem:[#allocation12 + $0x124] ss:$16 sps:$4 sm:$0xff]  }
 0x4c8   : > { %4153 = vmatmul.mubr.bf16.vlgmr.msra.gmra.mrb[40].mxu1 %v3595_v36 }
 0x4c9   : > { %4203 = vmatpush1.bf16.msra.mxu1 %v12087_v35  ;;  %4234 = vmatprep.mubr.bf16.mxu1 %v13746_v0  ;;  %v12194_v35 = vld [vmem:[#allocation12 + $0x34c] ss:$16 sps:$4 sm:$0xff]  }
 0x4ca   : > { %4204 = vmatprep.subr.bf16.mxu1 %v12095_v37  ;;  %v12192_v37 = vld [vmem:[#allocation12 + $0x348] ss:$16 sps:$4 sm:$0xff]  }
 0x4cd   : > { %4205 = vmatpush1.bf16.msra.mxu1 %v12093_v38  ;;  %v12197_v38 = vld [vmem:[#allocation12 + $0x144] ss:$16 sps:$4 sm:$0xff]  }
 0x4ce   : > { %4206 = vmatprep.subr.bf16.mxu1 %v12101_v16  ;;  %v12200_v16 = vld [vmem:[#allocation12 + $0x36c] ss:$16 sps:$4 sm:$0xff]  }
 0x4d1   : > { %4207 = vmatpush1.bf16.msra.mxu1 %v12099_v21  ;;  %v12195_v21 = vld [vmem:[#allocation12 + $0x140] ss:$16 sps:$4 sm:$0xff]  }
 0x4d2   : > { %4208 = vmatprep.subr.bf16.mxu1 %v12107_v39  ;;  %v12198_v39 = vld [vmem:[#allocation12 + $0x368] ss:$16 sps:$4 sm:$0xff]  }
 0x4d5   : > { %4209 = vmatpush1.bf16.msra.mxu1 %v12105_v40  ;;  %v12203_v40 = vld [vmem:[#allocation12 + $0x164] ss:$16 sps:$4 sm:$0xff]  }
 0x4d6   : > { %4210 = vmatprep.subr.bf16.mxu1 %v12113_v41  ;;  %v12206_v41 = vld [vmem:[#allocation12 + $0x38c] ss:$16 sps:$4 sm:$0xff]  }
 0x4d9   : > { %4211 = vmatpush1.bf16.msra.mxu1 %v12111_v42  ;;  %v12201_v42 = vld [vmem:[#allocation12 + $0x160] ss:$16 sps:$4 sm:$0xff]  }
 0x4da   : > { %4212 = vmatprep.subr.bf16.mxu1 %v12119_v43  ;;  %v12204_v43 = vld [vmem:[#allocation12 + $0x388] ss:$16 sps:$4 sm:$0xff]  }
 0x4dd   : > { %4213 = vmatpush1.bf16.msra.mxu1 %v12117_v44  ;;  %v12209_v44 = vld [vmem:[#allocation12 + $0x184] ss:$16 sps:$4 sm:$0xff]  }
 0x4de   : > { %4214 = vmatprep.subr.bf16.mxu1 %v12125_v45  ;;  %v12212_v45 = vld [vmem:[#allocation12 + $0x3ac] ss:$16 sps:$4 sm:$0xff]  }
 0x4e1   : > { %4215 = vmatpush1.bf16.msra.mxu1 %v12123_v46  ;;  %v12207_v46 = vld [vmem:[#allocation12 + $0x180] ss:$16 sps:$4 sm:$0xff]  }
 0x4e2   : > { %4216 = vmatprep.subr.bf16.mxu1 %v12131_v48  ;;  %v12210_v48 = vld [vmem:[#allocation12 + $0x3a8] ss:$16 sps:$4 sm:$0xff]  }
 0x4e5   : > { %4217 = vmatpush1.bf16.msra.mxu1 %v12129_v49  ;;  %v12215_v49 = vld [vmem:[#allocation12 + $0x1a4] ss:$16 sps:$4 sm:$0xff]  }
 0x4e6   : > { %4723 = vmatprep.subr.bf16.mxu1 %v12137_v51  ;;  %v12218_v51 = vld [vmem:[#allocation12 + $0x3cc] ss:$16 sps:$4 sm:$0xff]  }
 0x4e8   : > { %4235 = vmatmul.mubr.bf16.vlgmr.msra.gmra.mrb[44].mxu1 %v3595_v36  ;;  %v12189_v36 = vld [vmem:[#allocation12 + $0x120] ss:$16 sps:$4 sm:$0xff]  }
 0x4e9   : > { %4724 = vmatpush1.bf16.msra.mxu1 %v12135_v50  ;;  %v12213_v50 = vld [vmem:[#allocation12 + $0x1a0] ss:$16 sps:$4 sm:$0xff]  }
 0x4ea   : > { %4725 = vmatprep.subr.bf16.mxu1 %v12143_v53  ;;  %v12216_v53 = vld [vmem:[#allocation12 + $0x3c8] ss:$16 sps:$4 sm:$0xff]  }
 0x4ed   : > { %4726 = vmatpush1.bf16.msra.mxu1 %v12141_v52  ;;  %v12221_v52 = vld [vmem:[#allocation12 + $0x1c4] ss:$16 sps:$4 sm:$0xff]  }
 0x4ee   : > { %4727 = vmatprep.subr.bf16.mxu1 %v12149_v55  ;;  %v12224_v55 = vld [vmem:[#allocation12 + $0x3ec] ss:$16 sps:$4 sm:$0xff]  }
 0x4f0   : > { %v14376_v58 = vpop.f32.mrb[36].mxu1 }
 0x4f1   : > { %3361 = vst [vmem:[#allocation2] sm:$0xff] %v14376_v58  ;;  %4728 = vmatpush1.bf16.msra.mxu1 %v12147_v56  ;;  %v3231_v60 = vpop.f32.mrb[37].mxu1  ;;  %v12219_v56 = vld [vmem:[#allocation12 + $0x1c0] ss:$16 sps:$4 sm:$0xff]  }
 0x4f2   : > { %3362 = vst [vmem:[#allocation2 + $0x8] sm:$0xff] %v3231_v60  ;;  %v3233_v62 = vpop.f32.mrb[38].mxu1  ;;  %4729 = vmatprep.subr.bf16.mxu1 %v12155_v57  ;;  %v14379_v3 = vpack.c.bf16 %v3231_v60, %v3231_v60  ;;  %v12222_v57 = vld [vmem:[#allocation12 + $0x3e8] ss:$16 sps:$4 sm:$0xff]   ;;  %v12227_v60 = vld [vmem:[#allocation12 + $0x1e4] ss:$16 sps:$4 sm:$0xff]  }
 0x4f3   : > { %3364 = vst [vmem:[#allocation2 + $0x18] sm:$0xf] %v3233_v62  ;;  %v3235_v4 = vpop.f32.mrb[39].mxu1  ;;  %v12225_v62 = vld [vmem:[#allocation12 + $0x1e0] ss:$16 sps:$4 sm:$0xff]  }
 0x4f4   : > { %3365 = vst [vmem:[#allocation2 + $0x20] sm:$0xf] %v3235_v4  ;;  %4755 = vmatprep.mubr.bf16.mxu1 %v14379_v3  ;;  %v12233_v4 = vld [vmem:[#allocation12 + $0x20c] ss:$16 sps:$4 sm:$0xff]  }
 0x4f5   : > { %4730 = vmatpush1.bf16.msra.mxu1 %v12153_v61  ;;  %v12230_v61 = vld [vmem:[#allocation12 + $0x40c] ss:$16 sps:$4 sm:$0xff]  }
 0x4f6   : > { %4731 = vmatprep.subr.bf16.mxu1 %v12161_v2  ;;  %v12228_v2 = vld [vmem:[#allocation12 + $0x408] ss:$16 sps:$4 sm:$0xff]  }
 0x4f8   : > { %v3469_v9 = vld [vmem:[#allocation2] sm:$0xfe] }
 0x4f9   : > { %4732 = vmatpush1.bf16.msra.mxu1 %v12159_v6  ;;  %v3470_v34 = vld [vmem:[#allocation2 + $0x8] sm:$0xfe]  ;;  %v12236_v6 = vld [vmem:[#allocation12 + $0x42c] ss:$16 sps:$4 sm:$0xff]  }
 0x4fa   : > { %4733 = vmatprep.subr.bf16.mxu1 %v12167_v13  ;;  %v3472_v1 = vld [vmem:[#allocation2 + $0x18] sm:$0x1]  ;;  %v12231_v13 = vld [vmem:[#allocation12 + $0x208] ss:$16 sps:$4 sm:$0xff]  }
 0x4fb   : > { %v3473_v63 = vld [vmem:[#allocation2 + $0x20] sm:$0x1]  ;;  %v3475_v10 = vpack.c.bf16 %v3472_v1, %v3469_v9  ;;  %v12239_v9 = vld [vmem:[#allocation12 + $0x22c] ss:$16 sps:$4 sm:$0xff]  }
 0x4fc   : > { %v3476_v12 = vpack.c.bf16 %v3473_v63, %v3470_v34  ;;  %v12242_v1 = vld [vmem:[#allocation12 + $0x44c] ss:$16 sps:$4 sm:$0xff]   ;;  %v12237_v34 = vld [vmem:[#allocation12 + $0x228] ss:$16 sps:$4 sm:$0xff]  }
 0x4fd   : > { %4734 = vmatpush1.bf16.msra.mxu1 %v12165_v7  ;;  %v3578_v33 = vshll.u32 %v3475_v10, 16  ;;  %v3576_v26 = vshrl.u32 %v3475_v10, 16  ;;  %v14387_v7 = vpack.c.bf16 %v14376_v58, %v14376_v58  ;;  %v12240_v63 = vld [vmem:[#allocation12 + $0x448] ss:$16 sps:$4 sm:$0xff]   ;;  %v12245_v10 = vld [vmem:[#allocation12 + $0x24c] ss:$16 sps:$4 sm:$0xff]  }
 0x4fe   : > { %4735 = vmatprep.subr.bf16.mxu1 %v12173_v8  ;;  %v3585_v14 = vshll.u32 %v3476_v12, 16  ;;  %v3583_v5 = vshrl.u32 %v3476_v12, 16  ;;  %v12234_v8 = vld [vmem:[#allocation12 + $0x428] ss:$16 sps:$4 sm:$0xff]   ;;  %v12248_v12 = vld [vmem:[#allocation12 + $0x46c] ss:$16 sps:$4 sm:$0xff]  }
 0x4ff   : > { %v3580_v15 = vrot.slane %v3578_v33, 1  ;;  %v12243_v58 = vld [vmem:[#allocation12 + $0x248] ss:$16 sps:$4 sm:$0xff]   ;;  %v12251_v33 = vld [vmem:[#allocation12 + $0x26c] ss:$16 sps:$4 sm:$0xff]  }
 0x500   : > { %v3587_v18 = vrot.slane %v3585_v14, 1  ;;  %v12249_v14 = vld [vmem:[#allocation12 + $0x268] ss:$16 sps:$4 sm:$0xff]  }
 0x501   : > { %4736 = vmatpush1.bf16.msra.mxu1 %v12171_v17  ;;  %v14382_v27 = vor.u32 %v3580_v15, %v3576_v26  ;;  %v12246_v17 = vld [vmem:[#allocation12 + $0x468] ss:$16 sps:$4 sm:$0xff]  }
 0x502   : > { %4737 = vmatprep.subr.bf16.mxu1 %v12179_v59  ;;  %v3588_v19 = vor.u32 %v3587_v18, %v3583_v5  ;;  %v12254_v59 = vld [vmem:[#allocation12 + $0x48c] ss:$16 sps:$4 sm:$0xff]   ;;  %v12252_v15 = vld [vmem:[#allocation12 + $0x488] ss:$16 sps:$4 sm:$0xff]  }
 0x503   : > { %v12257_v5 = vld [vmem:[#allocation12 + $0x28c] ss:$16 sps:$4 sm:$0xff]   ;;  %v12258_v26 = vld [vmem:[#allocation12 + $0x4a8] ss:$16 sps:$4 sm:$0xff]  }
 0x504   : > { %4111 = vmatprep.mubr.bf16.mxu0 %v3588_v19  ;;  %v12260_v18 = vld [vmem:[#allocation12 + $0x4ac] ss:$16 sps:$4 sm:$0xff]  }
 0x505   : > { %4738 = vmatpush1.bf16.msra.mxu1 %v12177_v22  ;;  %4112 = vmatmul.mubr.bf16.vlgmr.msra.gmra.mrb[60].mxu0 %v14382_v27  ;;  %v12255_v22 = vld [vmem:[#allocation12 + $0x288] ss:$16 sps:$4 sm:$0xff]  }
 0x506   : > { %4162 = vmatpush1.bf16.msra.mxu0 %v12180_v24  ;;  %4193 = vmatprep.mubr.bf16.mxu0 %v3588_v19  ;;  %v12263_v19 = vld [vmem:[#allocation12 + $0x2ac] ss:$16 sps:$4 sm:$0xff]  }
 0x507   : > { %4739 = vmatprep.subr.bf16.mxu1 %v12185_v54  ;;  %4163 = vmatprep.subr.bf16.mxu0 %v12188_v29  ;;  %v12266_v24 = vld [vmem:[#allocation12 + $0x4cc] ss:$16 sps:$4 sm:$0xff]   ;;  %v12261_v54 = vld [vmem:[#allocation12 + $0x2a8] ss:$16 sps:$4 sm:$0xff]  }
 0x508   : > { %v12264_v29 = vld [vmem:[#allocation12 + $0x4c8] ss:$16 sps:$4 sm:$0xff]  }
 0x509   : > { %4740 = vmatpush1.bf16.msra.mxu1 %v12183_v30  ;;  %v12269_v30 = vld [vmem:[#allocation12 + $0x2cc] ss:$16 sps:$4 sm:$0xff]  }
 0x50a   : > { %4164 = vmatpush1.bf16.msra.mxu0 %v12186_v31  ;;  %4741 = vmatprep.subr.bf16.mxu1 %v12191_v32  ;;  %v12272_v31 = vld [vmem:[#allocation12 + $0x4ec] ss:$16 sps:$4 sm:$0xff]   ;;  %v12267_v32 = vld [vmem:[#allocation12 + $0x2c8] ss:$16 sps:$4 sm:$0xff]  }
 0x50b   : > { %4165 = vmatprep.subr.bf16.mxu0 %v12194_v35  ;;  %v12270_v35 = vld [vmem:[#allocation12 + $0x4e8] ss:$16 sps:$4 sm:$0xff]  }
 0x50d   : > { %4742 = vmatpush1.bf16.msra.mxu1 %v12189_v36  ;;  %v12275_v36 = vld [vmem:[#allocation12 + $0x2ec] ss:$16 sps:$4 sm:$0xff]  }
 0x50e   : > { %4166 = vmatpush1.bf16.msra.mxu0 %v12192_v37  ;;  %4743 = vmatprep.subr.bf16.mxu1 %v12197_v38  ;;  %v12278_v37 = vld [vmem:[#allocation12 + $0x204] ss:$16 sps:$4 sm:$0xff]   ;;  %v4891_v38 = vld [vmem:[#allocation2 + $0x20] sm:$0x3] }
 0x50f   : > { %4167 = vmatprep.subr.bf16.mxu0 %v12200_v16  ;;  %v12273_v16 = vld [vmem:[#allocation12 + $0x2e8] ss:$16 sps:$4 sm:$0xff]  }
 0x511   : > { %4744 = vmatpush1.bf16.msra.mxu1 %v12195_v21  ;;  %v12276_v21 = vld [vmem:[#allocation12 + $0x200] ss:$16 sps:$4 sm:$0xff]  }
 0x512   : > { %4168 = vmatpush1.bf16.msra.mxu0 %v12198_v39  ;;  %4745 = vmatprep.subr.bf16.mxu1 %v12203_v40  ;;  %v12281_v39 = vld [vmem:[#allocation12 + $0x604] ss:$16 sps:$4 sm:$0xff]  }
 0x513   : > { %4169 = vmatprep.subr.bf16.mxu0 %v12206_v41  ;;  %v4888_v40 = vld [vmem:[#allocation2 + $0x8] sm:$0xfc] }
 0x514   : > { %v12284_v41 = vld [vmem:[#allocation12 + $0x224] ss:$16 sps:$4 sm:$0xff]  }
 0x515   : > { %4746 = vmatpush1.bf16.msra.mxu1 %v12201_v42  ;;  %v4894_v42 = vpack.c.bf16 %v4891_v38, %v4888_v40  ;;  %v12351_v38 = vld [vmem:[#allocation12 + $0x780] ss:$16 sps:$4 sm:$0xff]  }
 0x516   : > { %4170 = vmatpush1.bf16.msra.mxu0 %v12204_v43  ;;  %4747 = vmatprep.subr.bf16.mxu1 %v12209_v44  ;;  %v12279_v43 = vld [vmem:[#allocation12 + $0x600] ss:$16 sps:$4 sm:$0xff]   ;;  %v14394_v44 = vpack.c.bf16 %v14372_v47, %v14372_v47  ;;  %v12293_v47 = vld [vmem:[#allocation12 + $0x644] ss:$16 sps:$4 sm:$0xff]  }
 0x517   : > { %4171 = vmatprep.subr.bf16.mxu0 %v12212_v45  ;;  %v12282_v45 = vld [vmem:[#allocation12 + $0x220] ss:$16 sps:$4 sm:$0xff]  }
 0x518   : > { %v12357_v40 = vld [vmem:[#allocation12 + $0x7a0] ss:$16 sps:$4 sm:$0xff]  }
 0x519   : > { %4748 = vmatpush1.bf16.msra.mxu1 %v12207_v46  ;;  %v12287_v46 = vld [vmem:[#allocation12 + $0x624] ss:$16 sps:$4 sm:$0xff]  }
 0x51a   : > { %4172 = vmatpush1.bf16.msra.mxu0 %v12210_v48  ;;  %4749 = vmatprep.subr.bf16.mxu1 %v12215_v49  ;;  %v14396_v48 = vrot.slane %v4894_v42, 1  ;;  %v12290_v49 = vld [vmem:[#allocation12 + $0x244] ss:$16 sps:$4 sm:$0xff]  }
 0x51b   : > { %4173 = vmatprep.subr.bf16.mxu0 %v12218_v51  ;;  %v12288_v51 = vld [vmem:[#allocation12 + $0x240] ss:$16 sps:$4 sm:$0xff]   ;;  %v12365_v42 = vld [vmem:[#allocation12 + $0x7c4] ss:$16 sps:$4 sm:$0xff]  }
 0x51d   : > { %4750 = vmatpush1.bf16.msra.mxu1 %v12213_v50  ;;  %v12296_v50 = vld [vmem:[#allocation12 + $0x264] ss:$16 sps:$4 sm:$0xff]  }
 0x51e   : > { %4174 = vmatpush1.bf16.msra.mxu0 %v12216_v53  ;;  %4751 = vmatprep.subr.bf16.mxu1 %v12221_v52  ;;  %v12291_v53 = vld [vmem:[#allocation12 + $0x640] ss:$16 sps:$4 sm:$0xff]  }
 0x51f   : > { %4175 = vmatprep.subr.bf16.mxu0 %v12224_v55  ;;  %v12294_v52 = vld [vmem:[#allocation12 + $0x260] ss:$16 sps:$4 sm:$0xff]   ;;  %v12299_v55 = vld [vmem:[#allocation12 + $0x664] ss:$16 sps:$4 sm:$0xff]  }
 0x521   : > { %4752 = vmatpush1.bf16.msra.mxu1 %v12219_v56  ;;  %v12302_v56 = vld [vmem:[#allocation12 + $0x284] ss:$16 sps:$4 sm:$0xff]  }
 0x522   : > { %4176 = vmatpush1.bf16.msra.mxu0 %v12222_v57  ;;  %4753 = vmatprep.subr.bf16.mxu1 %v12227_v60  ;;  %v12297_v57 = vld [vmem:[#allocation12 + $0x660] ss:$16 sps:$4 sm:$0xff]  }
 0x523   : > { %4177 = vmatprep.subr.bf16.mxu0 %v12230_v61  ;;  %v12300_v60 = vld [vmem:[#allocation12 + $0x280] ss:$16 sps:$4 sm:$0xff]   ;;  %v12305_v61 = vld [vmem:[#allocation12 + $0x684] ss:$16 sps:$4 sm:$0xff]  }
 0x525   : > { %4754 = vmatpush1.bf16.msra.mxu1 %v12225_v62  ;;  %v12308_v62 = vld [vmem:[#allocation12 + $0x2a4] ss:$16 sps:$4 sm:$0xff]  }
 0x526   : > { %4178 = vmatpush1.bf16.msra.mxu0 %v12228_v2  ;;  %4846 = vmatprep.subr.bf16.mxu1 %v12233_v4  ;;  %v12303_v2 = vld [vmem:[#allocation12 + $0x680] ss:$16 sps:$4 sm:$0xff]  }
 0x527   : > { %4179 = vmatprep.subr.bf16.mxu0 %v12236_v6  ;;  %v12306_v4 = vld [vmem:[#allocation12 + $0x2a0] ss:$16 sps:$4 sm:$0xff]   ;;  %v12311_v6 = vld [vmem:[#allocation12 + $0x6a4] ss:$16 sps:$4 sm:$0xff]  }
 0x528   : > { %4756 = vmatmul.mubr.bf16.vlgmr.msra.gmra.mrb[48].mxu1 %v14387_v7 }
 0x529   : > { %4847 = vmatpush1.bf16.msra.mxu1 %v12231_v13  ;;  %4878 = vmatprep.mubr.bf16.mxu1 %v13746_v0  ;;  %v12314_v13 = vld [vmem:[#allocation12 + $0x2c4] ss:$16 sps:$4 sm:$0xff]  }
 0x52a   : > { %4180 = vmatpush1.bf16.msra.mxu0 %v12234_v8  ;;  %4848 = vmatprep.subr.bf16.mxu1 %v12239_v9  ;;  %v12309_v8 = vld [vmem:[#allocation12 + $0x6a0] ss:$16 sps:$4 sm:$0xff]  }
 0x52b   : > { %4181 = vmatprep.subr.bf16.mxu0 %v12242_v1  ;;  %v12312_v9 = vld [vmem:[#allocation12 + $0x2c0] ss:$16 sps:$4 sm:$0xff]   ;;  %v12317_v1 = vld [vmem:[#allocation12 + $0x6c4] ss:$16 sps:$4 sm:$0xff]  }
 0x52d   : > { %4849 = vmatpush1.bf16.msra.mxu1 %v12237_v34  ;;  %v12320_v34 = vld [vmem:[#allocation12 + $0x2e4] ss:$16 sps:$4 sm:$0xff]  }
 0x52e   : > { %4182 = vmatpush1.bf16.msra.mxu0 %v12240_v63  ;;  %4850 = vmatprep.subr.bf16.mxu1 %v12245_v10  ;;  %v12315_v63 = vld [vmem:[#allocation12 + $0x6c0] ss:$16 sps:$4 sm:$0xff]  }
 0x52f   : > { %4183 = vmatprep.subr.bf16.mxu0 %v12248_v12  ;;  %v12318_v10 = vld [vmem:[#allocation12 + $0x2e0] ss:$16 sps:$4 sm:$0xff]   ;;  %v12323_v12 = vld [vmem:[#allocation12 + $0x6e4] ss:$16 sps:$4 sm:$0xff]  }
 0x531   : > { %4851 = vmatpush1.bf16.msra.mxu1 %v12243_v58  ;;  %v12326_v58 = vld [vmem:[#allocation12 + $0xc] ss:$16 sps:$4 sm:$0xff]  }
 0x532   : > { %4184 = vmatpush1.bf16.msra.mxu0 %v12246_v17  ;;  %4852 = vmatprep.subr.bf16.mxu1 %v12251_v33  ;;  %v12321_v17 = vld [vmem:[#allocation12 + $0x6e0] ss:$16 sps:$4 sm:$0xff]   ;;  %v12324_v33 = vld [vmem:[#allocation12 + $0x8] ss:$16 sps:$4 sm:$0xff]  }
 0x533   : > { %4185 = vmatprep.subr.bf16.mxu0 %v12254_v59  ;;  %v12329_v59 = vld [vmem:[#allocation12 + $0x704] ss:$16 sps:$4 sm:$0xff]  }
 0x535   : > { %4853 = vmatpush1.bf16.msra.mxu1 %v12249_v14  ;;  %v12332_v14 = vld [vmem:[#allocation12 + $0x2c] ss:$16 sps:$4 sm:$0xff]  }
 0x536   : > { %4186 = vmatpush1.bf16.msra.mxu0 %v12252_v15  ;;  %4854 = vmatprep.subr.bf16.mxu1 %v12257_v5  ;;  %v12327_v15 = vld [vmem:[#allocation12 + $0x700] ss:$16 sps:$4 sm:$0xff]   ;;  %v12330_v5 = vld [vmem:[#allocation12 + $0x28] ss:$16 sps:$4 sm:$0xff]  }
 0x537   : > { %4187 = vmatprep.subr.bf16.mxu0 %v12260_v18  ;;  %v12335_v18 = vld [vmem:[#allocation12 + $0x724] ss:$16 sps:$4 sm:$0xff]  }
 0x539   : > { %4855 = vmatpush1.bf16.msra.mxu1 %v12255_v22  ;;  %v12338_v22 = vld [vmem:[#allocation12 + $0x4c] ss:$16 sps:$4 sm:$0xff]  }
 0x53a   : > { %4188 = vmatpush1.bf16.msra.mxu0 %v12258_v26  ;;  %4856 = vmatprep.subr.bf16.mxu1 %v12263_v19  ;;  %v12333_v26 = vld [vmem:[#allocation12 + $0x720] ss:$16 sps:$4 sm:$0xff]   ;;  %v12336_v19 = vld [vmem:[#allocation12 + $0x48] ss:$16 sps:$4 sm:$0xff]  }
 0x53b   : > { %4189 = vmatprep.subr.bf16.mxu0 %v12266_v24  ;;  %v12341_v24 = vld [vmem:[#allocation12 + $0x744] ss:$16 sps:$4 sm:$0xff]  }
 0x53d   : > { %4857 = vmatpush1.bf16.msra.mxu1 %v12261_v54  ;;  %v12344_v54 = vld [vmem:[#allocation12 + $0x6c] ss:$16 sps:$4 sm:$0xff]  }
 0x53e   : > { %4190 = vmatpush1.bf16.msra.mxu0 %v12264_v29  ;;  %4858 = vmatprep.subr.bf16.mxu1 %v12269_v30  ;;  %v12339_v29 = vld [vmem:[#allocation12 + $0x740] ss:$16 sps:$4 sm:$0xff]   ;;  %v12342_v30 = vld [vmem:[#allocation12 + $0x68] ss:$16 sps:$4 sm:$0xff]  }
 0x53f   : > { %4191 = vmatprep.subr.bf16.mxu0 %v12272_v31  ;;  %v12347_v31 = vld [vmem:[#allocation12 + $0x764] ss:$16 sps:$4 sm:$0xff]  }
 0x541   : > { %4859 = vmatpush1.bf16.msra.mxu1 %v12267_v32  ;;  %v12345_v32 = vld [vmem:[#allocation12 + $0x760] ss:$16 sps:$4 sm:$0xff]  }
 0x542   : > { %4192 = vmatpush1.bf16.msra.mxu0 %v12270_v35  ;;  %4860 = vmatprep.subr.bf16.mxu1 %v12275_v36  ;;  %v12348_v35 = vld [vmem:[#allocation12 + $0x88] ss:$16 sps:$4 sm:$0xff]   ;;  %v12353_v36 = vld [vmem:[#allocation12 + $0x784] ss:$16 sps:$4 sm:$0xff]  }
 0x543   : > { %4764 = vmatprep.subr.bf16.mxu0 %v12278_v37  ;;  %v12356_v37 = vld [vmem:[#allocation12 + $0xac] ss:$16 sps:$4 sm:$0xff]  }
 0x545   : > { %4194 = vmatmul.mubr.bf16.vlgmr.msra.gmra.mrb[64].mxu0 %v14382_v27  ;;  %4861 = vmatpush1.bf16.msra.mxu1 %v12273_v16  ;;  %v12285_v27 = vld [vmem:[#allocation12 + $0x620] ss:$16 sps:$4 sm:$0xff]   ;;  %v12354_v16 = vld [vmem:[#allocation12 + $0xa8] ss:$16 sps:$4 sm:$0xff]  }
 0x546   : > { %4765 = vmatpush1.bf16.msra.mxu0 %v12276_v21  ;;  %5482 = vmatprep.subr.bf16.mxu1 %v12281_v39  ;;  %v12359_v21 = vld [vmem:[#allocation12 + $0x7a4] ss:$16 sps:$4 sm:$0xff]   ;;  %v12362_v39 = vld [vmem:[#allocation12 + $0xcc] ss:$16 sps:$4 sm:$0xff]  }
 0x547   : > { %4766 = vmatprep.subr.bf16.mxu0 %v12284_v41  ;;  %4796 = vmatprep.mubr.bf16.mxu0 %v13746_v0  ;;  %v12360_v41 = vld [vmem:[#allocation12 + $0xc8] ss:$16 sps:$4 sm:$0xff]  }
 0x548   : > { %4879 = vmatmul.mubr.bf16.vlgmr.msra.gmra.mrb[52].mxu1 %v14394_v44 }
 0x549   : > { %5483 = vmatpush1.bf16.msra.mxu1 %v12279_v43  ;;  %5514 = vmatprep.mubr.bf16.mxu1 %v14396_v48  ;;  %v12368_v43 = vld [vmem:[#allocation12 + $0xec] ss:$16 sps:$4 sm:$0xff]  }
 0x54a   : > { %4767 = vmatpush1.bf16.msra.mxu0 %v12282_v45  ;;  %5484 = vmatprep.subr.bf16.mxu1 %v12287_v46  ;;  %v12366_v45 = vld [vmem:[#allocation12 + $0xe8] ss:$16 sps:$4 sm:$0xff]   ;;  %v12371_v46 = vld [vmem:[#allocation12 + $0x7e4] ss:$16 sps:$4 sm:$0xff]  }
 0x54b   : > { %4768 = vmatprep.subr.bf16.mxu0 %v12290_v49  ;;  %v12374_v49 = vld [vmem:[#allocation12 + $0x10c] ss:$16 sps:$4 sm:$0xff]  }
 0x54d   : > { %5485 = vmatpush1.bf16.msra.mxu1 %v12285_v27  ;;  %v4890_v27 = vld [vmem:[#allocation2 + $0x18] sm:$0x3] }
 0x54e   : > { %4769 = vmatpush1.bf16.msra.mxu0 %v12288_v51  ;;  %5486 = vmatprep.subr.bf16.mxu1 %v12293_v47  ;;  %v12369_v51 = vld [vmem:[#allocation12 + $0x7e0] ss:$16 sps:$4 sm:$0xff]  }
 0x54f   : > { %4770 = vmatprep.subr.bf16.mxu0 %v12296_v50  ;;  %v4887_v47 = vld [vmem:[#allocation2] sm:$0xfc]  ;;  %v12372_v50 = vld [vmem:[#allocation12 + $0x108] ss:$16 sps:$4 sm:$0xff]  }
 0x551   : > { %5487 = vmatpush1.bf16.msra.mxu1 %v12291_v53  ;;  %v4893_v53 = vpack.c.bf16 %v4890_v27, %v4887_v47  ;;  %v12426_v27 = vld [vmem:[#allocation12 + $0x820] ss:$16 sps:$4 sm:$0xff]  }
 0x552   : > { %4771 = vmatpush1.bf16.msra.mxu0 %v12294_v52  ;;  %5488 = vmatprep.subr.bf16.mxu1 %v12299_v55  ;;  %v12377_v52 = vld [vmem:[#allocation12 + $0x80c] ss:$16 sps:$4 sm:$0xff]  }
 0x553   : > { %4772 = vmatprep.subr.bf16.mxu0 %v12302_v56  ;;  %v12380_v55 = vld [vmem:[#allocation12 + $0x12c] ss:$16 sps:$4 sm:$0xff]   ;;  %v12375_v56 = vld [vmem:[#allocation12 + $0x808] ss:$16 sps:$4 sm:$0xff]  }
 0x555   : > { %5489 = vmatpush1.bf16.msra.mxu1 %v12297_v57  ;;  %v14403_v57 = vrot.slane %v4893_v53, 1  ;;  %v12432_v53 = vld [vmem:[#allocation12 + $0x840] ss:$16 sps:$4 sm:$0xff]  }
 0x556   : > { %4773 = vmatpush1.bf16.msra.mxu0 %v12300_v60  ;;  %5490 = vmatprep.subr.bf16.mxu1 %v12305_v61  ;;  %v12378_v60 = vld [vmem:[#allocation12 + $0x128] ss:$16 sps:$4 sm:$0xff]   ;;  %v12383_v61 = vld [vmem:[#allocation12 + $0x82c] ss:$16 sps:$4 sm:$0xff]  }
 0x557   : > { %4774 = vmatprep.subr.bf16.mxu0 %v12308_v62  ;;  %v12386_v62 = vld [vmem:[#allocation12 + $0x14c] ss:$16 sps:$4 sm:$0xff]  }
 0x559   : > { %5491 = vmatpush1.bf16.msra.mxu1 %v12303_v2  ;;  %v12381_v2 = vld [vmem:[#allocation12 + $0x828] ss:$16 sps:$4 sm:$0xff]  }
 0x55a   : > { %4775 = vmatpush1.bf16.msra.mxu0 %v12306_v4  ;;  %5492 = vmatprep.subr.bf16.mxu1 %v12311_v6  ;;  %v12384_v4 = vld [vmem:[#allocation12 + $0x148] ss:$16 sps:$4 sm:$0xff]   ;;  %v12389_v6 = vld [vmem:[#allocation12 + $0x84c] ss:$16 sps:$4 sm:$0xff]  }
 0x55b   : > { %4776 = vmatprep.subr.bf16.mxu0 %v12314_v13  ;;  %v12392_v13 = vld [vmem:[#allocation12 + $0x16c] ss:$16 sps:$4 sm:$0xff]  }
 0x55d   : > { %5493 = vmatpush1.bf16.msra.mxu1 %v12309_v8  ;;  %v12387_v8 = vld [vmem:[#allocation12 + $0x848] ss:$16 sps:$4 sm:$0xff]  }
 0x55e   : > { %4777 = vmatpush1.bf16.msra.mxu0 %v12312_v9  ;;  %5494 = vmatprep.subr.bf16.mxu1 %v12317_v1  ;;  %v12390_v9 = vld [vmem:[#allocation12 + $0x168] ss:$16 sps:$4 sm:$0xff]   ;;  %v12395_v1 = vld [vmem:[#allocation12 + $0x86c] ss:$16 sps:$4 sm:$0xff]  }
 0x55f   : > { %4778 = vmatprep.subr.bf16.mxu0 %v12320_v34  ;;  %v12398_v34 = vld [vmem:[#allocation12 + $0x18c] ss:$16 sps:$4 sm:$0xff]  }
 0x561   : > { %5495 = vmatpush1.bf16.msra.mxu1 %v12315_v63  ;;  %v12393_v63 = vld [vmem:[#allocation12 + $0x868] ss:$16 sps:$4 sm:$0xff]  }
 0x562   : > { %4779 = vmatpush1.bf16.msra.mxu0 %v12318_v10  ;;  %5496 = vmatprep.subr.bf16.mxu1 %v12323_v12  ;;  %v12396_v10 = vld [vmem:[#allocation12 + $0x188] ss:$16 sps:$4 sm:$0xff]   ;;  %v12401_v12 = vld [vmem:[#allocation12 + $0x88c] ss:$16 sps:$4 sm:$0xff]  }
 0x563   : > { %4805 = vmatprep.subr.bf16.mxu0 %v12326_v58  ;;  %v12404_v58 = vld [vmem:[#allocation12 + $0x1ac] ss:$16 sps:$4 sm:$0xff]  }
 0x565   : > { %4797 = vmatmul.mubr.bf16.vlgmr.msra.gmra.mrb[68].mxu0 %v14394_v44  ;;  %5497 = vmatpush1.bf16.msra.mxu1 %v12321_v17  ;;  %v12363_v44 = vld [vmem:[#allocation12 + $0x7c0] ss:$16 sps:$4 sm:$0xff]   ;;  %v12399_v17 = vld [vmem:[#allocation12 + $0x888] ss:$16 sps:$4 sm:$0xff]  }
 0x566   : > { %4806 = vmatpush1.bf16.msra.mxu0 %v12324_v33  ;;  %4837 = vmatprep.mubr.bf16.mxu0 %v14379_v3  ;;  %v12350_v3 = vld [vmem:[#allocation12 + $0x8c] ss:$16 sps:$4 sm:$0xff]   ;;  %v12402_v33 = vld [vmem:[#allocation12 + $0x1a8] ss:$16 sps:$4 sm:$0xff]  }
 0x567   : > { %5498 = vmatprep.subr.bf16.mxu1 %v12329_v59  ;;  %4807 = vmatprep.subr.bf16.mxu0 %v12332_v14  ;;  %v12407_v59 = vld [vmem:[#allocation12 + $0x8ac] ss:$16 sps:$4 sm:$0xff]  }
 0x568   : > { %v12410_v14 = vld [vmem:[#allocation12 + $0x1cc] ss:$16 sps:$4 sm:$0xff]  }
 0x569   : > { %5499 = vmatpush1.bf16.msra.mxu1 %v12327_v15  ;;  %v5654_v15 = vld [vmem:[#allocation2 + $0x20] sm:$0x7] }
 0x56a   : > { %4808 = vmatpush1.bf16.msra.mxu0 %v12330_v5  ;;  %5500 = vmatprep.subr.bf16.mxu1 %v12335_v18  ;;  %v12405_v5 = vld [vmem:[#allocation12 + $0x8a8] ss:$16 sps:$4 sm:$0xff]  }
 0x56b   : > { %4809 = vmatprep.subr.bf16.mxu0 %v12338_v22  ;;  %v12408_v18 = vld [vmem:[#allocation12 + $0x1c8] ss:$16 sps:$4 sm:$0xff]   ;;  %v12413_v22 = vld [vmem:[#allocation12 + $0x8cc] ss:$16 sps:$4 sm:$0xff]  }
 0x56d   : > { %5501 = vmatpush1.bf16.msra.mxu1 %v12333_v26  ;;  %v5651_v26 = vld [vmem:[#allocation2 + $0x8] sm:$0xf8] }
 0x56e   : > { %4810 = vmatpush1.bf16.msra.mxu0 %v12336_v19  ;;  %5502 = vmatprep.subr.bf16.mxu1 %v12341_v24  ;;  %v12416_v24 = vld [vmem:[#allocation12 + $0x1ec] ss:$16 sps:$4 sm:$0xff]  }
 0x56f   : > { %4811 = vmatprep.subr.bf16.mxu0 %v12344_v54  ;;  %v5657_v54 = vpack.c.bf16 %v5654_v15, %v5651_v26  ;;  %v12465_v26 = vld [vmem:[#allocation12 + $0x9e0] ss:$16 sps:$4 sm:$0xff]  }
 0x571   : > { %5503 = vmatpush1.bf16.msra.mxu1 %v12339_v29 }
 0x572   : > { %4812 = vmatpush1.bf16.msra.mxu0 %v12342_v30  ;;  %5504 = vmatprep.subr.bf16.mxu1 %v12347_v31  ;;  %v12411_v31 = vld [vmem:[#allocation12 + $0x8c8] ss:$16 sps:$4 sm:$0xff]  }
 0x573   : > { %4813 = vmatprep.subr.bf16.mxu0 %v12350_v3 }
 0x575   : > { %5505 = vmatpush1.bf16.msra.mxu1 %v12345_v32  ;;  %v12414_v32 = vld [vmem:[#allocation12 + $0x1e8] ss:$16 sps:$4 sm:$0xff]  }
 0x576   : > { %4814 = vmatpush1.bf16.msra.mxu0 %v12348_v35  ;;  %5506 = vmatprep.subr.bf16.mxu1 %v12353_v36  ;;  %v12419_v35 = vld [vmem:[#allocation12 + $0x8ec] ss:$16 sps:$4 sm:$0xff]   ;;  %v12422_v36 = vld [vmem:[#allocation12 + $0x804] ss:$16 sps:$4 sm:$0xff]  }
 0x577   : > { %4815 = vmatprep.subr.bf16.mxu0 %v12356_v37  ;;  %v4892_v37 = vld [vmem:[#allocation2 + $0x28] sm:$0x3] }
 0x579   : > { %5507 = vmatpush1.bf16.msra.mxu1 %v12351_v38  ;;  %v5765_v38 = vshrl.u32 %v5657_v54, 16 }
 0x57a   : > { %4816 = vmatpush1.bf16.msra.mxu0 %v12354_v16  ;;  %5508 = vmatprep.subr.bf16.mxu1 %v12359_v21  ;;  %v5768_v16 = vshll.u32 %v5657_v54, 16  ;;  %v12417_v21 = vld [vmem:[#allocation12 + $0x8e8] ss:$16 sps:$4 sm:$0xff]   ;;  %v12473_v54 = vld [vmem:[#allocation12 + $0xa04] ss:$16 sps:$4 sm:$0xff]  }
 0x57b   : > { %4817 = vmatprep.subr.bf16.mxu0 %v12362_v39  ;;  %v4889_v39 = vld [vmem:[#allocation2 + $0x10] sm:$0xfc] }
 0x57d   : > { %5509 = vmatpush1.bf16.msra.mxu1 %v12357_v40  ;;  %v12420_v40 = vld [vmem:[#allocation12 + $0x800] ss:$16 sps:$4 sm:$0xff]  }
 0x57e   : > { %4818 = vmatpush1.bf16.msra.mxu0 %v12360_v41  ;;  %5510 = vmatprep.subr.bf16.mxu1 %v12365_v42  ;;  %v4895_v41 = vpack.c.bf16 %v4892_v37, %v4889_v39  ;;  %v12425_v42 = vld [vmem:[#allocation12 + $0x904] ss:$16 sps:$4 sm:$0xff]   ;;  %v12480_v37 = vld [vmem:[#allocation12 + $0x648] ss:$16 sps:$4 sm:$0xff]  }
 0x57f   : > { %4819 = vmatprep.subr.bf16.mxu0 %v12368_v43  ;;  %v12428_v43 = vld [vmem:[#allocation12 + $0x824] ss:$16 sps:$4 sm:$0xff]   ;;  %v12486_v39 = vld [vmem:[#allocation12 + $0x668] ss:$16 sps:$4 sm:$0xff]  }
 0x581   : > { %5511 = vmatpush1.bf16.msra.mxu1 %v12363_v44  ;;  %v5767_v44 = vrot.slane %v5765_v38, 1  ;;  %v12485_v38 = vld [vmem:[#allocation12 + $0xa44] ss:$16 sps:$4 sm:$0xff]  }
 0x582   : > { %4820 = vmatpush1.bf16.msra.mxu0 %v12366_v45  ;;  %5512 = vmatprep.subr.bf16.mxu1 %v12371_v46  ;;  %v5770_v45 = vrot.slane %v5768_v16, 2  ;;  %v12423_v46 = vld [vmem:[#allocation12 + $0x900] ss:$16 sps:$4 sm:$0xff]   ;;  %v12488_v16 = vld [vmem:[#allocation12 + $0x66c] ss:$16 sps:$4 sm:$0xff]  }
 0x583   : > { %4821 = vmatprep.subr.bf16.mxu0 %v12374_v49  ;;  %v14412_v49 = vrot.slane %v4895_v41, 1  ;;  %v12489_v41 = vld [vmem:[#allocation12 + $0xa60] ss:$16 sps:$4 sm:$0xff]  }
 0x584   : > { %v14414_v47 = vor.u32 %v5770_v45, %v5767_v44  ;;  %v12500_v44 = vld [vmem:[#allocation12 + $0x6ac] ss:$16 sps:$4 sm:$0xff]   ;;  %v12495_v45 = vld [vmem:[#allocation12 + $0xa80] ss:$16 sps:$4 sm:$0xff]  }
 0x585   : > { %5513 = vmatpush1.bf16.msra.mxu1 %v12369_v51  ;;  %v12431_v51 = vld [vmem:[#allocation12 + $0x924] ss:$16 sps:$4 sm:$0xff]  }
 0x586   : > { %4822 = vmatpush1.bf16.msra.mxu0 %v12372_v50  ;;  %5605 = vmatprep.subr.bf16.mxu1 %v12377_v52  ;;  %v12434_v50 = vld [vmem:[#allocation12 + $0x844] ss:$16 sps:$4 sm:$0xff]  }
 0x587   : > { %4823 = vmatprep.subr.bf16.mxu0 %v12380_v55  ;;  %v12437_v52 = vld [vmem:[#allocation12 + $0x944] ss:$16 sps:$4 sm:$0xff]  }
 0x588   : > { %5515 = vmatmul.mubr.bf16.vlgmr.msra.gmra.mrb[56].mxu1 %v14403_v57  ;;  %v12440_v55 = vld [vmem:[#allocation12 + $0x864] ss:$16 sps:$4 sm:$0xff]  }
 0x589   : > { %5606 = vmatpush1.bf16.msra.mxu1 %v12375_v56  ;;  %5637 = vmatprep.mubr.bf16.mxu1 %v13746_v0  ;;  %v12435_v56 = vld [vmem:[#allocation12 + $0x940] ss:$16 sps:$4 sm:$0xff]  }
 0x58a   : > { %4824 = vmatpush1.bf16.msra.mxu0 %v12378_v60  ;;  %5607 = vmatprep.subr.bf16.mxu1 %v12383_v61  ;;  %v12438_v60 = vld [vmem:[#allocation12 + $0x860] ss:$16 sps:$4 sm:$0xff]   ;;  %v12443_v61 = vld [vmem:[#allocation12 + $0x964] ss:$16 sps:$4 sm:$0xff]  }
 0x58b   : > { %4825 = vmatprep.subr.bf16.mxu0 %v12386_v62  ;;  %v12446_v62 = vld [vmem:[#allocation12 + $0x884] ss:$16 sps:$4 sm:$0xff]  }
 0x58d   : > { %5608 = vmatpush1.bf16.msra.mxu1 %v12381_v2  ;;  %v12441_v2 = vld [vmem:[#allocation12 + $0x960] ss:$16 sps:$4 sm:$0xff]  }
 0x58e   : > { %4826 = vmatpush1.bf16.msra.mxu0 %v12384_v4  ;;  %5609 = vmatprep.subr.bf16.mxu1 %v12389_v6  ;;  %v12444_v4 = vld [vmem:[#allocation12 + $0x880] ss:$16 sps:$4 sm:$0xff]   ;;  %v12449_v6 = vld [vmem:[#allocation12 + $0x984] ss:$16 sps:$4 sm:$0xff]  }
 0x58f   : > { %4827 = vmatprep.subr.bf16.mxu0 %v12392_v13  ;;  %v12452_v13 = vld [vmem:[#allocation12 + $0x8a4] ss:$16 sps:$4 sm:$0xff]  }
 0x591   : > { %5610 = vmatpush1.bf16.msra.mxu1 %v12387_v8  ;;  %v12447_v8 = vld [vmem:[#allocation12 + $0x980] ss:$16 sps:$4 sm:$0xff]  }
 0x592   : > { %4828 = vmatpush1.bf16.msra.mxu0 %v12390_v9  ;;  %5611 = vmatprep.subr.bf16.mxu1 %v12395_v1  ;;  %v12450_v9 = vld [vmem:[#allocation12 + $0x8a0] ss:$16 sps:$4 sm:$0xff]   ;;  %v12455_v1 = vld [vmem:[#allocation12 + $0x9a4] ss:$16 sps:$4 sm:$0xff]  }
 0x593   : > { %4829 = vmatprep.subr.bf16.mxu0 %v12398_v34  ;;  %v12458_v34 = vld [vmem:[#allocation12 + $0x8c4] ss:$16 sps:$4 sm:$0xff]  }
 0x595   : > { %5612 = vmatpush1.bf16.msra.mxu1 %v12393_v63  ;;  %v12453_v63 = vld [vmem:[#allocation12 + $0x9a0] ss:$16 sps:$4 sm:$0xff]  }
 0x596   : > { %4830 = vmatpush1.bf16.msra.mxu0 %v12396_v10  ;;  %5613 = vmatprep.subr.bf16.mxu1 %v12401_v12  ;;  %v12456_v10 = vld [vmem:[#allocation12 + $0x8c0] ss:$16 sps:$4 sm:$0xff]   ;;  %v12461_v12 = vld [vmem:[#allocation12 + $0x9c4] ss:$16 sps:$4 sm:$0xff]  }
 0x597   : > { %4831 = vmatprep.subr.bf16.mxu0 %v12404_v58 }
 0x599   : > { %5614 = vmatpush1.bf16.msra.mxu1 %v12399_v17  ;;  %v12464_v17 = vld [vmem:[#allocation12 + $0x8e4] ss:$16 sps:$4 sm:$0xff]  }
 0x59a   : > { %4832 = vmatpush1.bf16.msra.mxu0 %v12402_v33  ;;  %5615 = vmatprep.subr.bf16.mxu1 %v12407_v59 }
 0x59b   : > { %v14407_v19 = vpop.f32.mrb[40].mxu1  ;;  %4833 = vmatprep.subr.bf16.mxu0 %v12410_v14  ;;  %v12459_v14 = vld [vmem:[#allocation12 + $0x9c0] ss:$16 sps:$4 sm:$0xff]  }
 0x59c   : > { %v14409_v29 = vpop.f32.mrb[41].mxu1 }
 0x59d   : > { %5616 = vmatpush1.bf16.msra.mxu1 %v12405_v5  ;;  %v4158_v30 = vpop.f32.mrb[42].mxu1  ;;  %v12462_v5 = vld [vmem:[#allocation12 + $0x8e0] ss:$16 sps:$4 sm:$0xff]  }
 0x59e   : > { %4834 = vmatpush1.bf16.msra.mxu0 %v12408_v18  ;;  %v4159_v3 = vpop.f32.mrb[43].mxu1  ;;  %5617 = vmatprep.subr.bf16.mxu1 %v12413_v22  ;;  %v12467_v18 = vld [vmem:[#allocation12 + $0x9e4] ss:$16 sps:$4 sm:$0xff]   ;;  %v12470_v22 = vld [vmem:[#allocation12 + $0x60c] ss:$16 sps:$4 sm:$0xff]  }
 0x59f   : > { %4835 = vmatprep.subr.bf16.mxu0 %v12416_v24  ;;  %v12468_v24 = vld [vmem:[#allocation12 + $0x608] ss:$16 sps:$4 sm:$0xff]   ;;  %v12476_v30 = vld [vmem:[#allocation12 + $0x62c] ss:$16 sps:$4 sm:$0xff]  }
 0x5a0   : > { %v12474_v3 = vld [vmem:[#allocation12 + $0x628] ss:$16 sps:$4 sm:$0xff]  }
 0x5a1   : > { %5618 = vmatpush1.bf16.msra.mxu1 %v12411_v31  ;;  %v12471_v31 = vld [vmem:[#allocation12 + $0xa00] ss:$16 sps:$4 sm:$0xff]  }
 0x5a2   : > { %4836 = vmatpush1.bf16.msra.mxu0 %v12414_v32  ;;  %5619 = vmatprep.subr.bf16.mxu1 %v12419_v35  ;;  %v12479_v32 = vld [vmem:[#allocation12 + $0xa24] ss:$16 sps:$4 sm:$0xff]   ;;  %v12482_v35 = vld [vmem:[#allocation12 + $0x64c] ss:$16 sps:$4 sm:$0xff]  }
 0x5a3   : > { %5523 = vmatprep.subr.bf16.mxu0 %v12422_v36  ;;  %v12477_v36 = vld [vmem:[#allocation12 + $0xa20] ss:$16 sps:$4 sm:$0xff]  }
 0x5a5   : > { %4838 = vmatmul.mubr.bf16.vlgmr.msra.gmra.mrb[72].mxu0 %v14387_v7  ;;  %5620 = vmatpush1.bf16.msra.mxu1 %v12417_v21  ;;  %v12429_v7 = vld [vmem:[#allocation12 + $0x920] ss:$16 sps:$4 sm:$0xff]  }
 0x5a6   : > { %5524 = vmatpush1.bf16.msra.mxu0 %v12420_v40  ;;  %6263 = vmatprep.subr.bf16.mxu1 %v12425_v42  ;;  %v12483_v21 = vld [vmem:[#allocation12 + $0xa40] ss:$16 sps:$4 sm:$0xff]   ;;  %v12491_v40 = vld [vmem:[#allocation12 + $0xa64] ss:$16 sps:$4 sm:$0xff]   ;;  %v12492_v42 = vld [vmem:[#allocation12 + $0x688] ss:$16 sps:$4 sm:$0xff]  }
 0x5a7   : > { %5525 = vmatprep.subr.bf16.mxu0 %v12428_v43  ;;  %5555 = vmatprep.mubr.bf16.mxu0 %v13746_v0  ;;  %v12497_v43 = vld [vmem:[#allocation12 + $0xa84] ss:$16 sps:$4 sm:$0xff]  }
 0x5a8   : > { %5638 = vmatmul.mubr.bf16.vlgmr.msra.gmra.mrb[60].mxu1 %v14412_v49 }
 0x5a9   : > { %6264 = vmatpush1.bf16.msra.mxu1 %v12423_v46  ;;  %6295 = vmatprep.mubr.bf16.mxu1 %v14414_v47  ;;  %v12498_v46 = vld [vmem:[#allocation12 + $0x6a8] ss:$16 sps:$4 sm:$0xff]  }
 0x5aa   : > { %5526 = vmatpush1.bf16.msra.mxu0 %v12426_v27  ;;  %6265 = vmatprep.subr.bf16.mxu1 %v12431_v51  ;;  %v12506_v27 = vld [vmem:[#allocation12 + $0x6cc] ss:$16 sps:$4 sm:$0xff]   ;;  %v5653_v51 = vld [vmem:[#allocation2 + $0x18] sm:$0x7] }
 0x5ab   : > { %5527 = vmatprep.subr.bf16.mxu0 %v12434_v50 }
 0x5ad   : > { %6266 = vmatpush1.bf16.msra.mxu1 %v12429_v7 }
 0x5ae   : > { %5528 = vmatpush1.bf16.msra.mxu0 %v12432_v53  ;;  %6267 = vmatprep.subr.bf16.mxu1 %v12437_v52  ;;  %v12501_v52 = vld [vmem:[#allocation12 + $0xaa0] ss:$16 sps:$4 sm:$0xff]  }
 0x5af   : > { %5529 = vmatprep.subr.bf16.mxu0 %v12440_v55  ;;  %v5650_v55 = vld [vmem:[#allocation2] sm:$0xf8] }
 0x5b1   : > { %6268 = vmatpush1.bf16.msra.mxu1 %v12435_v56 }
 0x5b2   : > { %5530 = vmatpush1.bf16.msra.mxu0 %v12438_v60  ;;  %6269 = vmatprep.subr.bf16.mxu1 %v12443_v61  ;;  %v12504_v61 = vld [vmem:[#allocation12 + $0x6c8] ss:$16 sps:$4 sm:$0xff]  }
 0x5b3   : > { %5531 = vmatprep.subr.bf16.mxu0 %v12446_v62  ;;  %v12509_v62 = vld [vmem:[#allocation12 + $0xac4] ss:$16 sps:$4 sm:$0xff]  }
 0x5b5   : > { %6270 = vmatpush1.bf16.msra.mxu1 %v12441_v2  ;;  %v5656_v2 = vpack.c.bf16 %v5653_v51, %v5650_v55  ;;  %v12555_v55 = vld [vmem:[#allocation12 + $0xbc8] ss:$16 sps:$4 sm:$0xff]  }
 0x5b6   : > { %5532 = vmatpush1.bf16.msra.mxu0 %v12444_v4  ;;  %6271 = vmatprep.subr.bf16.mxu1 %v12449_v6  ;;  %v12512_v6 = vld [vmem:[#allocation12 + $0x6ec] ss:$16 sps:$4 sm:$0xff]  }
 0x5b7   : > { %5533 = vmatprep.subr.bf16.mxu0 %v12452_v13  ;;  %v12507_v13 = vld [vmem:[#allocation12 + $0xac0] ss:$16 sps:$4 sm:$0xff]  }
 0x5b9   : > { %6272 = vmatpush1.bf16.msra.mxu1 %v12447_v8  ;;  %v12515_v8 = vld [vmem:[#allocation12 + $0xae4] ss:$16 sps:$4 sm:$0xff]  }
 0x5ba   : > { %5534 = vmatpush1.bf16.msra.mxu0 %v12450_v9  ;;  %6273 = vmatprep.subr.bf16.mxu1 %v12455_v1  ;;  %v5757_v9 = vshrl.u32 %v5656_v2, 16  ;;  %v5760_v1 = vshll.u32 %v5656_v2, 16  ;;  %v12558_v2 = vld [vmem:[#allocation12 + $0x7e8] ss:$16 sps:$4 sm:$0xff]  }
 0x5bb   : > { %v14419_v58 = vpop.f32.mrb[44].mxu1  ;;  %5535 = vmatprep.subr.bf16.mxu0 %v12458_v34  ;;  %v12513_v34 = vld [vmem:[#allocation12 + $0xae0] ss:$16 sps:$4 sm:$0xff]  }
 0x5bc   : > { %v14421_v33 = vpop.f32.mrb[45].mxu1 }
 0x5bd   : > { %v4240_v59 = vpop.f32.mrb[46].mxu1  ;;  %6274 = vmatpush1.bf16.msra.mxu1 %v12453_v63  ;;  %v12516_v63 = vld [vmem:[#allocation12 + $0x708] ss:$16 sps:$4 sm:$0xff]  }
 0x5be   : > { %v4241_v15 = vpop.f32.mrb[47].mxu1  ;;  %5536 = vmatpush1.bf16.msra.mxu0 %v12456_v10  ;;  %6275 = vmatprep.subr.bf16.mxu1 %v12461_v12  ;;  %v5759_v10 = vrot.slane %v5757_v9, 1  ;;  %v5762_v12 = vrot.slane %v5760_v1, 2  ;;  %v12524_v59 = vld [vmem:[#allocation12 + $0x72c] ss:$16 sps:$4 sm:$0xff]  }
 0x5bf   : > { %5537 = vmatprep.subr.bf16.mxu0 %v12464_v17  ;;  %v12521_v17 = vld [vmem:[#allocation12 + $0xb0c] ss:$16 sps:$4 sm:$0xff]   ;;  %v12569_v9 = vld [vmem:[#allocation12 + $0xc04] ss:$16 sps:$4 sm:$0xff]  }
 0x5c0   : > { %v14431_v15 = vor.u32 %v5762_v12, %v5759_v10  ;;  %v6432_v1 = vld [vmem:[#allocation2 + $0x8] sm:$0xf0]  ;;  %v12570_v12 = vld [vmem:[#allocation12 + $0xb20] ss:$16 sps:$4 sm:$0xff]  }
 0x5c1   : > { %6276 = vmatpush1.bf16.msra.mxu1 %v12459_v14  ;;  %v12519_v14 = vld [vmem:[#allocation12 + $0xb08] ss:$16 sps:$4 sm:$0xff]  }
 0x5c2   : > { %5538 = vmatpush1.bf16.msra.mxu0 %v12462_v5  ;;  %6277 = vmatprep.subr.bf16.mxu1 %v12467_v18  ;;  %v12522_v5 = vld [vmem:[#allocation12 + $0x728] ss:$16 sps:$4 sm:$0xff]   ;;  %v12527_v18 = vld [vmem:[#allocation12 + $0xb2c] ss:$16 sps:$4 sm:$0xff]  }
 0x5c3   : > { %5564 = vmatprep.subr.bf16.mxu0 %v12470_v22  ;;  %v12530_v22 = vld [vmem:[#allocation12 + $0x74c] ss:$16 sps:$4 sm:$0xff]  }
 0x5c5   : > { %5556 = vmatmul.mubr.bf16.vlgmr.msra.gmra.mrb[76].mxu0 %v14412_v49  ;;  %6278 = vmatpush1.bf16.msra.mxu1 %v12465_v26  ;;  %v12503_v49 = vld [vmem:[#allocation12 + $0xaa4] ss:$16 sps:$4 sm:$0xff]   ;;  %v12525_v26 = vld [vmem:[#allocation12 + $0xb28] ss:$16 sps:$4 sm:$0xff]  }
 0x5c6   : > { %5565 = vmatpush1.bf16.msra.mxu0 %v12468_v24  ;;  %5596 = vmatprep.mubr.bf16.mxu0 %v14396_v48  ;;  %v12494_v48 = vld [vmem:[#allocation12 + $0x68c] ss:$16 sps:$4 sm:$0xff]   ;;  %v12528_v24 = vld [vmem:[#allocation12 + $0x748] ss:$16 sps:$4 sm:$0xff]  }
 0x5c7   : > { %6279 = vmatprep.subr.bf16.mxu1 %v12473_v54  ;;  %5566 = vmatprep.subr.bf16.mxu0 %v12476_v30  ;;  %v12533_v54 = vld [vmem:[#allocation12 + $0xb4c] ss:$16 sps:$4 sm:$0xff]  }
 0x5c8   : > { %v12536_v30 = vld [vmem:[#allocation12 + $0x76c] ss:$16 sps:$4 sm:$0xff]  }
 0x5c9   : > { %6280 = vmatpush1.bf16.msra.mxu1 %v12471_v31  ;;  %v12531_v31 = vld [vmem:[#allocation12 + $0xb48] ss:$16 sps:$4 sm:$0xff]  }
 0x5ca   : > { %5567 = vmatpush1.bf16.msra.mxu0 %v12474_v3  ;;  %6281 = vmatprep.subr.bf16.mxu1 %v12479_v32  ;;  %v12534_v3 = vld [vmem:[#allocation12 + $0x768] ss:$16 sps:$4 sm:$0xff]   ;;  %v12539_v32 = vld [vmem:[#allocation12 + $0xb6c] ss:$16 sps:$4 sm:$0xff]  }
 0x5cb   : > { %5568 = vmatprep.subr.bf16.mxu0 %v12482_v35  ;;  %v12542_v35 = vld [vmem:[#allocation12 + $0x78c] ss:$16 sps:$4 sm:$0xff]  }
 0x5cd   : > { %6282 = vmatpush1.bf16.msra.mxu1 %v12477_v36  ;;  %v12537_v36 = vld [vmem:[#allocation12 + $0xb68] ss:$16 sps:$4 sm:$0xff]  }
 0x5ce   : > { %5569 = vmatpush1.bf16.msra.mxu0 %v12480_v37  ;;  %6283 = vmatprep.subr.bf16.mxu1 %v12485_v38  ;;  %v12540_v37 = vld [vmem:[#allocation12 + $0x788] ss:$16 sps:$4 sm:$0xff]   ;;  %v12545_v38 = vld [vmem:[#allocation12 + $0xb8c] ss:$16 sps:$4 sm:$0xff]  }
 0x5cf   : > { %5570 = vmatprep.subr.bf16.mxu0 %v12488_v16  ;;  %v12548_v16 = vld [vmem:[#allocation12 + $0x7ac] ss:$16 sps:$4 sm:$0xff]  }
 0x5d1   : > { %6284 = vmatpush1.bf16.msra.mxu1 %v12483_v21  ;;  %v12543_v21 = vld [vmem:[#allocation12 + $0xb88] ss:$16 sps:$4 sm:$0xff]  }
 0x5d2   : > { %5571 = vmatpush1.bf16.msra.mxu0 %v12486_v39  ;;  %6285 = vmatprep.subr.bf16.mxu1 %v12491_v40  ;;  %v12546_v39 = vld [vmem:[#allocation12 + $0x7a8] ss:$16 sps:$4 sm:$0xff]   ;;  %v12551_v40 = vld [vmem:[#allocation12 + $0xbac] ss:$16 sps:$4 sm:$0xff]  }
 0x5d3   : > { %5572 = vmatprep.subr.bf16.mxu0 %v12494_v48  ;;  %v5655_v48 = vld [vmem:[#allocation2 + $0x28] sm:$0x7] }
 0x5d5   : > { %6286 = vmatpush1.bf16.msra.mxu1 %v12489_v41  ;;  %v12554_v41 = vld [vmem:[#allocation12 + $0x7cc] ss:$16 sps:$4 sm:$0xff]  }
 0x5d6   : > { %5573 = vmatpush1.bf16.msra.mxu0 %v12492_v42  ;;  %6287 = vmatprep.subr.bf16.mxu1 %v12497_v43  ;;  %v5652_v42 = vld [vmem:[#allocation2 + $0x10] sm:$0xf8]  ;;  %v12549_v43 = vld [vmem:[#allocation12 + $0xba8] ss:$16 sps:$4 sm:$0xff]  }
 0x5d7   : > { %5574 = vmatprep.subr.bf16.mxu0 %v12500_v44  ;;  %v5658_v44 = vpack.c.bf16 %v5655_v48, %v5652_v42  ;;  %v12597_v48 = vld [vmem:[#allocation12 + $0xca0] ss:$16 sps:$4 sm:$0xff]  }
 0x5d8   : > { %v4113_v50 = vpop.f32.mrb[60].mxu0 }
 0x5d9   : > { %v14426_v7 = vadd.f32 %v14407_v19, %v4113_v50  ;;  %6288 = vmatpush1.bf16.msra.mxu1 %v12495_v45  ;;  %v4115_v53 = vpop.f32.mrb[61].mxu0  ;;  %v12510_v19 = vld [vmem:[#allocation12 + $0x6e8] ss:$16 sps:$4 sm:$0xff]  }
 0x5da   : > { %v14429_v56 = vadd.f32 %v14409_v29, %v4115_v53  ;;  %5575 = vmatpush1.bf16.msra.mxu0 %v12498_v46  ;;  %v4117_v60 = vpop.f32.mrb[62].mxu0  ;;  %6289 = vmatprep.subr.bf16.mxu1 %v12503_v49  ;;  %v12518_v29 = vld [vmem:[#allocation12 + $0x70c] ss:$16 sps:$4 sm:$0xff]   ;;  %v12552_v45 = vld [vmem:[#allocation12 + $0x7c8] ss:$16 sps:$4 sm:$0xff]  }
 0x5db   : > { %v4118_v4 = vpop.f32.mrb[63].mxu0  ;;  %5576 = vmatprep.subr.bf16.mxu0 %v12506_v27  ;;  %v12557_v46 = vld [vmem:[#allocation12 + $0xbcc] ss:$16 sps:$4 sm:$0xff]   ;;  %v5773_v60 = vshrl.u32 %v5658_v44, 16 }
 0x5dc   : > { %v12560_v27 = vld [vmem:[#allocation12 + $0x7ec] ss:$16 sps:$4 sm:$0xff]  }
 0x5dd   : > { %6290 = vmatpush1.bf16.msra.mxu1 %v12501_v52  ;;  %v12563_v4 = vld [vmem:[#allocation12 + $0xbec] ss:$16 sps:$4 sm:$0xff]  }
 0x5de   : > { %5577 = vmatpush1.bf16.msra.mxu0 %v12504_v61  ;;  %6291 = vmatprep.subr.bf16.mxu1 %v12509_v62  ;;  %v5776_v61 = vshll.u32 %v5658_v44, 16  ;;  %v12605_v44 = vld [vmem:[#allocation12 + $0xcc4] ss:$16 sps:$4 sm:$0xff]  }
 0x5df   : > { %5578 = vmatprep.subr.bf16.mxu0 %v12512_v6  ;;  %v12566_v6 = vld [vmem:[#allocation12 + $0xb04] ss:$16 sps:$4 sm:$0xff]  }
 0x5e1   : > { %6292 = vmatpush1.bf16.msra.mxu1 %v12507_v13  ;;  %v6435_v13 = vld [vmem:[#allocation2 + $0x20] sm:$0xf] }
 0x5e2   : > { %5579 = vmatpush1.bf16.msra.mxu0 %v12510_v19  ;;  %6293 = vmatprep.subr.bf16.mxu1 %v12515_v8  ;;  %v5775_v19 = vrot.slane %v5773_v60, 1  ;;  %v5778_v8 = vrot.slane %v5776_v61, 2  ;;  %v12614_v60 = vld [vmem:[#allocation12 + $0x90c] ss:$16 sps:$4 sm:$0xff]   ;;  %v12609_v61 = vld [vmem:[#allocation12 + $0xce0] ss:$16 sps:$4 sm:$0xff]  }
 0x5e3   : > { %5580 = vmatprep.subr.bf16.mxu0 %v12518_v29  ;;  %v12572_v29 = vld [vmem:[#allocation12 + $0xb24] ss:$16 sps:$4 sm:$0xff]  }
 0x5e4   : > { %v14442_v10 = vor.u32 %v5778_v8, %v5775_v19  ;;  %v12626_v19 = vld [vmem:[#allocation12 + $0x94c] ss:$16 sps:$4 sm:$0xff]   ;;  %v12621_v8 = vld [vmem:[#allocation12 + $0xd20] ss:$16 sps:$4 sm:$0xff]  }
 0x5e5   : > { %6294 = vmatpush1.bf16.msra.mxu1 %v12513_v34  ;;  %v6438_v34 = vpack.c.bf16 %v6435_v13, %v6432_v1  ;;  %v12618_v13 = vld [vmem:[#allocation12 + $0x928] ss:$16 sps:$4 sm:$0xff]   ;;  %v12632_v1 = vld [vmem:[#allocation12 + $0x96c] ss:$16 sps:$4 sm:$0xff]  }
 0x5e6   : > { %5581 = vmatpush1.bf16.msra.mxu0 %v12516_v63  ;;  %6386 = vmatprep.subr.bf16.mxu1 %v12521_v17  ;;  %v12567_v63 = vld [vmem:[#allocation12 + $0xc00] ss:$16 sps:$4 sm:$0xff]   ;;  %v12575_v17 = vld [vmem:[#allocation12 + $0xc24] ss:$16 sps:$4 sm:$0xff]  }
 0x5e7   : > { %5582 = vmatprep.subr.bf16.mxu0 %v12524_v59  ;;  %v14444_v59 = vrot.slane %v6438_v34, 2  ;;  %v12630_v34 = vld [vmem:[#allocation12 + $0x968] ss:$16 sps:$4 sm:$0xff]  }
 0x5e8   : > { %6296 = vmatmul.mubr.bf16.vlgmr.msra.gmra.mrb[64].mxu1 %v14431_v15 }
 0x5e9   : > { %6387 = vmatpush1.bf16.msra.mxu1 %v12519_v14  ;;  %6418 = vmatprep.mubr.bf16.mxu1 %v13746_v0  ;;  %v12578_v14 = vld [vmem:[#allocation12 + $0xb44] ss:$16 sps:$4 sm:$0xff]  }
 0x5ea   : > { %5583 = vmatpush1.bf16.msra.mxu0 %v12522_v5  ;;  %6388 = vmatprep.subr.bf16.mxu1 %v12527_v18  ;;  %v12576_v5 = vld [vmem:[#allocation12 + $0xb40] ss:$16 sps:$4 sm:$0xff]   ;;  %v12581_v18 = vld [vmem:[#allocation12 + $0xc44] ss:$16 sps:$4 sm:$0xff]  }
 0x5eb   : > { %5584 = vmatprep.subr.bf16.mxu0 %v12530_v22  ;;  %v12584_v22 = vld [vmem:[#allocation12 + $0xb64] ss:$16 sps:$4 sm:$0xff]  }
 0x5ed   : > { %6389 = vmatpush1.bf16.msra.mxu1 %v12525_v26  ;;  %v12579_v26 = vld [vmem:[#allocation12 + $0xc40] ss:$16 sps:$4 sm:$0xff]  }
 0x5ee   : > { %5585 = vmatpush1.bf16.msra.mxu0 %v12528_v24  ;;  %6390 = vmatprep.subr.bf16.mxu1 %v12533_v54  ;;  %v12582_v24 = vld [vmem:[#allocation12 + $0xb60] ss:$16 sps:$4 sm:$0xff]   ;;  %v12587_v54 = vld [vmem:[#allocation12 + $0xc64] ss:$16 sps:$4 sm:$0xff]  }
 0x5ef   : > { %5586 = vmatprep.subr.bf16.mxu0 %v12536_v30  ;;  %v12590_v30 = vld [vmem:[#allocation12 + $0xb84] ss:$16 sps:$4 sm:$0xff]  }
 0x5f1   : > { %6391 = vmatpush1.bf16.msra.mxu1 %v12531_v31  ;;  %v12585_v31 = vld [vmem:[#allocation12 + $0xc60] ss:$16 sps:$4 sm:$0xff]  }
 0x5f2   : > { %5587 = vmatpush1.bf16.msra.mxu0 %v12534_v3  ;;  %6392 = vmatprep.subr.bf16.mxu1 %v12539_v32  ;;  %v12588_v3 = vld [vmem:[#allocation12 + $0xb80] ss:$16 sps:$4 sm:$0xff]   ;;  %v12593_v32 = vld [vmem:[#allocation12 + $0xc84] ss:$16 sps:$4 sm:$0xff]  }
 0x5f3   : > { %5588 = vmatprep.subr.bf16.mxu0 %v12542_v35  ;;  %v12596_v35 = vld [vmem:[#allocation12 + $0xba4] ss:$16 sps:$4 sm:$0xff]  }
 0x5f5   : > { %6393 = vmatpush1.bf16.msra.mxu1 %v12537_v36  ;;  %v12591_v36 = vld [vmem:[#allocation12 + $0xc80] ss:$16 sps:$4 sm:$0xff]  }
 0x5f6   : > { %5589 = vmatpush1.bf16.msra.mxu0 %v12540_v37  ;;  %6394 = vmatprep.subr.bf16.mxu1 %v12545_v38  ;;  %v12594_v37 = vld [vmem:[#allocation12 + $0xba0] ss:$16 sps:$4 sm:$0xff]   ;;  %v12599_v38 = vld [vmem:[#allocation12 + $0xca4] ss:$16 sps:$4 sm:$0xff]  }
 0x5f7   : > { %5590 = vmatprep.subr.bf16.mxu0 %v12548_v16  ;;  %v12602_v16 = vld [vmem:[#allocation12 + $0xbc4] ss:$16 sps:$4 sm:$0xff]  }
 0x5f9   : > { %6395 = vmatpush1.bf16.msra.mxu1 %v12543_v21 }
 0x5fa   : > { %5591 = vmatpush1.bf16.msra.mxu0 %v12546_v39  ;;  %6396 = vmatprep.subr.bf16.mxu1 %v12551_v40 }
 0x5fb   : > { %v4757_v49 = vpop.f32.mrb[48].mxu1  ;;  %5592 = vmatprep.subr.bf16.mxu0 %v12554_v41 }
 0x5fc   : > { %v14436_v51 = vadd.f32 %v4757_v49, %v14426_v7  ;;  %v4759_v50 = vpop.f32.mrb[49].mxu1  ;;  %v12561_v7 = vld [vmem:[#allocation12 + $0xbe8] ss:$16 sps:$4 sm:$0xff]   ;;  %v12608_v49 = vld [vmem:[#allocation12 + $0xbe4] ss:$16 sps:$4 sm:$0xff]  }
 0x5fd   : > { %v14439_v53 = vadd.f32 %v4759_v50, %v14429_v56  ;;  %v4761_v52 = vpop.f32.mrb[50].mxu1  ;;  %6397 = vmatpush1.bf16.msra.mxu1 %v12549_v43  ;;  %v12564_v56 = vld [vmem:[#allocation12 + $0xb00] ss:$16 sps:$4 sm:$0xff]  }
 0x5fe   : > { %v4762_v62 = vpop.f32.mrb[51].mxu1  ;;  %5593 = vmatpush1.bf16.msra.mxu0 %v12552_v45  ;;  %6398 = vmatprep.subr.bf16.mxu1 %v12557_v46  ;;  %v12600_v43 = vld [vmem:[#allocation12 + $0xbc0] ss:$16 sps:$4 sm:$0xff]  }
 0x5ff   : > { %5594 = vmatprep.subr.bf16.mxu0 %v12560_v27  ;;  %v12603_v50 = vld [vmem:[#allocation12 + $0xcc0] ss:$16 sps:$4 sm:$0xff]   ;;  %v12612_v62 = vld [vmem:[#allocation12 + $0x908] ss:$16 sps:$4 sm:$0xff]  }
 0x601   : > { %6399 = vmatpush1.bf16.msra.mxu1 %v12555_v55  ;;  %v12611_v55 = vld [vmem:[#allocation12 + $0xce4] ss:$16 sps:$4 sm:$0xff]  }
 0x602   : > { %5595 = vmatpush1.bf16.msra.mxu0 %v12558_v2  ;;  %6400 = vmatprep.subr.bf16.mxu1 %v12563_v4  ;;  %v12617_v2 = vld [vmem:[#allocation12 + $0xd04] ss:$16 sps:$4 sm:$0xff]   ;;  %v12620_v4 = vld [vmem:[#allocation12 + $0x92c] ss:$16 sps:$4 sm:$0xff]  }
 0x603   : > { %6304 = vmatprep.subr.bf16.mxu0 %v12566_v6  ;;  %v12615_v6 = vld [vmem:[#allocation12 + $0xd00] ss:$16 sps:$4 sm:$0xff]  }
 0x605   : > { %5597 = vmatmul.mubr.bf16.vlgmr.msra.gmra.mrb[80].mxu0 %v14403_v57  ;;  %6401 = vmatpush1.bf16.msra.mxu1 %v12561_v7  ;;  %v12573_v57 = vld [vmem:[#allocation12 + $0xc20] ss:$16 sps:$4 sm:$0xff]   ;;  %v12623_v7 = vld [vmem:[#allocation12 + $0xd24] ss:$16 sps:$4 sm:$0xff]  }
 0x606   : > { %6305 = vmatpush1.bf16.msra.mxu0 %v12564_v56  ;;  %7026 = vmatprep.subr.bf16.mxu1 %v12569_v9  ;;  %v12624_v56 = vld [vmem:[#allocation12 + $0x948] ss:$16 sps:$4 sm:$0xff]   ;;  %v12629_v9 = vld [vmem:[#allocation12 + $0xd44] ss:$16 sps:$4 sm:$0xff]  }
 0x607   : > { %6306 = vmatprep.subr.bf16.mxu0 %v12572_v29  ;;  %6336 = vmatprep.mubr.bf16.mxu0 %v13746_v0  ;;  %v12627_v29 = vld [vmem:[#allocation12 + $0xd40] ss:$16 sps:$4 sm:$0xff]  }
 0x608   : > { %6419 = vmatmul.mubr.bf16.vlgmr.msra.gmra.mrb[68].mxu1 %v14442_v10 }
 0x609   : > { %7027 = vmatpush1.bf16.msra.mxu1 %v12567_v63  ;;  %7058 = vmatprep.mubr.bf16.mxu1 %v14444_v59  ;;  %v12635_v63 = vld [vmem:[#allocation12 + $0xd64] ss:$16 sps:$4 sm:$0xff]  }
 0x60a   : > { %6307 = vmatpush1.bf16.msra.mxu0 %v12570_v12  ;;  %7028 = vmatprep.subr.bf16.mxu1 %v12575_v17  ;;  %v12636_v12 = vld [vmem:[#allocation12 + $0x988] ss:$16 sps:$4 sm:$0xff]   ;;  %v12641_v17 = vld [vmem:[#allocation12 + $0xd84] ss:$16 sps:$4 sm:$0xff]  }
 0x60b   : > { %6308 = vmatprep.subr.bf16.mxu0 %v12578_v14  ;;  %v12644_v14 = vld [vmem:[#allocation12 + $0x9ac] ss:$16 sps:$4 sm:$0xff]  }
 0x60d   : > { %7029 = vmatpush1.bf16.msra.mxu1 %v12573_v57  ;;  %v12639_v57 = vld [vmem:[#allocation12 + $0xd80] ss:$16 sps:$4 sm:$0xff]  }
 0x60e   : > { %6309 = vmatpush1.bf16.msra.mxu0 %v12576_v5  ;;  %7030 = vmatprep.subr.bf16.mxu1 %v12581_v18  ;;  %v12642_v5 = vld [vmem:[#allocation12 + $0x9a8] ss:$16 sps:$4 sm:$0xff]   ;;  %v12647_v18 = vld [vmem:[#allocation12 + $0xda4] ss:$16 sps:$4 sm:$0xff]  }
 0x60f   : > { %6310 = vmatprep.subr.bf16.mxu0 %v12584_v22  ;;  %v12650_v22 = vld [vmem:[#allocation12 + $0x9cc] ss:$16 sps:$4 sm:$0xff]  }
 0x611   : > { %7031 = vmatpush1.bf16.msra.mxu1 %v12579_v26 }
 0x612   : > { %6311 = vmatpush1.bf16.msra.mxu0 %v12582_v24  ;;  %7032 = vmatprep.subr.bf16.mxu1 %v12587_v54 }
 0x613   : > { %6312 = vmatprep.subr.bf16.mxu0 %v12590_v30  ;;  %v12645_v30 = vld [vmem:[#allocation12 + $0xda0] ss:$16 sps:$4 sm:$0xff]  }
 0x615   : > { %7033 = vmatpush1.bf16.msra.mxu1 %v12585_v31 }
 0x616   : > { %6313 = vmatpush1.bf16.msra.mxu0 %v12588_v3  ;;  %7034 = vmatprep.subr.bf16.mxu1 %v12593_v32  ;;  %v12648_v32 = vld [vmem:[#allocation12 + $0x9c8] ss:$16 sps:$4 sm:$0xff]  }
 0x617   : > { %6314 = vmatprep.subr.bf16.mxu0 %v12596_v35  ;;  %v12653_v35 = vld [vmem:[#allocation12 + $0xdc4] ss:$16 sps:$4 sm:$0xff]  }
 0x618   : > { %v4195_v21 = vpop.f32.mrb[64].mxu0 }
 0x619   : > { %v14450_v39 = vadd.f32 %v14419_v58, %v4195_v21  ;;  %v4197_v40 = vpop.f32.mrb[65].mxu0  ;;  %7035 = vmatpush1.bf16.msra.mxu1 %v12591_v36  ;;  %v12662_v21 = vld [vmem:[#allocation12 + $0xa0c] ss:$16 sps:$4 sm:$0xff]  }
 0x61a   : > { %v14453_v41 = vadd.f32 %v14421_v33, %v4197_v40  ;;  %v4199_v42 = vpop.f32.mrb[66].mxu0  ;;  %6315 = vmatpush1.bf16.msra.mxu0 %v12594_v37  ;;  %7036 = vmatprep.subr.bf16.mxu1 %v12599_v38  ;;  %v12606_v33 = vld [vmem:[#allocation12 + $0xbe0] ss:$16 sps:$4 sm:$0xff]   ;;  %v12656_v37 = vld [vmem:[#allocation12 + $0x9ec] ss:$16 sps:$4 sm:$0xff]  }
 0x61b   : > { %v4200_v45 = vpop.f32.mrb[67].mxu0  ;;  %v14455_v46 = vpop.f32.mrb[52].mxu1  ;;  %6316 = vmatprep.subr.bf16.mxu0 %v12602_v16  ;;  %v12651_v38 = vld [vmem:[#allocation12 + $0xdc0] ss:$16 sps:$4 sm:$0xff]   ;;  %v12659_v16 = vld [vmem:[#allocation12 + $0xde4] ss:$16 sps:$4 sm:$0xff]  }
 0x61c   : > { %v14457_v27 = vpop.f32.mrb[53].mxu1  ;;  %v6434_v40 = vld [vmem:[#allocation2 + $0x18] sm:$0xf]  ;;  %v12660_v42 = vld [vmem:[#allocation12 + $0xa08] ss:$16 sps:$4 sm:$0xff]  }
 0x61d   : > { %v4884_v58 = vpop.f32.mrb[54].mxu1  ;;  %7037 = vmatpush1.bf16.msra.mxu1 %v12597_v48  ;;  %v6431_v48 = vld [vmem:[#allocation2] sm:$0xf0] }
 0x61e   : > { %v4885_v52 = vpop.f32.mrb[55].mxu1  ;;  %6317 = vmatpush1.bf16.msra.mxu0 %v12600_v43  ;;  %7038 = vmatprep.subr.bf16.mxu1 %v12605_v44  ;;  %v6437_v43 = vpack.c.bf16 %v6434_v40, %v6431_v48  ;;  %v12665_v44 = vld [vmem:[#allocation12 + $0xe0c] ss:$16 sps:$4 sm:$0xff]   ;;  %v12719_v40 = vld [vmem:[#allocation12 + $0xe64] ss:$16 sps:$4 sm:$0xff]  }
 0x61f   : > { %6318 = vmatprep.subr.bf16.mxu0 %v12608_v49  ;;  %v12668_v45 = vld [vmem:[#allocation12 + $0xa2c] ss:$16 sps:$4 sm:$0xff]   ;;  %v12663_v49 = vld [vmem:[#allocation12 + $0xe08] ss:$16 sps:$4 sm:$0xff]   ;;  %v12722_v48 = vld [vmem:[#allocation12 + $0xe84] ss:$16 sps:$4 sm:$0xff]  }
 0x620   : > { %v14467_v58 = vrot.slane %v6437_v43, 2  ;;  %v12671_v52 = vld [vmem:[#allocation12 + $0xe2c] ss:$16 sps:$4 sm:$0xff]   ;;  %v12723_v43 = vld [vmem:[#allocation12 + $0xea0] ss:$16 sps:$4 sm:$0xff]  }
 0x621   : > { %7039 = vmatpush1.bf16.msra.mxu1 %v12603_v50  ;;  %v12666_v50 = vld [vmem:[#allocation12 + $0xa28] ss:$16 sps:$4 sm:$0xff]  }
 0x622   : > { %6319 = vmatpush1.bf16.msra.mxu0 %v12606_v33  ;;  %7040 = vmatprep.subr.bf16.mxu1 %v12611_v55  ;;  %v12674_v33 = vld [vmem:[#allocation12 + $0xa4c] ss:$16 sps:$4 sm:$0xff]   ;;  %v12669_v55 = vld [vmem:[#allocation12 + $0xe28] ss:$16 sps:$4 sm:$0xff]  }
 0x623   : > { %6345 = vmatprep.subr.bf16.mxu0 %v12614_v60  ;;  %v12672_v60 = vld [vmem:[#allocation12 + $0xa48] ss:$16 sps:$4 sm:$0xff]  }
 0x625   : > { %6337 = vmatmul.mubr.bf16.vlgmr.msra.gmra.mrb[84].mxu0 %v14442_v10  ;;  %7041 = vmatpush1.bf16.msra.mxu1 %v12609_v61  ;;  %v12633_v10 = vld [vmem:[#allocation12 + $0xd60] ss:$16 sps:$4 sm:$0xff]   ;;  %v12677_v61 = vld [vmem:[#allocation12 + $0xe4c] ss:$16 sps:$4 sm:$0xff]  }
 0x626   : > { %6346 = vmatpush1.bf16.msra.mxu0 %v12612_v62  ;;  %6377 = vmatprep.mubr.bf16.mxu0 %v14414_v47  ;;  %v12638_v47 = vld [vmem:[#allocation12 + $0x98c] ss:$16 sps:$4 sm:$0xff]  }
 0x627   : > { %7042 = vmatprep.subr.bf16.mxu1 %v12617_v2  ;;  %6347 = vmatprep.subr.bf16.mxu0 %v12620_v4  ;;  %v12680_v62 = vld [vmem:[#allocation12 + $0xa6c] ss:$16 sps:$4 sm:$0xff]   ;;  %v12675_v2 = vld [vmem:[#allocation12 + $0xe48] ss:$16 sps:$4 sm:$0xff]  }
 0x628   : > { %v12678_v4 = vld [vmem:[#allocation12 + $0xa68] ss:$16 sps:$4 sm:$0xff]  }
 0x629   : > { %7043 = vmatpush1.bf16.msra.mxu1 %v12615_v6  ;;  %v12683_v6 = vld [vmem:[#allocation12 + $0xe6c] ss:$16 sps:$4 sm:$0xff]  }
 0x62a   : > { %6348 = vmatpush1.bf16.msra.mxu0 %v12618_v13  ;;  %7044 = vmatprep.subr.bf16.mxu1 %v12623_v7  ;;  %v12686_v13 = vld [vmem:[#allocation12 + $0xa8c] ss:$16 sps:$4 sm:$0xff]   ;;  %v12681_v7 = vld [vmem:[#allocation12 + $0xe68] ss:$16 sps:$4 sm:$0xff]  }
 0x62b   : > { %6349 = vmatprep.subr.bf16.mxu0 %v12626_v19  ;;  %v12684_v19 = vld [vmem:[#allocation12 + $0xa88] ss:$16 sps:$4 sm:$0xff]  }
 0x62d   : > { %7045 = vmatpush1.bf16.msra.mxu1 %v12621_v8  ;;  %v12689_v8 = vld [vmem:[#allocation12 + $0xe8c] ss:$16 sps:$4 sm:$0xff]  }
 0x62e   : > { %6350 = vmatpush1.bf16.msra.mxu0 %v12624_v56  ;;  %7046 = vmatprep.subr.bf16.mxu1 %v12629_v9  ;;  %v12692_v56 = vld [vmem:[#allocation12 + $0xaac] ss:$16 sps:$4 sm:$0xff]   ;;  %v12687_v9 = vld [vmem:[#allocation12 + $0xe88] ss:$16 sps:$4 sm:$0xff]  }
 0x62f   : > { %6351 = vmatprep.subr.bf16.mxu0 %v12632_v1  ;;  %v12690_v1 = vld [vmem:[#allocation12 + $0xaa8] ss:$16 sps:$4 sm:$0xff]  }
 0x631   : > { %7047 = vmatpush1.bf16.msra.mxu1 %v12627_v29  ;;  %v12695_v29 = vld [vmem:[#allocation12 + $0xeac] ss:$16 sps:$4 sm:$0xff]  }
 0x632   : > { %6352 = vmatpush1.bf16.msra.mxu0 %v12630_v34  ;;  %7048 = vmatprep.subr.bf16.mxu1 %v12635_v63  ;;  %v12698_v34 = vld [vmem:[#allocation12 + $0xacc] ss:$16 sps:$4 sm:$0xff]   ;;  %v12693_v63 = vld [vmem:[#allocation12 + $0xea8] ss:$16 sps:$4 sm:$0xff]  }
 0x633   : > { %6353 = vmatprep.subr.bf16.mxu0 %v12638_v47  ;;  %v12696_v47 = vld [vmem:[#allocation12 + $0xac8] ss:$16 sps:$4 sm:$0xff]  }
 0x635   : > { %7049 = vmatpush1.bf16.msra.mxu1 %v12633_v10  ;;  %v12701_v10 = vld [vmem:[#allocation12 + $0xecc] ss:$16 sps:$4 sm:$0xff]  }
 0x636   : > { %6354 = vmatpush1.bf16.msra.mxu0 %v12636_v12  ;;  %7050 = vmatprep.subr.bf16.mxu1 %v12641_v17  ;;  %v12704_v17 = vld [vmem:[#allocation12 + $0xaec] ss:$16 sps:$4 sm:$0xff]  }
 0x637   : > { %6355 = vmatprep.subr.bf16.mxu0 %v12644_v14 }
 0x638   : > { %v4798_v26 = vpop.f32.mrb[68].mxu0 }
 0x639   : > { %v14462_v24 = vadd.f32 %v4798_v26, %v14436_v51  ;;  %v4800_v54 = vpop.f32.mrb[69].mxu0  ;;  %7051 = vmatpush1.bf16.msra.mxu1 %v12639_v57  ;;  %v12654_v51 = vld [vmem:[#allocation12 + $0x9e8] ss:$16 sps:$4 sm:$0xff]   ;;  %v12707_v26 = vld [vmem:[#allocation12 + $0xeec] ss:$16 sps:$4 sm:$0xff]  }
 0x63a   : > { %v14465_v31 = vadd.f32 %v4800_v54, %v14439_v53  ;;  %v4802_v3 = vpop.f32.mrb[70].mxu0  ;;  %6356 = vmatpush1.bf16.msra.mxu0 %v12642_v5  ;;  %7052 = vmatprep.subr.bf16.mxu1 %v12647_v18  ;;  %v12657_v53 = vld [vmem:[#allocation12 + $0xde0] ss:$16 sps:$4 sm:$0xff]   ;;  %v12699_v5 = vld [vmem:[#allocation12 + $0xec8] ss:$16 sps:$4 sm:$0xff]  }
 0x63b   : > { %v4803_v36 = vpop.f32.mrb[71].mxu0  ;;  %6357 = vmatprep.subr.bf16.mxu0 %v12650_v22  ;;  %v12702_v22 = vld [vmem:[#allocation12 + $0xae8] ss:$16 sps:$4 sm:$0xff]   ;;  %v12710_v54 = vld [vmem:[#allocation12 + $0xe04] ss:$16 sps:$4 sm:$0xff]  }
 0x63c   : > { %v12705_v3 = vld [vmem:[#allocation12 + $0xee8] ss:$16 sps:$4 sm:$0xff]  }
 0x63d   : > { %7053 = vmatpush1.bf16.msra.mxu1 %v12645_v30  ;;  %v6436_v30 = vld [vmem:[#allocation2 + $0x28] sm:$0xf] }
 0x63e   : > { %6358 = vmatpush1.bf16.msra.mxu0 %v12648_v32  ;;  %7054 = vmatprep.subr.bf16.mxu1 %v12653_v35  ;;  %v6433_v32 = vld [vmem:[#allocation2 + $0x10] sm:$0xf0] }
 0x63f   : > { %6359 = vmatprep.subr.bf16.mxu0 %v12656_v37  ;;  %v12708_v35 = vld [vmem:[#allocation12 + $0xe00] ss:$16 sps:$4 sm:$0xff]   ;;  %v6439_v36 = vpack.c.bf16 %v6436_v30, %v6433_v32  ;;  %v12713_v37 = vld [vmem:[#allocation12 + $0xe24] ss:$16 sps:$4 sm:$0xff]   ;;  %v12755_v30 = vld [vmem:[#allocation12 + $0xcec] ss:$16 sps:$4 sm:$0xff]  }
 0x640   : > { %v12753_v32 = vld [vmem:[#allocation12 + $0xce8] ss:$16 sps:$4 sm:$0xff]  }
 0x641   : > { %7055 = vmatpush1.bf16.msra.mxu1 %v12651_v38  ;;  %v6542_v38 = vrot.slane %v6439_v36, 2  ;;  %v12761_v36 = vld [vmem:[#allocation12 + $0xd2c] ss:$16 sps:$4 sm:$0xff]  }
 0x642   : > { %6360 = vmatpush1.bf16.msra.mxu0 %v12654_v51  ;;  %7056 = vmatprep.subr.bf16.mxu1 %v12659_v16  ;;  %v12711_v51 = vld [vmem:[#allocation12 + $0xe20] ss:$16 sps:$4 sm:$0xff]   ;;  %v12716_v16 = vld [vmem:[#allocation12 + $0xe44] ss:$16 sps:$4 sm:$0xff]  }
 0x643   : > { %6361 = vmatprep.subr.bf16.mxu0 %v12662_v21  ;;  %v12714_v21 = vld [vmem:[#allocation12 + $0xe40] ss:$16 sps:$4 sm:$0xff]  }
 0x645   : > { %7057 = vmatpush1.bf16.msra.mxu1 %v12657_v53  ;;  %v12717_v53 = vld [vmem:[#allocation12 + $0xe60] ss:$16 sps:$4 sm:$0xff]  }
 0x646   : > { %6362 = vmatpush1.bf16.msra.mxu0 %v12660_v42  ;;  %7149 = vmatprep.subr.bf16.mxu1 %v12665_v44  ;;  %v12725_v42 = vld [vmem:[#allocation12 + $0xea4] ss:$16 sps:$4 sm:$0xff]  }
 0x647   : > { %6363 = vmatprep.subr.bf16.mxu0 %v12668_v45  ;;  %v12728_v44 = vld [vmem:[#allocation12 + $0xec4] ss:$16 sps:$4 sm:$0xff]  }
 0x648   : > { %7059 = vmatmul.mubr.bf16.vlgmr.msra.gmra.mrb[72].mxu1 %v14467_v58 }
 0x649   : > { %7150 = vmatpush1.bf16.msra.mxu1 %v12663_v49  ;;  %7181 = vmatprep.mubr.bf16.mxu1 %v13746_v0 }
 0x64a   : > { %6364 = vmatpush1.bf16.msra.mxu0 %v12666_v50  ;;  %7151 = vmatprep.subr.bf16.mxu1 %v12671_v52 }
 0x64b   : > { %6365 = vmatprep.subr.bf16.mxu0 %v12674_v33 }
 0x64d   : > { %7152 = vmatpush1.bf16.msra.mxu1 %v12669_v55  ;;  %v12726_v55 = vld [vmem:[#allocation12 + $0xec0] ss:$16 sps:$4 sm:$0xff]  }
 0x64e   : > { %6366 = vmatpush1.bf16.msra.mxu0 %v12672_v60  ;;  %7153 = vmatprep.subr.bf16.mxu1 %v12677_v61 }
 0x64f   : > { %6367 = vmatprep.subr.bf16.mxu0 %v12680_v62 }
 0x651   : > { %7154 = vmatpush1.bf16.msra.mxu1 %v12675_v2  ;;  %v12731_v2 = vld [vmem:[#allocation12 + $0xee4] ss:$16 sps:$4 sm:$0xff]  }
 0x652   : > { %6368 = vmatpush1.bf16.msra.mxu0 %v12678_v4  ;;  %7155 = vmatprep.subr.bf16.mxu1 %v12683_v6 }
 0x653   : > { %6369 = vmatprep.subr.bf16.mxu0 %v12686_v13 }
 0x655   : > { %7156 = vmatpush1.bf16.msra.mxu1 %v12681_v7  ;;  %v12734_v7 = vld [vmem:[#allocation12 + $0xc0c] ss:$16 sps:$4 sm:$0xff]  }
 0x656   : > { %6370 = vmatpush1.bf16.msra.mxu0 %v12684_v19  ;;  %7157 = vmatprep.subr.bf16.mxu1 %v12689_v8  ;;  %v12732_v19 = vld [vmem:[#allocation12 + $0xc08] ss:$16 sps:$4 sm:$0xff]  }
 0x657   : > { %6371 = vmatprep.subr.bf16.mxu0 %v12692_v56  ;;  %v12735_v8 = vld [vmem:[#allocation12 + $0xc28] ss:$16 sps:$4 sm:$0xff]  }
 0x658   : > { %v12738_v56 = vld [vmem:[#allocation12 + $0xc48] ss:$16 sps:$4 sm:$0xff]  }
 0x659   : > { %7158 = vmatpush1.bf16.msra.mxu1 %v12687_v9  ;;  %v12743_v9 = vld [vmem:[#allocation12 + $0xc6c] ss:$16 sps:$4 sm:$0xff]  }
 0x65a   : > { %6372 = vmatpush1.bf16.msra.mxu0 %v12690_v1  ;;  %7159 = vmatprep.subr.bf16.mxu1 %v12695_v29  ;;  %v12741_v1 = vld [vmem:[#allocation12 + $0xc68] ss:$16 sps:$4 sm:$0xff]   ;;  %v12746_v29 = vld [vmem:[#allocation12 + $0xc8c] ss:$16 sps:$4 sm:$0xff]  }
 0x65b   : > { %v14471_v12 = vpop.f32.mrb[56].mxu1  ;;  %6373 = vmatprep.subr.bf16.mxu0 %v12698_v34  ;;  %v12744_v34 = vld [vmem:[#allocation12 + $0xc88] ss:$16 sps:$4 sm:$0xff]  }
 0x65c   : > { %v14473_v14 = vpop.f32.mrb[57].mxu1 }
 0x65d   : > { %v5520_v57 = vpop.f32.mrb[58].mxu1  ;;  %7160 = vmatpush1.bf16.msra.mxu1 %v12693_v63  ;;  %v12749_v63 = vld [vmem:[#allocation12 + $0xcac] ss:$16 sps:$4 sm:$0xff]  }
 0x65e   : > { %v5521_v18 = vpop.f32.mrb[59].mxu1  ;;  %6374 = vmatpush1.bf16.msra.mxu0 %v12696_v47  ;;  %7161 = vmatprep.subr.bf16.mxu1 %v12701_v10  ;;  %v12747_v47 = vld [vmem:[#allocation12 + $0xca8] ss:$16 sps:$4 sm:$0xff]   ;;  %v12752_v10 = vld [vmem:[#allocation12 + $0xccc] ss:$16 sps:$4 sm:$0xff]  }
 0x65f   : > { %6375 = vmatprep.subr.bf16.mxu0 %v12704_v17 }
 0x661   : > { %7162 = vmatpush1.bf16.msra.mxu1 %v12699_v5 }
 0x662   : > { %6376 = vmatpush1.bf16.msra.mxu0 %v12702_v22  ;;  %7163 = vmatprep.subr.bf16.mxu1 %v12707_v26  ;;  %v12750_v22 = vld [vmem:[#allocation12 + $0xcc8] ss:$16 sps:$4 sm:$0xff]  }
 0x663   : > { %7067 = vmatprep.subr.bf16.mxu0 %v12710_v54 }
 0x665   : > { %6378 = vmatmul.mubr.bf16.vlgmr.msra.gmra.mrb[88].mxu0 %v14431_v15  ;;  %7164 = vmatpush1.bf16.msra.mxu1 %v12705_v3  ;;  %v12720_v15 = vld [vmem:[#allocation12 + $0xe80] ss:$16 sps:$4 sm:$0xff]  }
 0x666   : > { %7068 = vmatpush1.bf16.msra.mxu0 %v12708_v35  ;;  %7099 = vmatprep.mubr.bf16.mxu0 %v13746_v0  ;;  %v12758_v35 = vld [vmem:[#allocation12 + $0xd0c] ss:$16 sps:$4 sm:$0xff]  }
 0x667   : > { %7069 = vmatprep.subr.bf16.mxu0 %v12713_v37  ;;  %v12764_v37 = vld [vmem:[#allocation12 + $0xd4c] ss:$16 sps:$4 sm:$0xff]  }
 0x668   : > { %7182 = vmatmul.mubr.bf16.vlgmr.msra.gmra.mrb[76].mxu1 %v6542_v38 }
 0x669   : > { %7277 = vmatprep.mubr.bf16.mxu1 %v13746_v0 }
 0x66a   : > { %7070 = vmatpush1.bf16.msra.mxu0 %v12711_v51  ;;  %v12765_v51 = vld [vmem:[#allocation12 + $0xd68] ss:$16 sps:$4 sm:$0xff]  }
 0x66b   : > { %7071 = vmatprep.subr.bf16.mxu0 %v12716_v16  ;;  %v12768_v16 = vld [vmem:[#allocation12 + $0xd88] ss:$16 sps:$4 sm:$0xff]  }
 0x66e   : > { %7072 = vmatpush1.bf16.msra.mxu0 %v12714_v21  ;;  %v12773_v21 = vld [vmem:[#allocation12 + $0xdac] ss:$16 sps:$4 sm:$0xff]  }
 0x66f   : > { %7073 = vmatprep.subr.bf16.mxu0 %v12719_v40  ;;  %v12771_v40 = vld [vmem:[#allocation12 + $0xda8] ss:$16 sps:$4 sm:$0xff]  }
 0x672   : > { %7074 = vmatpush1.bf16.msra.mxu0 %v12717_v53  ;;  %v12776_v53 = vld [vmem:[#allocation12 + $0xdcc] ss:$16 sps:$4 sm:$0xff]  }
 0x673   : > { %7075 = vmatprep.subr.bf16.mxu0 %v12722_v48  ;;  %v12774_v48 = vld [vmem:[#allocation12 + $0xdc8] ss:$16 sps:$4 sm:$0xff]  }
 0x676   : > { %7076 = vmatpush1.bf16.msra.mxu0 %v12720_v15 }
 0x677   : > { %7077 = vmatprep.subr.bf16.mxu0 %v12725_v42  ;;  %v12779_v42 = vld [vmem:[#allocation12 + $0xdec] ss:$16 sps:$4 sm:$0xff]  }
 0x678   : > { %v4839_v45 = vpop.f32.mrb[72].mxu0 }
 0x679   : > { %v4840_v49 = vadd.f32 %v4839_v45, %v14450_v39  ;;  %v4841_v50 = vpop.f32.mrb[73].mxu0 }
 0x67a   : > { %v4842_v52 = vadd.f32 %v4841_v50, %v14453_v41  ;;  %v4843_v33 = vpop.f32.mrb[74].mxu0  ;;  %7078 = vmatpush1.bf16.msra.mxu0 %v12723_v43  ;;  %v12729_v41 = vld [vmem:[#allocation12 + $0xee0] ss:$16 sps:$4 sm:$0xff]  }
 0x67b   : > { %v14481_v60 = vadd.f32 %v14455_v46, %v4840_v49  ;;  %v4844_v61 = vpop.f32.mrb[75].mxu0  ;;  %v14483_v62 = vpop.f32.mrb[60].mxu1  ;;  %7079 = vmatprep.subr.bf16.mxu0 %v12728_v44  ;;  %v12737_v46 = vld [vmem:[#allocation12 + $0xc2c] ss:$16 sps:$4 sm:$0xff]   ;;  %v12777_v49 = vld [vmem:[#allocation12 + $0xde8] ss:$16 sps:$4 sm:$0xff]  }
 0x67c   : > { %v14486_v4 = vadd.f32 %v14457_v27, %v4842_v52  ;;  %v14488_v6 = vpop.f32.mrb[61].mxu1  ;;  %v12740_v27 = vld [vmem:[#allocation12 + $0xc4c] ss:$16 sps:$4 sm:$0xff]  }
 0x67d   : > { %v5643_v39 = vpop.f32.mrb[62].mxu1 }
 0x67e   : > { %v5644_v13 = vpop.f32.mrb[63].mxu1  ;;  %7080 = vmatpush1.bf16.msra.mxu0 %v12726_v55 }
 0x67f   : > { %7081 = vmatprep.subr.bf16.mxu0 %v12731_v2 }
 0x682   : > { %7082 = vmatpush1.bf16.msra.mxu0 %v12729_v41 }
 0x683   : > { %7108 = vmatprep.subr.bf16.mxu0 %v12734_v7 }
 0x685   : > { %7100 = vmatmul.mubr.bf16.vlgmr.msra.gmra.mrb[92].mxu0 %v6542_v38  ;;  %v12767_v38 = vld [vmem:[#allocation12 + $0xd6c] ss:$16 sps:$4 sm:$0xff]  }
 0x686   : > { %7109 = vmatpush1.bf16.msra.mxu0 %v12732_v19  ;;  %7140 = vmatprep.mubr.bf16.mxu0 %v14444_v59 }
 0x687   : > { %7110 = vmatprep.subr.bf16.mxu0 %v12737_v46 }
 0x68a   : > { %7111 = vmatpush1.bf16.msra.mxu0 %v12735_v8 }
 0x68b   : > { %7112 = vmatprep.subr.bf16.mxu0 %v12740_v27 }
 0x68e   : > { %7113 = vmatpush1.bf16.msra.mxu0 %v12738_v56 }
 0x68f   : > { %7114 = vmatprep.subr.bf16.mxu0 %v12743_v9 }
 0x692   : > { %7115 = vmatpush1.bf16.msra.mxu0 %v12741_v1 }
 0x693   : > { %7116 = vmatprep.subr.bf16.mxu0 %v12746_v29 }
 0x696   : > { %7117 = vmatpush1.bf16.msra.mxu0 %v12744_v34 }
 0x697   : > { %7118 = vmatprep.subr.bf16.mxu0 %v12749_v63  ;;  %v12780_v63 = vld [vmem:[#allocation16] ss:$8 sps:$4 sm:$0xff]  }
 0x698   : > { %v5557_v59 = vpop.f32.mrb[76].mxu0 }
 0x699   : > { %v5558_v17 = vadd.f32 %v5557_v59, %v14471_v12  ;;  %v5559_v57 = vpop.f32.mrb[77].mxu0  ;;  %v12756_v12 = vld [vmem:[#allocation12 + $0xd08] ss:$16 sps:$4 sm:$0xff]  }
 0x69a   : > { %v5560_v5 = vadd.f32 %v5559_v57, %v14473_v14  ;;  %v5561_v18 = vpop.f32.mrb[78].mxu0  ;;  %7119 = vmatpush1.bf16.msra.mxu0 %v12747_v47  ;;  %v12759_v14 = vld [vmem:[#allocation12 + $0xd28] ss:$16 sps:$4 sm:$0xff]  }
 0x69b   : > { %v14494_v26 = vadd.f32 %v5558_v17, %v14462_v24  ;;  %v5562_v54 = vpop.f32.mrb[79].mxu0  ;;  %7120 = vmatprep.subr.bf16.mxu0 %v12752_v10  ;;  %v12762_v24 = vld [vmem:[#allocation12 + $0xd48] ss:$16 sps:$4 sm:$0xff]  }
 0x69c   : > { %v5647_v3 = vadd.f32 %v5560_v5, %v14465_v31  ;;  %v12770_v31 = vld [vmem:[#allocation12 + $0xd8c] ss:$16 sps:$4 sm:$0xff]  }
 0x69d   : > { %v12782_v47 = vld [vmem:[#allocation16 + $0x4] ss:$8 sps:$4 sm:$0xff]   ;;  %v12785_v10 = vld [vmem:[#allocation16 + $0x14] ss:$8 sps:$4 sm:$0xff]   ;;  %v12783_v59 = vld [vmem:[#allocation16 + $0x10] ss:$8 sps:$4 sm:$0xff]  }
 0x69e   : > { %7121 = vmatpush1.bf16.msra.mxu0 %v12750_v22  ;;  %v12788_v17 = vld [vmem:[#allocation16 + $0x24] ss:$8 sps:$4 sm:$0xff]   ;;  %v12786_v57 = vld [vmem:[#allocation16 + $0x20] ss:$8 sps:$4 sm:$0xff]   ;;  %v12791_v5 = vld [vmem:[#allocation16 + $0x34] ss:$8 sps:$4 sm:$0xff]  }
 0x69f   : > { %7122 = vmatprep.subr.bf16.mxu0 %v12755_v30  ;;  %v12789_v18 = vld [vmem:[#allocation16 + $0x30] ss:$8 sps:$4 sm:$0xff]   ;;  %v12794_v22 = vld [vmem:[#allocation16 + $0x44] ss:$8 sps:$4 sm:$0xff]   ;;  %v12797_v30 = vld [vmem:[#allocation16 + $0x54] ss:$8 sps:$4 sm:$0xff]  }
 0x6a2   : > { %7123 = vmatpush1.bf16.msra.mxu0 %v12753_v32 }
 0x6a3   : > { %7124 = vmatprep.subr.bf16.mxu0 %v12758_v35 }
 0x6a6   : > { %7125 = vmatpush1.bf16.msra.mxu0 %v12756_v12 }
 0x6a7   : > { %7126 = vmatprep.subr.bf16.mxu0 %v12761_v36 }
 0x6aa   : > { %7127 = vmatpush1.bf16.msra.mxu0 %v12759_v14 }
 0x6ab   : > { %7128 = vmatprep.subr.bf16.mxu0 %v12764_v37 }
 0x6ae   : > { %7129 = vmatpush1.bf16.msra.mxu0 %v12762_v24  ;;  %v12795_v24 = vld [vmem:[#allocation16 + $0x50] ss:$8 sps:$4 sm:$0xff]  }
 0x6af   : > { %7130 = vmatprep.subr.bf16.mxu0 %v12767_v38 }
 0x6b2   : > { %7131 = vmatpush1.bf16.msra.mxu0 %v12765_v51 }
 0x6b3   : > { %7132 = vmatprep.subr.bf16.mxu0 %v12770_v31  ;;  %v12800_v31 = vld [vmem:[#allocation16 + $0x64] ss:$8 sps:$4 sm:$0xff]  }
 0x6b6   : > { %7133 = vmatpush1.bf16.msra.mxu0 %v12768_v16 }
 0x6b7   : > { %7134 = vmatprep.subr.bf16.mxu0 %v12773_v21 }
 0x6ba   : > { %7135 = vmatpush1.bf16.msra.mxu0 %v12771_v40  ;;  %v12798_v40 = vld [vmem:[#allocation16 + $0x60] ss:$8 sps:$4 sm:$0xff]  }
 0x6bb   : > { %v6297_v15 = vpop.f32.mrb[64].mxu1  ;;  %7136 = vmatprep.subr.bf16.mxu0 %v12776_v53  ;;  %v12803_v53 = vld [vmem:[#allocation16 + $0x74] ss:$8 sps:$4 sm:$0xff]  }
 0x6bc   : > { %v6299_v43 = vpop.f32.mrb[65].mxu1 }
 0x6bd   : > { %v6301_v44 = vpop.f32.mrb[66].mxu1 }
 0x6be   : > { %v6302_v45 = vpop.f32.mrb[67].mxu1  ;;  %7137 = vmatpush1.bf16.msra.mxu0 %v12774_v48  ;;  %v12801_v48 = vld [vmem:[#allocation16 + $0x70] ss:$8 sps:$4 sm:$0xff]  }
 0x6bf   : > { %7138 = vmatprep.subr.bf16.mxu0 %v12779_v42  ;;  %v12804_v42 = vld [vmem:[#allocation16 + $0x80] ss:$8 sps:$4 sm:$0xff]   ;;  %v12807_v44 = vld [vmem:[#allocation16 + $0x90] ss:$8 sps:$4 sm:$0xff]   ;;  %v12812_v45 = vld [vmem:[#allocation16 + $0xa4] ss:$8 sps:$4 sm:$0xff]  }
 0x6c2   : > { %7139 = vmatpush1.bf16.msra.mxu0 %v12777_v49  ;;  %v12810_v49 = vld [vmem:[#allocation16 + $0xa0] ss:$8 sps:$4 sm:$0xff]  }
 0x6c3   : > { %7715 = vmatprep.subr.bf16.mxu0 %v12782_v47 }
 0x6c5   : > { %7141 = vmatmul.mubr.bf16.vlgmr.msra.gmra.mrb[96].mxu0 %v14467_v58 }
 0x6c6   : > { %7716 = vmatpush1.bf16.msra.mxu0 %v12780_v63  ;;  %v12822_v63 = vld [vmem:[#allocation16 + $0xe0] ss:$8 sps:$4 sm:$0xff]  }
 0x6c7   : > { %7717 = vmatprep.subr.bf16.mxu0 %v12785_v10 }
 0x6ca   : > { %7718 = vmatpush1.bf16.msra.mxu0 %v12783_v59 }
 0x6cb   : > { %7719 = vmatprep.subr.bf16.mxu0 %v12788_v17 }
 0x6ce   : > { %7720 = vmatpush1.bf16.msra.mxu0 %v12786_v57 }
 0x6cf   : > { %7721 = vmatprep.subr.bf16.mxu0 %v12791_v5 }
 0x6d2   : > { %7722 = vmatpush1.bf16.msra.mxu0 %v12789_v18 }
 0x6d3   : > { %7723 = vmatprep.subr.bf16.mxu0 %v12794_v22 }
 0x6d8   : > { %v5598_v50 = vpop.f32.mrb[80].mxu0 }
 0x6d9   : > { %v5640_v52 = vadd.f32 %v14483_v62, %v5598_v50  ;;  %v5600_v33 = vpop.f32.mrb[81].mxu0  ;;  %v12815_v50 = vld [vmem:[#allocation16 + $0xb4] ss:$8 sps:$4 sm:$0xff]  }
 0x6da   : > { %v5642_v55 = vadd.f32 %v14488_v6, %v5600_v33  ;;  %v5602_v61 = vpop.f32.mrb[82].mxu0  ;;  %v12818_v33 = vld [vmem:[#allocation16 + $0xc4] ss:$8 sps:$4 sm:$0xff]  }
 0x6db   : > { %v5648_v2 = vadd.f32 %v5640_v52, %v14481_v60  ;;  %v5603_v39 = vpop.f32.mrb[83].mxu0  ;;  %v6420_v13 = vpop.f32.mrb[68].mxu1  ;;  %v12813_v52 = vld [vmem:[#allocation16 + $0xb0] ss:$8 sps:$4 sm:$0xff]   ;;  %v12816_v61 = vld [vmem:[#allocation16 + $0xc0] ss:$8 sps:$4 sm:$0xff]  }
 0x6dc   : > { %v5649_v41 = vadd.f32 %v5642_v55, %v14486_v4  ;;  %v6422_v7 = vpop.f32.mrb[69].mxu1  ;;  %v7194_v55 = vld [vmem:[#allocation13] sm:$0xf] }
 0x6dd   : > { %v6424_v19 = vpop.f32.mrb[70].mxu1  ;;  %v12821_v39 = vld [vmem:[#allocation16 + $0xd4] ss:$8 sps:$4 sm:$0xff]   ;;  %v7207_v57 = vrot.slane %v7194_v55, %v14300_v23  ;;  %v7211_v22 = vrot.slane %v7194_v55, %v14303_v28 }
 0x6de   : > { %v6425_v46 = vpop.f32.mrb[71].mxu1 }
 0x6df   : > { %v7203_v46 = vrot.slane %v7194_v55, %v14332_v25 }
 0x6f8   : > { %v6338_v8 = vpop.f32.mrb[84].mxu0 }
 0x6f9   : > { %v6339_v27 = vadd.f32 %v6338_v8, %v6297_v15  ;;  %v6340_v56 = vpop.f32.mrb[85].mxu0  ;;  %v12806_v15 = vld [vmem:[#allocation16 + $0x84] ss:$8 sps:$4 sm:$0xff]  }
 0x6fa   : > { %v6341_v58 = vadd.f32 %v6340_v56, %v6299_v43  ;;  %v6342_v9 = vpop.f32.mrb[86].mxu0  ;;  %v12809_v43 = vld [vmem:[#allocation16 + $0x94] ss:$8 sps:$4 sm:$0xff]  }
 0x6fb   : > { %v14503_v62 = vadd.f32 %v6339_v27, %v14494_v26  ;;  %v6343_v1 = vpop.f32.mrb[87].mxu0  ;;  %v12792_v26 = vld [vmem:[#allocation16 + $0x40] ss:$8 sps:$4 sm:$0xff]  }
 0x6fc   : > { %v14505_v6 = vadd.f32 %v6341_v58, %v5647_v3  ;;  %7724 = vmatpush1.bf16.msra.mxu0 %v12792_v26  ;;  %v12819_v58 = vld [vmem:[#allocation16 + $0xd0] ss:$8 sps:$4 sm:$0xff]   ;;  %v12824_v1 = vld [vmem:[#allocation16 + $0xe4] ss:$8 sps:$4 sm:$0xff]  }
 0x6fd   : > { %7725 = vmatprep.subr.bf16.mxu0 %v12797_v30 }
 0x700   : > { %7726 = vmatpush1.bf16.msra.mxu0 %v12795_v24 }
 0x701   : > { %7727 = vmatprep.subr.bf16.mxu0 %v12800_v31  ;;  %v12827_v31 = vld [vmem:[#allocation16 + $0xf4] ss:$8 sps:$4 sm:$0xff]  }
 0x704   : > { %7728 = vmatpush1.bf16.msra.mxu0 %v12798_v40  ;;  %v12882_v40 = vld [vmem:[#allocation18 + $0x220] ss:$16 sps:$4 sm:$0xff]  }
 0x705   : > { %7729 = vmatprep.subr.bf16.mxu0 %v12803_v53  ;;  %v12890_v53 = vld [vmem:[#allocation18 + $0x244] ss:$16 sps:$4 sm:$0xff]  }
 0x708   : > { %7730 = vmatpush1.bf16.msra.mxu0 %v12801_v48  ;;  %v12888_v48 = vld [vmem:[#allocation18 + $0x240] ss:$16 sps:$4 sm:$0xff]  }
 0x709   : > { %7731 = vmatprep.subr.bf16.mxu0 %v12806_v15  ;;  %v12896_v15 = vld [vmem:[#allocation18 + $0x264] ss:$16 sps:$4 sm:$0xff]  }
 0x70c   : > { %7732 = vmatpush1.bf16.msra.mxu0 %v12804_v42  ;;  %v12894_v42 = vld [vmem:[#allocation18 + $0x260] ss:$16 sps:$4 sm:$0xff]  }
 0x70d   : > { %7733 = vmatprep.subr.bf16.mxu0 %v12809_v43  ;;  %v12902_v43 = vld [vmem:[#allocation18 + $0x284] ss:$16 sps:$4 sm:$0xff]  }
 0x710   : > { %7734 = vmatpush1.bf16.msra.mxu0 %v12807_v44  ;;  %v12900_v44 = vld [vmem:[#allocation18 + $0x280] ss:$16 sps:$4 sm:$0xff]  }
 0x711   : > { %7735 = vmatprep.subr.bf16.mxu0 %v12812_v45  ;;  %v12908_v45 = vld [vmem:[#allocation18 + $0x2a4] ss:$16 sps:$4 sm:$0xff]  }
 0x714   : > { %7736 = vmatpush1.bf16.msra.mxu0 %v12810_v49  ;;  %v12906_v49 = vld [vmem:[#allocation18 + $0x2a0] ss:$16 sps:$4 sm:$0xff]  }
 0x715   : > { %7737 = vmatprep.subr.bf16.mxu0 %v12815_v50  ;;  %v12914_v50 = vld [vmem:[#allocation18 + $0x2c4] ss:$16 sps:$4 sm:$0xff]  }
 0x718   : > { %7738 = vmatpush1.bf16.msra.mxu0 %v12813_v52  ;;  %v12912_v52 = vld [vmem:[#allocation18 + $0x2c0] ss:$16 sps:$4 sm:$0xff]  }
 0x719   : > { %7739 = vmatprep.subr.bf16.mxu0 %v12818_v33  ;;  %v12920_v33 = vld [vmem:[#allocation18 + $0x2e4] ss:$16 sps:$4 sm:$0xff]  }
 0x71b   : > { %v14507_v29 = vpop.f32.mrb[72].mxu1 }
 0x71c   : > { %v14509_v60 = vpop.f32.mrb[73].mxu1  ;;  %7740 = vmatpush1.bf16.msra.mxu0 %v12816_v61  ;;  %v12926_v61 = vld [vmem:[#allocation18 + $0x304] ss:$16 sps:$4 sm:$0xff]  }
 0x71d   : > { %v7064_v34 = vpop.f32.mrb[74].mxu1  ;;  %7741 = vmatprep.subr.bf16.mxu0 %v12821_v39  ;;  %v12932_v39 = vld [vmem:[#allocation18 + $0x324] ss:$16 sps:$4 sm:$0xff]  }
 0x71e   : > { %v7065_v4 = vpop.f32.mrb[75].mxu1 }
 0x720   : > { %7742 = vmatpush1.bf16.msra.mxu0 %v12819_v58 }
 0x721   : > { %7743 = vmatprep.subr.bf16.mxu0 %v12824_v1  ;;  %v12828_v1 = vld [vmem:[#allocation16 + $0x100] ss:$8 sps:$4 sm:$0xff]  }
 0x724   : > { %7744 = vmatpush1.bf16.msra.mxu0 %v12822_v63  ;;  %v12836_v63 = vld [vmem:[#allocation16 + $0x124] ss:$8 sps:$4 sm:$0xff]  }
 0x725   : > { %7745 = vmatprep.subr.bf16.mxu0 %v12827_v31  ;;  %v12872_v31 = vld [vmem:[#allocation16 + $0x1e4] ss:$8 sps:$4 sm:$0xff]  }
 0x738   : > { %v6379_v54 = vpop.f32.mrb[88].mxu0 }
 0x739   : > { %v6421_v3 = vadd.f32 %v6420_v13, %v6379_v54  ;;  %v6381_v32 = vpop.f32.mrb[89].mxu0 }
 0x73a   : > { %v6423_v35 = vadd.f32 %v6422_v7, %v6381_v32  ;;  %v6383_v12 = vpop.f32.mrb[90].mxu0 }
 0x73b   : > { %v14511_v36 = vadd.f32 %v6421_v3, %v5648_v2  ;;  %v6384_v14 = vpop.f32.mrb[91].mxu0  ;;  %v14513_v37 = vpop.f32.mrb[76].mxu1 }
 0x73c   : > { %v14515_v38 = vadd.f32 %v6423_v35, %v5649_v41  ;;  %v14517_v51 = vpop.f32.mrb[77].mxu1  ;;  %v7199_v41 = vrot.slane %v7194_v55, %v14327_v20  ;;  %v12918_v55 = vld [vmem:[#allocation18 + $0x2e0] ss:$16 sps:$4 sm:$0xff]  }
 0x73d   : > { %v7187_v16 = vpop.f32.mrb[78].mxu1 }
 0x73e   : > { %v7188_v21 = vpop.f32.mrb[79].mxu1  ;;  %v12878_v16 = vld [vmem:[#allocation18 + $0x204] ss:$16 sps:$4 sm:$0xff]  }
 0x73f   : > { %v12884_v21 = vld [vmem:[#allocation18 + $0x224] ss:$16 sps:$4 sm:$0xff]  }
 0x758   : > { %v7101_v2 = vpop.f32.mrb[92].mxu0 }
 0x759   : > { %v7102_v13 = vadd.f32 %v7101_v2, %v14507_v29  ;;  %v7103_v7 = vpop.f32.mrb[93].mxu0  ;;  %v12924_v2 = vld [vmem:[#allocation18 + $0x300] ss:$16 sps:$4 sm:$0xff]  }
 0x75a   : > { %v7104_v19 = vadd.f32 %v7103_v7, %v14509_v60  ;;  %v7105_v8 = vpop.f32.mrb[94].mxu0  ;;  %v12936_v7 = vld [vmem:[#allocation18 + $0x340] ss:$16 sps:$4 sm:$0xff]  }
 0x75b   : > { %v7190_v27 = vadd.f32 %v7102_v13, %v14503_v62  ;;  %v7106_v56 = vpop.f32.mrb[95].mxu0  ;;  %v7224_v62 = vld [vmem:[#allocation15] sm:$0x3]  ;;  %v12930_v13 = vld [vmem:[#allocation18 + $0x320] ss:$16 sps:$4 sm:$0xff]  }
 0x75c   : > { %v7191_v9 = vadd.f32 %v7104_v19, %v14505_v6  ;;  %v12944_v19 = vld [vmem:[#allocation18 + $0x364] ss:$16 sps:$4 sm:$0xff]  }
 0x75d   : > { %v7216_v34 = vadd.f32 %v7199_v41, %v7190_v27  ;;  %v12938_v41 = vld [vmem:[#allocation18 + $0x344] ss:$16 sps:$4 sm:$0xff]  }
 0x75e   : > { %v7217_v4 = vadd.f32 %v7203_v46, %v7191_v9  ;;  %v12942_v46 = vld [vmem:[#allocation18 + $0x360] ss:$16 sps:$4 sm:$0xff]  }
 0x75f   : > { %v7220_v29 = vmax.f32 %v7216_v34, 0.0 }
 0x760   : > { %v7221_v47 = vmax.f32 %v7217_v4, 0.0  ;;  %v12833_v4 = vld [vmem:[#allocation16 + $0x114] ss:$8 sps:$4 sm:$0xff]  }
 0x761   : > { %v7225_v60 = vpack.c.bf16 %v7220_v29, %v7220_v29  ;;  %v12831_v29 = vld [vmem:[#allocation16 + $0x110] ss:$8 sps:$4 sm:$0xff]  }
 0x762   : > { %v7226_v10 = vpack.c.bf16 %v7221_v47, %v7221_v47  ;;  %v12834_v47 = vld [vmem:[#allocation16 + $0x120] ss:$8 sps:$4 sm:$0xff]  }
 0x763   : > { %v7234_v59 = vsel %vm1995_vm2, %v7225_v60, 0  ;;  %v12839_v60 = vld [vmem:[#allocation16 + $0x134] ss:$8 sps:$4 sm:$0xff]  }
 0x764   : > { %11076 = vmatprep.subr.msk.bf16.mxu1 %vm1995_vm2, %v7226_v10  ;;  %v12837_v10 = vld [vmem:[#allocation16 + $0x130] ss:$8 sps:$4 sm:$0xff]  }
 0x765   : > { %7246 = vmatpush1.bf16.msra.mxu1 %v7234_v59  ;;  %v12842_v59 = vld [vmem:[#allocation16 + $0x144] ss:$8 sps:$4 sm:$0xff]  }
 0x768   : > { %11077 = vmatmul.mubr.msk.bf16.vlgmr.msra.gmra.mrb[80].mxu1 %vm7229_vm4, %v7224_v62 }
 0x769   : > { %7318 = vmatprep.mubr.bf16.mxu1 %v13746_v0 }
 0x798   : > { %v7142_v6 = vpop.f32.mrb[96].mxu0 }
 0x799   : > { %v7184_v17 = vadd.f32 %v14513_v37, %v7142_v6  ;;  %v7144_v5 = vpop.f32.mrb[97].mxu0  ;;  %v12845_v6 = vld [vmem:[#allocation16 + $0x154] ss:$8 sps:$4 sm:$0xff]  }
 0x79a   : > { %v7186_v18 = vadd.f32 %v14517_v51, %v7144_v5  ;;  %v7146_v26 = vpop.f32.mrb[98].mxu0  ;;  %v12825_v51 = vld [vmem:[#allocation16 + $0xf0] ss:$8 sps:$4 sm:$0xff]   ;;  %v12846_v5 = vld [vmem:[#allocation16 + $0x160] ss:$8 sps:$4 sm:$0xff]  }
 0x79b   : > { %v7192_v54 = vadd.f32 %v7184_v17, %v14511_v36  ;;  %v7147_v30 = vpop.f32.mrb[99].mxu0  ;;  %7746 = vmatpush1.bf16.msra.mxu0 %v12825_v51  ;;  %v12830_v36 = vld [vmem:[#allocation16 + $0x104] ss:$8 sps:$4 sm:$0xff]   ;;  %v12843_v17 = vld [vmem:[#allocation16 + $0x150] ss:$8 sps:$4 sm:$0xff]  }
 0x79c   : > { %v7193_v3 = vadd.f32 %v7186_v18, %v14515_v38  ;;  %7756 = vmatprep.subr.bf16.mxu0 %v12830_v36  ;;  %v12876_v38 = vld [vmem:[#allocation18 + $0x200] ss:$16 sps:$4 sm:$0xff]   ;;  %v12851_v18 = vld [vmem:[#allocation16 + $0x174] ss:$8 sps:$4 sm:$0xff]   ;;  %v12854_v26 = vld [vmem:[#allocation16 + $0x184] ss:$8 sps:$4 sm:$0xff]  }
 0x79d   : > { %v7218_v32 = vadd.f32 %v7207_v57, %v7192_v54  ;;  %v12848_v57 = vld [vmem:[#allocation16 + $0x164] ss:$8 sps:$4 sm:$0xff]   ;;  %v12852_v54 = vld [vmem:[#allocation16 + $0x180] ss:$8 sps:$4 sm:$0xff]   ;;  %v12857_v30 = vld [vmem:[#allocation16 + $0x194] ss:$8 sps:$4 sm:$0xff]  }
 0x79e   : > { %v7219_v35 = vadd.f32 %v7211_v22, %v7193_v3  ;;  %v12849_v22 = vld [vmem:[#allocation16 + $0x170] ss:$8 sps:$4 sm:$0xff]   ;;  %v12870_v36 = vld [vmem:[#allocation16 + $0x1e0] ss:$8 sps:$4 sm:$0xff]  }
 0x79f   : > { %v7222_v12 = vmax.f32 %v7218_v32, 0.0  ;;  %v12855_v3 = vld [vmem:[#allocation16 + $0x190] ss:$8 sps:$4 sm:$0xff]   ;;  %v12860_v32 = vld [vmem:[#allocation16 + $0x1a4] ss:$8 sps:$4 sm:$0xff]  }
 0x7a0   : > { %v7223_v0 = vmax.f32 %v7219_v35, 0.0  ;;  %v12858_v35 = vld [vmem:[#allocation16 + $0x1a0] ss:$8 sps:$4 sm:$0xff]   ;;  %v12867_v51 = vld [vmem:[#allocation16 + $0x1d0] ss:$8 sps:$4 sm:$0xff]  }
 0x7a1   : > { %v7227_v14 = vpack.c.bf16 %v7222_v12, %v7222_v12  ;;  %v12863_v12 = vld [vmem:[#allocation16 + $0x1b4] ss:$8 sps:$4 sm:$0xff]  }
 0x7a2   : > { %v7228_v24 = vpack.c.bf16 %v7223_v0, %v7223_v0  ;;  %v12861_v0 = vld [vmem:[#allocation16 + $0x1b0] ss:$8 sps:$4 sm:$0xff]  }
 0x7a3   : > { %v7240_v37 = vsel %vm1995_vm2, %v7227_v14, 0  ;;  %v12866_v14 = vld [vmem:[#allocation16 + $0x1c4] ss:$8 sps:$4 sm:$0xff]  }
 0x7a4   : > { %11078 = vmatprep.subr.msk.bf16.mxu1 %vm1995_vm2, %v7228_v24  ;;  %v12864_v24 = vld [vmem:[#allocation16 + $0x1c0] ss:$8 sps:$4 sm:$0xff]  }
 0x7a5   : > { %7287 = vmatpush1.bf16.msra.mxu1 %v7240_v37  ;;  %v12869_v37 = vld [vmem:[#allocation16 + $0x1d4] ss:$8 sps:$4 sm:$0xff]  }
 0x7a6   : > { %8280 = vmatprep.subr.bf16.mxu1 %v12878_v16  ;;  %v12873_v16 = vld [vmem:[#allocation16 + $0x1f0] ss:$8 sps:$4 sm:$0xff]  }
 0x7a8   : > { %11079 = vmatmul.mubr.msk.bf16.vlgmr.msra.gmra.mrb[84].mxu1 %vm7229_vm4, %v7224_v62  ;;  %v12840_v62 = vld [vmem:[#allocation16 + $0x140] ss:$8 sps:$4 sm:$0xff]  }
 0x7a9   : > { %8281 = vmatpush1.bf16.msra.mxu1 %v12876_v38  ;;  %v12875_v38 = vld [vmem:[#allocation16 + $0x1f4] ss:$8 sps:$4 sm:$0xff]  }
 0x7aa   : > { %8282 = vmatprep.subr.bf16.mxu1 %v12884_v21  ;;  %v12881_v21 = vld [vmem:[#allocation18 + $0x4] ss:$16 sps:$4 sm:$0xff]  }
 0x7ad   : > { %8283 = vmatpush1.bf16.msra.mxu1 %v12882_v40 }
 0x7ae   : > { %8284 = vmatprep.subr.bf16.mxu1 %v12890_v53 }
 0x7b1   : > { %8285 = vmatpush1.bf16.msra.mxu1 %v12888_v48 }
 0x7b2   : > { %8286 = vmatprep.subr.bf16.mxu1 %v12896_v15 }
 0x7b5   : > { %8287 = vmatpush1.bf16.msra.mxu1 %v12894_v42  ;;  %v12879_v42 = vld [vmem:[#allocation18] ss:$16 sps:$4 sm:$0xff]  }
 0x7b6   : > { %8288 = vmatprep.subr.bf16.mxu1 %v12902_v43 }
 0x7b9   : > { %8289 = vmatpush1.bf16.msra.mxu1 %v12900_v44 }
 0x7ba   : > { %8290 = vmatprep.subr.bf16.mxu1 %v12908_v45  ;;  %v12887_v45 = vld [vmem:[#allocation18 + $0x24] ss:$16 sps:$4 sm:$0xff]  }
 0x7bd   : > { %8291 = vmatpush1.bf16.msra.mxu1 %v12906_v49  ;;  %v12885_v49 = vld [vmem:[#allocation18 + $0x20] ss:$16 sps:$4 sm:$0xff]  }
 0x7be   : > { %8292 = vmatprep.subr.bf16.mxu1 %v12914_v50  ;;  %v12893_v50 = vld [vmem:[#allocation18 + $0x44] ss:$16 sps:$4 sm:$0xff]  }
 0x7c1   : > { %8293 = vmatpush1.bf16.msra.mxu1 %v12912_v52  ;;  %v12891_v52 = vld [vmem:[#allocation18 + $0x40] ss:$16 sps:$4 sm:$0xff]  }
 0x7c2   : > { %8294 = vmatprep.subr.bf16.mxu1 %v12920_v33  ;;  %v12899_v33 = vld [vmem:[#allocation18 + $0x64] ss:$16 sps:$4 sm:$0xff]  }
 0x7c5   : > { %8295 = vmatpush1.bf16.msra.mxu1 %v12918_v55  ;;  %v12897_v55 = vld [vmem:[#allocation18 + $0x60] ss:$16 sps:$4 sm:$0xff]  }
 0x7c6   : > { %8296 = vmatprep.subr.bf16.mxu1 %v12926_v61  ;;  %v12905_v61 = vld [vmem:[#allocation18 + $0x84] ss:$16 sps:$4 sm:$0xff]  }
 0x7c9   : > { %8297 = vmatpush1.bf16.msra.mxu1 %v12924_v2  ;;  %v12903_v2 = vld [vmem:[#allocation18 + $0x80] ss:$16 sps:$4 sm:$0xff]  }
 0x7ca   : > { %8298 = vmatprep.subr.bf16.mxu1 %v12932_v39  ;;  %v12911_v39 = vld [vmem:[#allocation18 + $0xa4] ss:$16 sps:$4 sm:$0xff]  }
 0x7cd   : > { %8299 = vmatpush1.bf16.msra.mxu1 %v12930_v13  ;;  %v12909_v13 = vld [vmem:[#allocation18 + $0xa0] ss:$16 sps:$4 sm:$0xff]  }
 0x7ce   : > { %8300 = vmatprep.subr.bf16.mxu1 %v12938_v41  ;;  %v12917_v41 = vld [vmem:[#allocation18 + $0xc4] ss:$16 sps:$4 sm:$0xff]  }
 0x7d1   : > { %8301 = vmatpush1.bf16.msra.mxu1 %v12936_v7  ;;  %v12915_v7 = vld [vmem:[#allocation18 + $0xc0] ss:$16 sps:$4 sm:$0xff]  }
 0x7d2   : > { %8302 = vmatprep.subr.bf16.mxu1 %v12944_v19  ;;  %v12923_v19 = vld [vmem:[#allocation18 + $0xe4] ss:$16 sps:$4 sm:$0xff]  }
 0x7d5   : > { %8303 = vmatpush1.bf16.msra.mxu1 %v12942_v46  ;;  %v12921_v46 = vld [vmem:[#allocation18 + $0xe0] ss:$16 sps:$4 sm:$0xff]  }
 0x83b   : > { %v7279_v8 = vpop.f32.mrb[80].mxu1 }
 0x83c   : > { %v7327_v27 = vpack.c.bf16 %v7279_v8, %v7279_v8  ;;  %v7281_v56 = vpop.f32.mrb[81].mxu1  ;;  %v12929_v8 = vld [vmem:[#allocation18 + $0x104] ss:$16 sps:$4 sm:$0xff]  }
 0x83d   : > { %v7328_v58 = vpack.c.bf16 %v7281_v56, %v7281_v56  ;;  %v7283_v9 = vpop.f32.mrb[82].mxu1  ;;  %v12935_v56 = vld [vmem:[#allocation18 + $0x124] ss:$16 sps:$4 sm:$0xff]  }
 0x83e   : > { %v7284_v34 = vpop.f32.mrb[83].mxu1  ;;  %v12941_v9 = vld [vmem:[#allocation18 + $0x144] ss:$16 sps:$4 sm:$0xff]  }
 0x83f   : > { %7747 = vmatprep.mubr.bf16.mxu0 %v7328_v58  ;;  %v12933_v58 = vld [vmem:[#allocation18 + $0x120] ss:$16 sps:$4 sm:$0xff]   ;;  %v12947_v34 = vld [vmem:[#allocation18 + $0x164] ss:$16 sps:$4 sm:$0xff]  }
 0x840   : > { %7748 = vmatmul.mubr.bf16.vlgmr.msra.gmra.mrb[100].mxu0 %v7327_v27  ;;  %v12927_v27 = vld [vmem:[#allocation18 + $0x100] ss:$16 sps:$4 sm:$0xff]  }
 0x841   : > { %7757 = vmatpush1.bf16.msra.mxu0 %v12828_v1  ;;  %v12939_v1 = vld [vmem:[#allocation18 + $0x140] ss:$16 sps:$4 sm:$0xff]  }
 0x842   : > { %7758 = vmatprep.subr.bf16.mxu0 %v12833_v4  ;;  %v12945_v4 = vld [vmem:[#allocation18 + $0x160] ss:$16 sps:$4 sm:$0xff]  }
 0x845   : > { %7759 = vmatpush1.bf16.msra.mxu0 %v12831_v29  ;;  %v12948_v29 = vld [vmem:[#allocation18 + $0x380] ss:$16 sps:$4 sm:$0xff]  }
 0x846   : > { %7760 = vmatprep.subr.bf16.mxu0 %v12836_v63  ;;  %v12950_v63 = vld [vmem:[#allocation18 + $0x384] ss:$16 sps:$4 sm:$0xff]  }
 0x847   : > { %8304 = vmatprep.subr.bf16.mxu1 %v12950_v63  ;;  %v13008_v63 = vld [vmem:[#allocation18 + $0x2c8] ss:$16 sps:$4 sm:$0xff]  }
 0x848   : > { %8305 = vmatpush1.bf16.msra.mxu1 %v12948_v29  ;;  %v13013_v29 = vld [vmem:[#allocation18 + $0x4c4] ss:$16 sps:$4 sm:$0xff]  }
 0x849   : > { %7761 = vmatpush1.bf16.msra.mxu0 %v12834_v47  ;;  %v12951_v47 = vld [vmem:[#allocation18 + $0x180] ss:$16 sps:$4 sm:$0xff]  }
 0x84a   : > { %7762 = vmatprep.subr.bf16.mxu0 %v12839_v60  ;;  %v12953_v60 = vld [vmem:[#allocation18 + $0x184] ss:$16 sps:$4 sm:$0xff]  }
 0x84d   : > { %7763 = vmatpush1.bf16.msra.mxu0 %v12837_v10  ;;  %v12954_v10 = vld [vmem:[#allocation18 + $0x3a0] ss:$16 sps:$4 sm:$0xff]  }
 0x84e   : > { %7764 = vmatprep.subr.bf16.mxu0 %v12842_v59  ;;  %v12956_v59 = vld [vmem:[#allocation18 + $0x3a4] ss:$16 sps:$4 sm:$0xff]  }
 0x84f   : > { %8306 = vmatprep.subr.bf16.mxu1 %v12956_v59  ;;  %v13014_v59 = vld [vmem:[#allocation18 + $0x2e8] ss:$16 sps:$4 sm:$0xff]  }
 0x850   : > { %8307 = vmatpush1.bf16.msra.mxu1 %v12954_v10  ;;  %v13019_v10 = vld [vmem:[#allocation18 + $0x4e4] ss:$16 sps:$4 sm:$0xff]  }
 0x851   : > { %7765 = vmatpush1.bf16.msra.mxu0 %v12840_v62  ;;  %v12957_v62 = vld [vmem:[#allocation18 + $0x1a0] ss:$16 sps:$4 sm:$0xff]  }
 0x852   : > { %7766 = vmatprep.subr.bf16.mxu0 %v12845_v6  ;;  %v12959_v6 = vld [vmem:[#allocation18 + $0x1a4] ss:$16 sps:$4 sm:$0xff]  }
 0x855   : > { %7767 = vmatpush1.bf16.msra.mxu0 %v12843_v17  ;;  %v12962_v17 = vld [vmem:[#allocation18 + $0x3c4] ss:$16 sps:$4 sm:$0xff]  }
 0x856   : > { %7768 = vmatprep.subr.bf16.mxu0 %v12848_v57  ;;  %v12965_v57 = vld [vmem:[#allocation18 + $0x1c4] ss:$16 sps:$4 sm:$0xff]   ;;  %8308 = vmatprep.subr.bf16.mxu1 %v12962_v17 }
 0x857   : > { %v13025_v17 = vld [vmem:[#allocation18 + $0x504] ss:$16 sps:$4 sm:$0xff]  }
 0x859   : > { %7769 = vmatpush1.bf16.msra.mxu0 %v12846_v5  ;;  %v12960_v5 = vld [vmem:[#allocation18 + $0x3c0] ss:$16 sps:$4 sm:$0xff]  }
 0x85a   : > { %7770 = vmatprep.subr.bf16.mxu0 %v12851_v18  ;;  %v12963_v18 = vld [vmem:[#allocation18 + $0x1c0] ss:$16 sps:$4 sm:$0xff]   ;;  %8309 = vmatpush1.bf16.msra.mxu1 %v12960_v5 }
 0x85b   : > { %v13023_v5 = vld [vmem:[#allocation18 + $0x500] ss:$16 sps:$4 sm:$0xff]  }
 0x85d   : > { %7771 = vmatpush1.bf16.msra.mxu0 %v12849_v22  ;;  %v12968_v22 = vld [vmem:[#allocation18 + $0x3e4] ss:$16 sps:$4 sm:$0xff]  }
 0x85e   : > { %7772 = vmatprep.subr.bf16.mxu0 %v12854_v26  ;;  %v12971_v26 = vld [vmem:[#allocation18 + $0x1e4] ss:$16 sps:$4 sm:$0xff]   ;;  %8310 = vmatprep.subr.bf16.mxu1 %v12968_v22 }
 0x85f   : > { %v13031_v22 = vld [vmem:[#allocation18 + $0x524] ss:$16 sps:$4 sm:$0xff]  }
 0x861   : > { %7773 = vmatpush1.bf16.msra.mxu0 %v12852_v54  ;;  %v12966_v54 = vld [vmem:[#allocation18 + $0x3e0] ss:$16 sps:$4 sm:$0xff]  }
 0x862   : > { %7774 = vmatprep.subr.bf16.mxu0 %v12857_v30  ;;  %v12969_v30 = vld [vmem:[#allocation18 + $0x1e0] ss:$16 sps:$4 sm:$0xff]   ;;  %8311 = vmatpush1.bf16.msra.mxu1 %v12966_v54 }
 0x863   : > { %v13029_v54 = vld [vmem:[#allocation18 + $0x520] ss:$16 sps:$4 sm:$0xff]  }
 0x865   : > { %7775 = vmatpush1.bf16.msra.mxu0 %v12855_v3  ;;  %v12974_v3 = vld [vmem:[#allocation18 + $0x20c] ss:$16 sps:$4 sm:$0xff]  }
 0x866   : > { %7776 = vmatprep.subr.bf16.mxu0 %v12860_v32  ;;  %v12977_v32 = vld [vmem:[#allocation18 + $0x404] ss:$16 sps:$4 sm:$0xff]   ;;  %8321 = vmatprep.subr.bf16.mxu1 %v12974_v3 }
 0x867   : > { %v13037_v3 = vld [vmem:[#allocation18 + $0x544] ss:$16 sps:$4 sm:$0xff]  }
 0x869   : > { %7777 = vmatpush1.bf16.msra.mxu0 %v12858_v35 }
 0x86a   : > { %7778 = vmatprep.subr.bf16.mxu0 %v12863_v12 }
 0x86d   : > { %7779 = vmatpush1.bf16.msra.mxu0 %v12861_v0 }
 0x86e   : > { %7780 = vmatprep.subr.bf16.mxu0 %v12866_v14 }
 0x871   : > { %7781 = vmatpush1.bf16.msra.mxu0 %v12864_v24 }
 0x872   : > { %7782 = vmatprep.subr.bf16.mxu0 %v12869_v37 }
 0x875   : > { %7783 = vmatpush1.bf16.msra.mxu0 %v12867_v51 }
 0x876   : > { %7784 = vmatprep.subr.bf16.mxu0 %v12872_v31 }
 0x879   : > { %7785 = vmatpush1.bf16.msra.mxu0 %v12870_v36 }
 0x87a   : > { %7786 = vmatprep.subr.bf16.mxu0 %v12875_v38 }
 0x87b   : > { %v7320_v40 = vpop.f32.mrb[84].mxu1 }
 0x87c   : > { %v7322_v53 = vpop.f32.mrb[85].mxu1  ;;  %v7329_v43 = vpack.c.bf16 %v7320_v40, %v7320_v40 }
 0x87d   : > { %v7330_v48 = vpack.c.bf16 %v7322_v53, %v7322_v53  ;;  %7787 = vmatpush1.bf16.msra.mxu0 %v12873_v16  ;;  %v7324_v15 = vpop.f32.mrb[86].mxu1 }
 0x87e   : > { %v7325_v44 = vpop.f32.mrb[87].mxu1  ;;  %8682 = vmatprep.subr.bf16.mxu0 %v12881_v21  ;;  %v12972_v15 = vld [vmem:[#allocation18 + $0x208] ss:$16 sps:$4 sm:$0xff]  }
 0x87f   : > { %7788 = vmatprep.mubr.bf16.mxu0 %v7330_v48  ;;  %v12975_v44 = vld [vmem:[#allocation18 + $0x400] ss:$16 sps:$4 sm:$0xff]  }
 0x880   : > { %7789 = vmatmul.mubr.bf16.vlgmr.msra.gmra.mrb[100].mxu0 %v7329_v43 }
 0x881   : > { %8683 = vmatpush1.bf16.msra.mxu0 %v12879_v42 }
 0x882   : > { %8684 = vmatprep.subr.bf16.mxu0 %v12887_v45  ;;  %v12980_v45 = vld [vmem:[#allocation18 + $0x22c] ss:$16 sps:$4 sm:$0xff]  }
 0x885   : > { %8685 = vmatpush1.bf16.msra.mxu0 %v12885_v49  ;;  %v12983_v49 = vld [vmem:[#allocation18 + $0x424] ss:$16 sps:$4 sm:$0xff]  }
 0x886   : > { %8686 = vmatprep.subr.bf16.mxu0 %v12893_v50 }
 0x889   : > { %8687 = vmatpush1.bf16.msra.mxu0 %v12891_v52  ;;  %v12978_v52 = vld [vmem:[#allocation18 + $0x228] ss:$16 sps:$4 sm:$0xff]  }
 0x88a   : > { %8688 = vmatprep.subr.bf16.mxu0 %v12899_v33  ;;  %v12981_v33 = vld [vmem:[#allocation18 + $0x420] ss:$16 sps:$4 sm:$0xff]  }
 0x88d   : > { %8689 = vmatpush1.bf16.msra.mxu0 %v12897_v55  ;;  %v12986_v55 = vld [vmem:[#allocation18 + $0x24c] ss:$16 sps:$4 sm:$0xff]  }
 0x88e   : > { %8690 = vmatprep.subr.bf16.mxu0 %v12905_v61  ;;  %v12989_v61 = vld [vmem:[#allocation18 + $0x444] ss:$16 sps:$4 sm:$0xff]  }
 0x891   : > { %8691 = vmatpush1.bf16.msra.mxu0 %v12903_v2  ;;  %v12984_v2 = vld [vmem:[#allocation18 + $0x248] ss:$16 sps:$4 sm:$0xff]  }
 0x892   : > { %8692 = vmatprep.subr.bf16.mxu0 %v12911_v39  ;;  %v12987_v39 = vld [vmem:[#allocation18 + $0x440] ss:$16 sps:$4 sm:$0xff]  }
 0x895   : > { %8693 = vmatpush1.bf16.msra.mxu0 %v12909_v13  ;;  %v12992_v13 = vld [vmem:[#allocation18 + $0x26c] ss:$16 sps:$4 sm:$0xff]  }
 0x896   : > { %8694 = vmatprep.subr.bf16.mxu0 %v12917_v41  ;;  %v12995_v41 = vld [vmem:[#allocation18 + $0x464] ss:$16 sps:$4 sm:$0xff]  }
 0x899   : > { %8695 = vmatpush1.bf16.msra.mxu0 %v12915_v7  ;;  %v12990_v7 = vld [vmem:[#allocation18 + $0x268] ss:$16 sps:$4 sm:$0xff]  }
 0x89a   : > { %8696 = vmatprep.subr.bf16.mxu0 %v12923_v19  ;;  %v12993_v19 = vld [vmem:[#allocation18 + $0x460] ss:$16 sps:$4 sm:$0xff]  }
 0x89d   : > { %8697 = vmatpush1.bf16.msra.mxu0 %v12921_v46  ;;  %v12998_v46 = vld [vmem:[#allocation18 + $0x28c] ss:$16 sps:$4 sm:$0xff]  }
 0x89e   : > { %8698 = vmatprep.subr.bf16.mxu0 %v12929_v8  ;;  %v13001_v8 = vld [vmem:[#allocation18 + $0x484] ss:$16 sps:$4 sm:$0xff]  }
 0x8a1   : > { %8699 = vmatpush1.bf16.msra.mxu0 %v12927_v27  ;;  %v12996_v27 = vld [vmem:[#allocation18 + $0x288] ss:$16 sps:$4 sm:$0xff]  }
 0x8a2   : > { %8700 = vmatprep.subr.bf16.mxu0 %v12935_v56  ;;  %v12999_v56 = vld [vmem:[#allocation18 + $0x480] ss:$16 sps:$4 sm:$0xff]  }
 0x8a5   : > { %8701 = vmatpush1.bf16.msra.mxu0 %v12933_v58  ;;  %v13004_v58 = vld [vmem:[#allocation18 + $0x2ac] ss:$16 sps:$4 sm:$0xff]  }
 0x8a6   : > { %8702 = vmatprep.subr.bf16.mxu0 %v12941_v9  ;;  %v13007_v9 = vld [vmem:[#allocation18 + $0x4a4] ss:$16 sps:$4 sm:$0xff]  }
 0x8a9   : > { %8703 = vmatpush1.bf16.msra.mxu0 %v12939_v1  ;;  %v13002_v1 = vld [vmem:[#allocation18 + $0x2a8] ss:$16 sps:$4 sm:$0xff]  }
 0x8aa   : > { %8704 = vmatprep.subr.bf16.mxu0 %v12947_v34  ;;  %v13005_v34 = vld [vmem:[#allocation18 + $0x4a0] ss:$16 sps:$4 sm:$0xff]  }
 0x8ad   : > { %8705 = vmatpush1.bf16.msra.mxu0 %v12945_v4  ;;  %v13010_v4 = vld [vmem:[#allocation18 + $0x2cc] ss:$16 sps:$4 sm:$0xff]  }
 0x8ae   : > { %8706 = vmatprep.subr.bf16.mxu0 %v12953_v60  ;;  %v13016_v60 = vld [vmem:[#allocation18 + $0x2ec] ss:$16 sps:$4 sm:$0xff]  }
 0x8b1   : > { %8707 = vmatpush1.bf16.msra.mxu0 %v12951_v47  ;;  %v13011_v47 = vld [vmem:[#allocation18 + $0x4c0] ss:$16 sps:$4 sm:$0xff]  }
 0x8b2   : > { %8708 = vmatprep.subr.bf16.mxu0 %v12959_v6  ;;  %v13022_v6 = vld [vmem:[#allocation18 + $0x30c] ss:$16 sps:$4 sm:$0xff]  }
 0x8b5   : > { %8709 = vmatpush1.bf16.msra.mxu0 %v12957_v62  ;;  %v13017_v62 = vld [vmem:[#allocation18 + $0x4e0] ss:$16 sps:$4 sm:$0xff]  }
 0x8b6   : > { %8710 = vmatprep.subr.bf16.mxu0 %v12965_v57  ;;  %v13020_v57 = vld [vmem:[#allocation18 + $0x308] ss:$16 sps:$4 sm:$0xff]  }
 0x8b9   : > { %8711 = vmatpush1.bf16.msra.mxu0 %v12963_v18  ;;  %v13028_v18 = vld [vmem:[#allocation18 + $0x32c] ss:$16 sps:$4 sm:$0xff]  }
 0x8ba   : > { %8712 = vmatprep.subr.bf16.mxu0 %v12971_v26  ;;  %v13026_v26 = vld [vmem:[#allocation18 + $0x328] ss:$16 sps:$4 sm:$0xff]  }
 0x8bd   : > { %8713 = vmatpush1.bf16.msra.mxu0 %v12969_v30  ;;  %v13034_v30 = vld [vmem:[#allocation18 + $0x34c] ss:$16 sps:$4 sm:$0xff]  }
 0x8be   : > { %9164 = vmatprep.subr.bf16.mxu0 %v12977_v32  ;;  %v13032_v32 = vld [vmem:[#allocation18 + $0x348] ss:$16 sps:$4 sm:$0xff]  }
 0x953   : > { %v7790_v35 = vpop.f32.mrb[100].mxu0 }
 0x954   : > { %v7792_v12 = vpop.f32.mrb[101].mxu0 }
 0x955   : > { %v7799_v0 = vcombine.low %v7790_v35, %v7792_v12  ;;  %v7794_v14 = vpop.f32.mrb[102].mxu0  ;;  %v13035_v35 = vld [vmem:[#allocation18 + $0x540] ss:$16 sps:$4 sm:$0xff]   ;;  %v13040_v12 = vld [vmem:[#allocation18 + $0x36c] ss:$16 sps:$4 sm:$0xff]  }
 0x956   : > { %v7795_v24 = vpop.f32.mrb[103].mxu0  ;;  %v13038_v14 = vld [vmem:[#allocation18 + $0x368] ss:$16 sps:$4 sm:$0xff]  }
 0x957   : > { %7801 = vst [vmem:[#allocation3] sm:$0xff] %v7799_v0  ;;  %v13043_v0 = vld [vmem:[#allocation18 + $0x564] ss:$16 sps:$4 sm:$0xff]   ;;  %v13041_v24 = vld [vmem:[#allocation18 + $0x560] ss:$16 sps:$4 sm:$0xff]  }
 0x95e   : > { %v7881_v37 = vld [vmem:[#allocation3 + $0x1] ss:$4 sm:$0x3]  ;;  %v7802_v51 = vld [vmem:[#allocation3] ss:$4 sm:$0x3] }
 0x95f   : > { %v7886_v31 = vrot.slane %v7881_v37, %v14327_v20  ;;  %v7890_v36 = vrot.slane %v7881_v37, %v14332_v25  ;;  %v7807_v38 = vrot.slane %v7802_v51, %v14327_v20  ;;  %v7811_v16 = vrot.slane %v7802_v51, %v14332_v25  ;;  %v14542_v21 = vld [vmem:[#allocation3 + $0x2] ss:$4 sm:$0x3]  ;;  %v13046_v37 = vld [vmem:[#allocation18 + $0x38c] ss:$16 sps:$4 sm:$0xff]  }
 0x960   : > { %v8774_v40 = vrot.slane %v14542_v21, %v14332_v25  ;;  %v13049_v51 = vld [vmem:[#allocation18 + $0x584] ss:$16 sps:$4 sm:$0xff]  }
 0x961   : > { %v14546_v53 = vpack.c.bf16 %v7886_v31, %v7886_v31  ;;  %v7894_v48 = vpack.c.bf16 %v7890_v36, %v7890_v36  ;;  %v14548_v42 = vpack.c.bf16 %v7807_v38, %v7807_v38  ;;  %v14550_v43 = vpack.c.bf16 %v7811_v16, %v7811_v16  ;;  %v13044_v31 = vld [vmem:[#allocation18 + $0x388] ss:$16 sps:$4 sm:$0xff]   ;;  %v13047_v36 = vld [vmem:[#allocation18 + $0x580] ss:$16 sps:$4 sm:$0xff]   ;;  %v13052_v38 = vld [vmem:[#allocation18 + $0x3ac] ss:$16 sps:$4 sm:$0xff]  }
 0x962   : > { %v14555_v50 = vpack.c.bf16 %v8774_v40, %v8774_v40  ;;  %v13055_v16 = vld [vmem:[#allocation18 + $0x5a4] ss:$16 sps:$4 sm:$0xff]   ;;  %v13050_v40 = vld [vmem:[#allocation18 + $0x3a8] ss:$16 sps:$4 sm:$0xff]  }
 0x963   : > { %8312 = vmatprep.mubr.bf16.mxu1 %v7894_v48  ;;  %8714 = vmatprep.mubr.bf16.mxu0 %v14550_v43 }
 0x964   : > { %8313 = vmatmul.mubr.bf16.vlgmr.msra.gmra.mrb[88].mxu1 %v14546_v53  ;;  %8715 = vmatmul.mubr.bf16.vlgmr.msra.gmra.mrb[104].mxu0 %v14548_v42 }
 0x965   : > { %8322 = vmatpush1.bf16.msra.mxu1 %v12972_v15  ;;  %9165 = vmatpush1.bf16.msra.mxu0 %v12975_v44  ;;  %v13058_v15 = vld [vmem:[#allocation18 + $0x3cc] ss:$16 sps:$4 sm:$0xff]   ;;  %v13061_v44 = vld [vmem:[#allocation18 + $0x5c4] ss:$16 sps:$4 sm:$0xff]  }
 0x966   : > { %8353 = vmatprep.mubr.bf16.mxu1 %v7894_v48  ;;  %9196 = vmatprep.mubr.bf16.mxu0 %v14555_v50  ;;  %v13053_v48 = vld [vmem:[#allocation18 + $0x5a0] ss:$16 sps:$4 sm:$0xff]  }
 0x967   : > { %8323 = vmatprep.subr.bf16.mxu1 %v12980_v45  ;;  %9166 = vmatprep.subr.bf16.mxu0 %v12983_v49  ;;  %v13056_v45 = vld [vmem:[#allocation18 + $0x3c8] ss:$16 sps:$4 sm:$0xff]   ;;  %v13059_v49 = vld [vmem:[#allocation18 + $0x5c0] ss:$16 sps:$4 sm:$0xff]  }
 0x969   : > { %8324 = vmatpush1.bf16.msra.mxu1 %v12978_v52  ;;  %9167 = vmatpush1.bf16.msra.mxu0 %v12981_v33  ;;  %v13064_v52 = vld [vmem:[#allocation18 + $0x3ec] ss:$16 sps:$4 sm:$0xff]   ;;  %v13067_v33 = vld [vmem:[#allocation18 + $0x5e4] ss:$16 sps:$4 sm:$0xff]  }
 0x96a   : > { %8325 = vmatprep.subr.bf16.mxu1 %v12986_v55  ;;  %9168 = vmatprep.subr.bf16.mxu0 %v12989_v61  ;;  %v13062_v55 = vld [vmem:[#allocation18 + $0x3e8] ss:$16 sps:$4 sm:$0xff]   ;;  %v13065_v61 = vld [vmem:[#allocation18 + $0x5e0] ss:$16 sps:$4 sm:$0xff]  }
 0x96d   : > { %8326 = vmatpush1.bf16.msra.mxu1 %v12984_v2  ;;  %9169 = vmatpush1.bf16.msra.mxu0 %v12987_v39  ;;  %v14558_v2 = vld [vmem:[#allocation3 + $0x3] ss:$4 sm:$0x3]  ;;  %v8770_v39 = vrot.slane %v14542_v21, %v14327_v20 }
 0x96e   : > { %8327 = vmatprep.subr.bf16.mxu1 %v12992_v13  ;;  %9170 = vmatprep.subr.bf16.mxu0 %v12995_v41  ;;  %v13070_v13 = vld [vmem:[#allocation18 + $0xc] ss:$16 sps:$4 sm:$0xff]   ;;  %v13073_v41 = vld [vmem:[#allocation18 + $0x604] ss:$16 sps:$4 sm:$0xff]  }
 0x971   : > { %8328 = vmatpush1.bf16.msra.mxu1 %v12990_v7  ;;  %9171 = vmatpush1.bf16.msra.mxu0 %v12993_v19  ;;  %v9260_v7 = vrot.slane %v14558_v2, %v14332_v25  ;;  %v13068_v19 = vld [vmem:[#allocation18 + $0x8] ss:$16 sps:$4 sm:$0xff]  }
 0x972   : > { %8329 = vmatprep.subr.bf16.mxu1 %v12998_v46  ;;  %9172 = vmatprep.subr.bf16.mxu0 %v13001_v8  ;;  %v14564_v46 = vpack.c.bf16 %v8770_v39, %v8770_v39  ;;  %v13071_v8 = vld [vmem:[#allocation18 + $0x600] ss:$16 sps:$4 sm:$0xff]   ;;  %v13148_v39 = vld [vmem:[#allocation18 + $0x1ac] ss:$16 sps:$4 sm:$0xff]  }
 0x973   : > { %v14568_v21 = vpack.c.bf16 %v9260_v7, %v9260_v7  ;;  %v13149_v7 = vld [vmem:[#allocation18 + $0x7a0] ss:$16 sps:$4 sm:$0xff]  }
 0x975   : > { %8330 = vmatpush1.bf16.msra.mxu1 %v12996_v27  ;;  %9173 = vmatpush1.bf16.msra.mxu0 %v12999_v56  ;;  %v13076_v27 = vld [vmem:[#allocation18 + $0x2c] ss:$16 sps:$4 sm:$0xff]   ;;  %v13079_v56 = vld [vmem:[#allocation18 + $0x624] ss:$16 sps:$4 sm:$0xff]  }
 0x976   : > { %8331 = vmatprep.subr.bf16.mxu1 %v13004_v58  ;;  %9174 = vmatprep.subr.bf16.mxu0 %v13007_v9  ;;  %v13074_v58 = vld [vmem:[#allocation18 + $0x28] ss:$16 sps:$4 sm:$0xff]   ;;  %v13077_v9 = vld [vmem:[#allocation18 + $0x620] ss:$16 sps:$4 sm:$0xff]  }
 0x979   : > { %8332 = vmatpush1.bf16.msra.mxu1 %v13002_v1  ;;  %9175 = vmatpush1.bf16.msra.mxu0 %v13005_v34  ;;  %v13082_v1 = vld [vmem:[#allocation18 + $0x4c] ss:$16 sps:$4 sm:$0xff]   ;;  %v13085_v34 = vld [vmem:[#allocation18 + $0x644] ss:$16 sps:$4 sm:$0xff]  }
 0x97a   : > { %8333 = vmatprep.subr.bf16.mxu1 %v13010_v4  ;;  %9176 = vmatprep.subr.bf16.mxu0 %v13013_v29  ;;  %v13080_v4 = vld [vmem:[#allocation18 + $0x48] ss:$16 sps:$4 sm:$0xff]   ;;  %v13088_v29 = vld [vmem:[#allocation18 + $0x6c] ss:$16 sps:$4 sm:$0xff]  }
 0x97d   : > { %8334 = vmatpush1.bf16.msra.mxu1 %v13008_v63  ;;  %9177 = vmatpush1.bf16.msra.mxu0 %v13011_v47  ;;  %v13091_v63 = vld [vmem:[#allocation18 + $0x664] ss:$16 sps:$4 sm:$0xff]   ;;  %v13086_v47 = vld [vmem:[#allocation18 + $0x68] ss:$16 sps:$4 sm:$0xff]  }
 0x97e   : > { %8335 = vmatprep.subr.bf16.mxu1 %v13016_v60  ;;  %9178 = vmatprep.subr.bf16.mxu0 %v13019_v10  ;;  %v13094_v60 = vld [vmem:[#allocation18 + $0x8c] ss:$16 sps:$4 sm:$0xff]   ;;  %v13097_v10 = vld [vmem:[#allocation18 + $0x684] ss:$16 sps:$4 sm:$0xff]  }
 0x981   : > { %8336 = vmatpush1.bf16.msra.mxu1 %v13014_v59  ;;  %9179 = vmatpush1.bf16.msra.mxu0 %v13017_v62  ;;  %v13092_v59 = vld [vmem:[#allocation18 + $0x88] ss:$16 sps:$4 sm:$0xff]   ;;  %v13095_v62 = vld [vmem:[#allocation18 + $0x680] ss:$16 sps:$4 sm:$0xff]  }
 0x982   : > { %8337 = vmatprep.subr.bf16.mxu1 %v13022_v6  ;;  %9180 = vmatprep.subr.bf16.mxu0 %v13025_v17  ;;  %v13100_v6 = vld [vmem:[#allocation18 + $0xac] ss:$16 sps:$4 sm:$0xff]   ;;  %v13103_v17 = vld [vmem:[#allocation18 + $0x6a4] ss:$16 sps:$4 sm:$0xff]  }
 0x985   : > { %8338 = vmatpush1.bf16.msra.mxu1 %v13020_v57  ;;  %9181 = vmatpush1.bf16.msra.mxu0 %v13023_v5  ;;  %v13098_v57 = vld [vmem:[#allocation18 + $0xa8] ss:$16 sps:$4 sm:$0xff]   ;;  %v13101_v5 = vld [vmem:[#allocation18 + $0x6a0] ss:$16 sps:$4 sm:$0xff]  }
 0x986   : > { %8339 = vmatprep.subr.bf16.mxu1 %v13028_v18  ;;  %9182 = vmatprep.subr.bf16.mxu0 %v13031_v22  ;;  %v13106_v18 = vld [vmem:[#allocation18 + $0xcc] ss:$16 sps:$4 sm:$0xff]   ;;  %v13109_v22 = vld [vmem:[#allocation18 + $0x6c4] ss:$16 sps:$4 sm:$0xff]  }
 0x989   : > { %8340 = vmatpush1.bf16.msra.mxu1 %v13026_v26  ;;  %9183 = vmatpush1.bf16.msra.mxu0 %v13029_v54  ;;  %v13104_v26 = vld [vmem:[#allocation18 + $0xc8] ss:$16 sps:$4 sm:$0xff]   ;;  %v13107_v54 = vld [vmem:[#allocation18 + $0x6c0] ss:$16 sps:$4 sm:$0xff]  }
 0x98a   : > { %8341 = vmatprep.subr.bf16.mxu1 %v13034_v30  ;;  %9184 = vmatprep.subr.bf16.mxu0 %v13037_v3  ;;  %v13112_v30 = vld [vmem:[#allocation18 + $0xec] ss:$16 sps:$4 sm:$0xff]   ;;  %v13115_v3 = vld [vmem:[#allocation18 + $0x6e4] ss:$16 sps:$4 sm:$0xff]  }
 0x98d   : > { %8342 = vmatpush1.bf16.msra.mxu1 %v13032_v32  ;;  %9185 = vmatpush1.bf16.msra.mxu0 %v13035_v35  ;;  %v13110_v32 = vld [vmem:[#allocation18 + $0xe8] ss:$16 sps:$4 sm:$0xff]   ;;  %v13113_v35 = vld [vmem:[#allocation18 + $0x6e0] ss:$16 sps:$4 sm:$0xff]  }
 0x98e   : > { %8343 = vmatprep.subr.bf16.mxu1 %v13040_v12  ;;  %9186 = vmatprep.subr.bf16.mxu0 %v13043_v0  ;;  %v13118_v12 = vld [vmem:[#allocation18 + $0x10c] ss:$16 sps:$4 sm:$0xff]   ;;  %v13121_v0 = vld [vmem:[#allocation18 + $0x704] ss:$16 sps:$4 sm:$0xff]  }
 0x991   : > { %8344 = vmatpush1.bf16.msra.mxu1 %v13038_v14  ;;  %9187 = vmatpush1.bf16.msra.mxu0 %v13041_v24  ;;  %v13116_v14 = vld [vmem:[#allocation18 + $0x108] ss:$16 sps:$4 sm:$0xff]   ;;  %v13119_v24 = vld [vmem:[#allocation18 + $0x700] ss:$16 sps:$4 sm:$0xff]  }
 0x992   : > { %8345 = vmatprep.subr.bf16.mxu1 %v13046_v37  ;;  %9188 = vmatprep.subr.bf16.mxu0 %v13049_v51  ;;  %v13124_v37 = vld [vmem:[#allocation18 + $0x12c] ss:$16 sps:$4 sm:$0xff]   ;;  %v13127_v51 = vld [vmem:[#allocation18 + $0x724] ss:$16 sps:$4 sm:$0xff]  }
 0x995   : > { %8346 = vmatpush1.bf16.msra.mxu1 %v13044_v31  ;;  %9189 = vmatpush1.bf16.msra.mxu0 %v13047_v36  ;;  %v13122_v31 = vld [vmem:[#allocation18 + $0x128] ss:$16 sps:$4 sm:$0xff]   ;;  %v13125_v36 = vld [vmem:[#allocation18 + $0x720] ss:$16 sps:$4 sm:$0xff]  }
 0x996   : > { %8347 = vmatprep.subr.bf16.mxu1 %v13052_v38  ;;  %9190 = vmatprep.subr.bf16.mxu0 %v13055_v16  ;;  %v13130_v38 = vld [vmem:[#allocation18 + $0x14c] ss:$16 sps:$4 sm:$0xff]   ;;  %v13133_v16 = vld [vmem:[#allocation18 + $0x744] ss:$16 sps:$4 sm:$0xff]  }
 0x999   : > { %8348 = vmatpush1.bf16.msra.mxu1 %v13050_v40  ;;  %9191 = vmatpush1.bf16.msra.mxu0 %v13053_v48  ;;  %v13128_v40 = vld [vmem:[#allocation18 + $0x148] ss:$16 sps:$4 sm:$0xff]   ;;  %v13131_v48 = vld [vmem:[#allocation18 + $0x740] ss:$16 sps:$4 sm:$0xff]  }
 0x99a   : > { %8349 = vmatprep.subr.bf16.mxu1 %v13058_v15  ;;  %9192 = vmatprep.subr.bf16.mxu0 %v13061_v44  ;;  %v13136_v15 = vld [vmem:[#allocation18 + $0x16c] ss:$16 sps:$4 sm:$0xff]   ;;  %v13139_v44 = vld [vmem:[#allocation18 + $0x764] ss:$16 sps:$4 sm:$0xff]  }
 0x99d   : > { %8350 = vmatpush1.bf16.msra.mxu1 %v13056_v45  ;;  %9193 = vmatpush1.bf16.msra.mxu0 %v13059_v49  ;;  %v13134_v45 = vld [vmem:[#allocation18 + $0x168] ss:$16 sps:$4 sm:$0xff]   ;;  %v13137_v49 = vld [vmem:[#allocation18 + $0x760] ss:$16 sps:$4 sm:$0xff]  }
 0x99e   : > { %8351 = vmatprep.subr.bf16.mxu1 %v13064_v52  ;;  %9194 = vmatprep.subr.bf16.mxu0 %v13067_v33  ;;  %v13142_v52 = vld [vmem:[#allocation18 + $0x18c] ss:$16 sps:$4 sm:$0xff]   ;;  %v13145_v33 = vld [vmem:[#allocation18 + $0x784] ss:$16 sps:$4 sm:$0xff]  }
 0x9a1   : > { %8352 = vmatpush1.bf16.msra.mxu1 %v13062_v55  ;;  %9195 = vmatpush1.bf16.msra.mxu0 %v13065_v61  ;;  %v13140_v55 = vld [vmem:[#allocation18 + $0x188] ss:$16 sps:$4 sm:$0xff]   ;;  %v13143_v61 = vld [vmem:[#allocation18 + $0x780] ss:$16 sps:$4 sm:$0xff]  }
 0x9a2   : > { %8723 = vmatprep.subr.bf16.mxu1 %v13070_v13  ;;  %9650 = vmatprep.subr.bf16.mxu0 %v13073_v41  ;;  %v13151_v13 = vld [vmem:[#allocation18 + $0x7a4] ss:$16 sps:$4 sm:$0xff]   ;;  %v13146_v41 = vld [vmem:[#allocation18 + $0x1a8] ss:$16 sps:$4 sm:$0xff]  }
 0x9a4   : > { %8354 = vmatmul.mubr.bf16.vlgmr.msra.gmra.mrb[92].mxu1 %v14546_v53  ;;  %9197 = vmatmul.mubr.bf16.vlgmr.msra.gmra.mrb[108].mxu0 %v14564_v46  ;;  %v13083_v53 = vld [vmem:[#allocation18 + $0x640] ss:$16 sps:$4 sm:$0xff]  }
 0x9a5   : > { %8724 = vmatpush1.bf16.msra.mxu1 %v13068_v19  ;;  %8755 = vmatprep.mubr.bf16.mxu1 %v14550_v43  ;;  %v13089_v43 = vld [vmem:[#allocation18 + $0x660] ss:$16 sps:$4 sm:$0xff]   ;;  %v13154_v19 = vld [vmem:[#allocation18 + $0x1cc] ss:$16 sps:$4 sm:$0xff]  }
 0x9a6   : > { %9651 = vmatpush1.bf16.msra.mxu0 %v13071_v8  ;;  %9682 = vmatprep.mubr.bf16.mxu0 %v14568_v21  ;;  %v13157_v8 = vld [vmem:[#allocation18 + $0x7c4] ss:$16 sps:$4 sm:$0xff]  }
 0x9a7   : > { %8725 = vmatprep.subr.bf16.mxu1 %v13076_v27  ;;  %9652 = vmatprep.subr.bf16.mxu0 %v13079_v56  ;;  %v13152_v27 = vld [vmem:[#allocation18 + $0x1c8] ss:$16 sps:$4 sm:$0xff]   ;;  %v13155_v56 = vld [vmem:[#allocation18 + $0x7c0] ss:$16 sps:$4 sm:$0xff]  }
 0x9a9   : > { %8726 = vmatpush1.bf16.msra.mxu1 %v13074_v58  ;;  %v13160_v58 = vld [vmem:[#allocation18 + $0x1ec] ss:$16 sps:$4 sm:$0xff]  }
 0x9aa   : > { %9653 = vmatpush1.bf16.msra.mxu0 %v13077_v9  ;;  %8727 = vmatprep.subr.bf16.mxu1 %v13082_v1  ;;  %v13163_v9 = vld [vmem:[#allocation18 + $0x7e4] ss:$16 sps:$4 sm:$0xff]   ;;  %v13158_v1 = vld [vmem:[#allocation18 + $0x1e8] ss:$16 sps:$4 sm:$0xff]  }
 0x9ab   : > { %9654 = vmatprep.subr.bf16.mxu0 %v13085_v34  ;;  %v13161_v34 = vld [vmem:[#allocation18 + $0x7e0] ss:$16 sps:$4 sm:$0xff]  }
 0x9ad   : > { %8728 = vmatpush1.bf16.msra.mxu1 %v13080_v4  ;;  %v13166_v4 = vld [vmem:[#allocation18 + $0x40c] ss:$16 sps:$4 sm:$0xff]  }
 0x9ae   : > { %9655 = vmatpush1.bf16.msra.mxu0 %v13083_v53  ;;  %8729 = vmatprep.subr.bf16.mxu1 %v13088_v29  ;;  %v9256_v53 = vrot.slane %v14558_v2, %v14327_v20  ;;  %v13164_v29 = vld [vmem:[#allocation18 + $0x408] ss:$16 sps:$4 sm:$0xff]  }
 0x9af   : > { %9656 = vmatprep.subr.bf16.mxu0 %v13091_v63  ;;  %v13169_v63 = vld [vmem:[#allocation18 + $0x42c] ss:$16 sps:$4 sm:$0xff]   ;;  %v13170_v2 = vld [vmem:[#allocation18 + $0x448] ss:$16 sps:$4 sm:$0xff]  }
 0x9b1   : > { %8730 = vmatpush1.bf16.msra.mxu1 %v13086_v47  ;;  %v14574_v47 = vpack.c.bf16 %v9256_v53, %v9256_v53 }
 0x9b2   : > { %9657 = vmatpush1.bf16.msra.mxu0 %v13089_v43  ;;  %8731 = vmatprep.subr.bf16.mxu1 %v13094_v60  ;;  %v13167_v43 = vld [vmem:[#allocation18 + $0x428] ss:$16 sps:$4 sm:$0xff]   ;;  %v13172_v60 = vld [vmem:[#allocation18 + $0x44c] ss:$16 sps:$4 sm:$0xff]  }
 0x9b3   : > { %9658 = vmatprep.subr.bf16.mxu0 %v13097_v10  ;;  %v13175_v10 = vld [vmem:[#allocation18 + $0x46c] ss:$16 sps:$4 sm:$0xff]  }
 0x9b5   : > { %8732 = vmatpush1.bf16.msra.mxu1 %v13092_v59  ;;  %v13173_v59 = vld [vmem:[#allocation18 + $0x468] ss:$16 sps:$4 sm:$0xff]  }
 0x9b6   : > { %9659 = vmatpush1.bf16.msra.mxu0 %v13095_v62  ;;  %8733 = vmatprep.subr.bf16.mxu1 %v13100_v6  ;;  %v13178_v62 = vld [vmem:[#allocation18 + $0x48c] ss:$16 sps:$4 sm:$0xff]   ;;  %v13176_v6 = vld [vmem:[#allocation18 + $0x488] ss:$16 sps:$4 sm:$0xff]  }
 0x9b7   : > { %9660 = vmatprep.subr.bf16.mxu0 %v13103_v17  ;;  %v13179_v17 = vld [vmem:[#allocation18 + $0x4a8] ss:$16 sps:$4 sm:$0xff]  }
 0x9b9   : > { %8734 = vmatpush1.bf16.msra.mxu1 %v13098_v57  ;;  %v13184_v57 = vld [vmem:[#allocation18 + $0x4cc] ss:$16 sps:$4 sm:$0xff]  }
 0x9ba   : > { %9661 = vmatpush1.bf16.msra.mxu0 %v13101_v5  ;;  %8735 = vmatprep.subr.bf16.mxu1 %v13106_v18  ;;  %v13187_v5 = vld [vmem:[#allocation18 + $0x4ec] ss:$16 sps:$4 sm:$0xff]   ;;  %v13260_v18 = vld [vmem:[#allocation21 + $0x40] sm:$0xff]  }
 0x9bb   : > { %9662 = vmatprep.subr.bf16.mxu0 %v13109_v22  ;;  %v13261_v22 = vld [vmem:[#allocation21] sm:$0xff]  }
 0x9bd   : > { %8736 = vmatpush1.bf16.msra.mxu1 %v13104_v26  ;;  %v13262_v26 = vld [vmem:[#allocation21 + $0x48] sm:$0xff]  }
 0x9be   : > { %9663 = vmatpush1.bf16.msra.mxu0 %v13107_v54  ;;  %8737 = vmatprep.subr.bf16.mxu1 %v13112_v30  ;;  %v13185_v54 = vld [vmem:[#allocation18 + $0x4e8] ss:$16 sps:$4 sm:$0xff]   ;;  %v13263_v30 = vld [vmem:[#allocation21 + $0x8] sm:$0xff]  }
 0x9bf   : > { %9664 = vmatprep.subr.bf16.mxu0 %v13115_v3  ;;  %v13190_v3 = vld [vmem:[#allocation18 + $0x50c] ss:$16 sps:$4 sm:$0xff]  }
 0x9c1   : > { %8738 = vmatpush1.bf16.msra.mxu1 %v13110_v32  ;;  %v13264_v32 = vld [vmem:[#allocation21 + $0x50] sm:$0xff]  }
 0x9c2   : > { %9665 = vmatpush1.bf16.msra.mxu0 %v13113_v35  ;;  %8739 = vmatprep.subr.bf16.mxu1 %v13118_v12  ;;  %v13188_v35 = vld [vmem:[#allocation18 + $0x508] ss:$16 sps:$4 sm:$0xff]  }
 0x9c3   : > { %9666 = vmatprep.subr.bf16.mxu0 %v13121_v0  ;;  %v13265_v12 = vld [vmem:[#allocation21 + $0x10] sm:$0xff]   ;;  %v13193_v0 = vld [vmem:[#allocation18 + $0x52c] ss:$16 sps:$4 sm:$0xff]  }
 0x9c5   : > { %8740 = vmatpush1.bf16.msra.mxu1 %v13116_v14  ;;  %v13266_v14 = vld [vmem:[#allocation21 + $0x58] sm:$0xff]  }
 0x9c6   : > { %9667 = vmatpush1.bf16.msra.mxu0 %v13119_v24  ;;  %8741 = vmatprep.subr.bf16.mxu1 %v13124_v37  ;;  %v13191_v24 = vld [vmem:[#allocation18 + $0x528] ss:$16 sps:$4 sm:$0xff]   ;;  %v13267_v37 = vld [vmem:[#allocation21 + $0x18] sm:$0xff]  }
 0x9c7   : > { %9668 = vmatprep.subr.bf16.mxu0 %v13127_v51  ;;  %v13196_v51 = vld [vmem:[#allocation18 + $0x54c] ss:$16 sps:$4 sm:$0xff]  }
 0x9c9   : > { %8742 = vmatpush1.bf16.msra.mxu1 %v13122_v31  ;;  %v13268_v31 = vld [vmem:[#allocation21 + $0x60] sm:$0xff]  }
 0x9ca   : > { %9669 = vmatpush1.bf16.msra.mxu0 %v13125_v36  ;;  %8743 = vmatprep.subr.bf16.mxu1 %v13130_v38  ;;  %v13194_v36 = vld [vmem:[#allocation18 + $0x548] ss:$16 sps:$4 sm:$0xff]  }
 0x9cb   : > { %9670 = vmatprep.subr.bf16.mxu0 %v13133_v16  ;;  %v13269_v38 = vld [vmem:[#allocation21 + $0x20] sm:$0xff]   ;;  %v13199_v16 = vld [vmem:[#allocation18 + $0x56c] ss:$16 sps:$4 sm:$0xff]  }
 0x9cd   : > { %8744 = vmatpush1.bf16.msra.mxu1 %v13128_v40  ;;  %v13270_v40 = vld [vmem:[#allocation21 + $0x68] sm:$0xff]  }
 0x9ce   : > { %9671 = vmatpush1.bf16.msra.mxu0 %v13131_v48  ;;  %8745 = vmatprep.subr.bf16.mxu1 %v13136_v15  ;;  %v13197_v48 = vld [vmem:[#allocation18 + $0x568] ss:$16 sps:$4 sm:$0xff]   ;;  %v13202_v15 = vld [vmem:[#allocation18 + $0x58c] ss:$16 sps:$4 sm:$0xff]  }
 0x9cf   : > { %9672 = vmatprep.subr.bf16.mxu0 %v13139_v44  ;;  %v13200_v44 = vld [vmem:[#allocation18 + $0x588] ss:$16 sps:$4 sm:$0xff]  }
 0x9d1   : > { %8746 = vmatpush1.bf16.msra.mxu1 %v13134_v45  ;;  %v13205_v45 = vld [vmem:[#allocation18 + $0x5ac] ss:$16 sps:$4 sm:$0xff]  }
 0x9d2   : > { %9673 = vmatpush1.bf16.msra.mxu0 %v13137_v49  ;;  %8747 = vmatprep.subr.bf16.mxu1 %v13142_v52  ;;  %v13203_v49 = vld [vmem:[#allocation18 + $0x5a8] ss:$16 sps:$4 sm:$0xff]   ;;  %v13208_v52 = vld [vmem:[#allocation18 + $0x5cc] ss:$16 sps:$4 sm:$0xff]  }
 0x9d3   : > { %9674 = vmatprep.subr.bf16.mxu0 %v13145_v33  ;;  %v13206_v33 = vld [vmem:[#allocation18 + $0x5c8] ss:$16 sps:$4 sm:$0xff]  }
 0x9d5   : > { %8748 = vmatpush1.bf16.msra.mxu1 %v13140_v55  ;;  %v13211_v55 = vld [vmem:[#allocation18 + $0x5ec] ss:$16 sps:$4 sm:$0xff]  }
 0x9d6   : > { %9675 = vmatpush1.bf16.msra.mxu0 %v13143_v61  ;;  %8749 = vmatprep.subr.bf16.mxu1 %v13148_v39  ;;  %v13209_v61 = vld [vmem:[#allocation18 + $0x5e8] ss:$16 sps:$4 sm:$0xff]   ;;  %v13214_v39 = vld [vmem:[#allocation18 + $0x60c] ss:$16 sps:$4 sm:$0xff]  }
 0x9d7   : > { %9676 = vmatprep.subr.bf16.mxu0 %v13151_v13  ;;  %v13212_v13 = vld [vmem:[#allocation18 + $0x608] ss:$16 sps:$4 sm:$0xff]  }
 0x9d9   : > { %8750 = vmatpush1.bf16.msra.mxu1 %v13146_v41  ;;  %v13217_v41 = vld [vmem:[#allocation18 + $0x62c] ss:$16 sps:$4 sm:$0xff]  }
 0x9da   : > { %9677 = vmatpush1.bf16.msra.mxu0 %v13149_v7  ;;  %8751 = vmatprep.subr.bf16.mxu1 %v13154_v19  ;;  %v13215_v7 = vld [vmem:[#allocation18 + $0x628] ss:$16 sps:$4 sm:$0xff]   ;;  %v13220_v19 = vld [vmem:[#allocation18 + $0x64c] ss:$16 sps:$4 sm:$0xff]  }
 0x9db   : > { %9678 = vmatprep.subr.bf16.mxu0 %v13157_v8  ;;  %v13218_v8 = vld [vmem:[#allocation18 + $0x648] ss:$16 sps:$4 sm:$0xff]  }
 0x9dd   : > { %8752 = vmatpush1.bf16.msra.mxu1 %v13152_v27  ;;  %v13223_v27 = vld [vmem:[#allocation18 + $0x66c] ss:$16 sps:$4 sm:$0xff]  }
 0x9de   : > { %9679 = vmatpush1.bf16.msra.mxu0 %v13155_v56  ;;  %8753 = vmatprep.subr.bf16.mxu1 %v13160_v58  ;;  %v13221_v56 = vld [vmem:[#allocation18 + $0x668] ss:$16 sps:$4 sm:$0xff]   ;;  %v13226_v58 = vld [vmem:[#allocation18 + $0x68c] ss:$16 sps:$4 sm:$0xff]  }
 0x9df   : > { %9680 = vmatprep.subr.bf16.mxu0 %v13163_v9  ;;  %v13224_v9 = vld [vmem:[#allocation18 + $0x688] ss:$16 sps:$4 sm:$0xff]  }
 0x9e1   : > { %8754 = vmatpush1.bf16.msra.mxu1 %v13158_v1  ;;  %v13229_v1 = vld [vmem:[#allocation18 + $0x6ac] ss:$16 sps:$4 sm:$0xff]  }
 0x9e2   : > { %9681 = vmatpush1.bf16.msra.mxu0 %v13161_v34  ;;  %9205 = vmatprep.subr.bf16.mxu1 %v13166_v4  ;;  %v13232_v34 = vld [vmem:[#allocation18 + $0x6cc] ss:$16 sps:$4 sm:$0xff]  }
 0x9e3   : > { %11502 = vmatprep.subr.bf16.mxu0 %v13260_v18  ;;  %v13274_v18 = vld [vmem:[#allocation21 + $0x78] sm:$0xff]  }
 0x9e4   : > { %8756 = vmatmul.mubr.bf16.vlgmr.msra.gmra.mrb[96].mxu1 %v14548_v42  ;;  %v13181_v42 = vld [vmem:[#allocation18 + $0x4ac] ss:$16 sps:$4 sm:$0xff]  }
 0x9e5   : > { %9683 = vmatmul.mubr.bf16.vlgmr.msra.gmra.mrb[112].mxu0 %v14574_v47  ;;  %9206 = vmatpush1.bf16.msra.mxu1 %v13164_v29 }
 0x9e6   : > { %9237 = vmatprep.mubr.bf16.mxu1 %v14555_v50  ;;  %9207 = vmatprep.subr.bf16.mxu1 %v13169_v63  ;;  %v13182_v50 = vld [vmem:[#allocation18 + $0x4c8] ss:$16 sps:$4 sm:$0xff]  }
 0x9e7   : > { %11503 = vmatpush3.bf16.msra.mxu0 %v13261_v22  ;;  %v13236_v22 = vld [vmem:[#allocation18 + $0x708] ss:$16 sps:$4 sm:$0xff]  }
 0x9e8   : > { %11504 = vmatprep.subr.bf16.mxu0 %v13262_v26  ;;  %v13241_v26 = vld [vmem:[#allocation18 + $0x72c] ss:$16 sps:$4 sm:$0xff]  }
 0x9e9   : > { %9208 = vmatpush1.bf16.msra.mxu1 %v13167_v43 }
 0x9ea   : > { %9209 = vmatprep.subr.bf16.mxu1 %v13172_v60 }
 0x9eb   : > { %11505 = vmatpush3.bf16.msra.mxu0 %v13263_v30  ;;  %v13239_v30 = vld [vmem:[#allocation18 + $0x728] ss:$16 sps:$4 sm:$0xff]  }
 0x9ec   : > { %11506 = vmatprep.subr.bf16.mxu0 %v13264_v32  ;;  %v13242_v32 = vld [vmem:[#allocation18 + $0x748] ss:$16 sps:$4 sm:$0xff]  }
 0x9ed   : > { %9210 = vmatpush1.bf16.msra.mxu1 %v13170_v2 }
 0x9ee   : > { %9211 = vmatprep.subr.bf16.mxu1 %v13175_v10  ;;  %v13230_v10 = vld [vmem:[#allocation18 + $0x6c8] ss:$16 sps:$4 sm:$0xff]  }
 0x9ef   : > { %11507 = vmatpush3.bf16.msra.mxu0 %v13265_v12  ;;  %v13245_v12 = vld [vmem:[#allocation18 + $0x768] ss:$16 sps:$4 sm:$0xff]  }
 0x9f0   : > { %11508 = vmatprep.subr.bf16.mxu0 %v13266_v14  ;;  %v13248_v14 = vld [vmem:[#allocation18 + $0x788] ss:$16 sps:$4 sm:$0xff]  }
 0x9f1   : > { %9212 = vmatpush1.bf16.msra.mxu1 %v13173_v59 }
 0x9f2   : > { %9213 = vmatprep.subr.bf16.mxu1 %v13178_v62 }
 0x9f3   : > { %11509 = vmatpush3.bf16.msra.mxu0 %v13267_v37  ;;  %v13251_v37 = vld [vmem:[#allocation18 + $0x7a8] ss:$16 sps:$4 sm:$0xff]  }
 0x9f4   : > { %11510 = vmatprep.subr.bf16.mxu0 %v13268_v31  ;;  %v13254_v31 = vld [vmem:[#allocation18 + $0x7c8] ss:$16 sps:$4 sm:$0xff]  }
 0x9f5   : > { %9214 = vmatpush1.bf16.msra.mxu1 %v13176_v6  ;;  %v13235_v6 = vld [vmem:[#allocation18 + $0x6ec] ss:$16 sps:$4 sm:$0xff]  }
 0x9f6   : > { %9215 = vmatprep.subr.bf16.mxu1 %v13181_v42  ;;  %v13233_v42 = vld [vmem:[#allocation18 + $0x6e8] ss:$16 sps:$4 sm:$0xff]  }
 0x9f7   : > { %11511 = vmatpush3.bf16.msra.mxu0 %v13269_v38  ;;  %v13257_v38 = vld [vmem:[#allocation18 + $0x7e8] ss:$16 sps:$4 sm:$0xff]  }
 0x9f8   : > { %11512 = vmatprep.subr.bf16.mxu0 %v13270_v40 }
 0x9f9   : > { %9216 = vmatpush1.bf16.msra.mxu1 %v13179_v17  ;;  %v13271_v17 = vld [vmem:[#allocation21 + $0x28] sm:$0xff]  }
 0x9fa   : > { %9217 = vmatprep.subr.bf16.mxu1 %v13184_v57  ;;  %v13238_v57 = vld [vmem:[#allocation18 + $0x70c] ss:$16 sps:$4 sm:$0xff]  }
 0x9fb   : > { %11513 = vmatpush3.bf16.msra.mxu0 %v13271_v17 }
 0x9fd   : > { %9218 = vmatpush1.bf16.msra.mxu1 %v13182_v50  ;;  %v13272_v50 = vld [vmem:[#allocation21 + $0x70] sm:$0xff]  }
 0x9fe   : > { %9219 = vmatprep.subr.bf16.mxu1 %v13187_v5  ;;  %v13273_v5 = vld [vmem:[#allocation21 + $0x30] sm:$0xff]   ;;  %11514 = vmatprep.subr.bf16.mxu0 %v13272_v50 }
 0x9ff   : > { %11515 = vmatpush3.bf16.msra.mxu0 %v13273_v5  ;;  %v13289_v5 = vld [vmem:[#allocation21 + $0xb0] sm:$0xff]  }
 0xa00   : > { %11516 = vmatprep.subr.bf16.mxu0 %v13274_v18 }
 0xa01   : > { %9220 = vmatpush1.bf16.msra.mxu1 %v13185_v54  ;;  %v13275_v54 = vld [vmem:[#allocation21 + $0x38] sm:$0xff]  }
 0xa02   : > { %9221 = vmatprep.subr.bf16.mxu1 %v13190_v3  ;;  %v13244_v3 = vld [vmem:[#allocation18 + $0x74c] ss:$16 sps:$4 sm:$0xff]  }
 0xa03   : > { %11517 = vmatpush3.bf16.msra.mxu0 %v13275_v54 }
 0xa05   : > { %9222 = vmatpush1.bf16.msra.mxu1 %v13188_v35  ;;  %v13247_v35 = vld [vmem:[#allocation18 + $0x76c] ss:$16 sps:$4 sm:$0xff]  }
 0xa06   : > { %9223 = vmatprep.subr.bf16.mxu1 %v13193_v0  ;;  %v13250_v0 = vld [vmem:[#allocation18 + $0x78c] ss:$16 sps:$4 sm:$0xff]  }
 0xa09   : > { %9224 = vmatpush1.bf16.msra.mxu1 %v13191_v24  ;;  %v13253_v24 = vld [vmem:[#allocation18 + $0x7ac] ss:$16 sps:$4 sm:$0xff]  }
 0xa0a   : > { %9225 = vmatprep.subr.bf16.mxu1 %v13196_v51  ;;  %v13256_v51 = vld [vmem:[#allocation18 + $0x7cc] ss:$16 sps:$4 sm:$0xff]  }
 0xa0d   : > { %9226 = vmatpush1.bf16.msra.mxu1 %v13194_v36  ;;  %v13259_v36 = vld [vmem:[#allocation18 + $0x7ec] ss:$16 sps:$4 sm:$0xff]  }
 0xa0e   : > { %9227 = vmatprep.subr.bf16.mxu1 %v13199_v16 }
 0xa11   : > { %9228 = vmatpush1.bf16.msra.mxu1 %v13197_v48 }
 0xa12   : > { %9229 = vmatprep.subr.bf16.mxu1 %v13202_v15 }
 0xa15   : > { %9230 = vmatpush1.bf16.msra.mxu1 %v13200_v44 }
 0xa16   : > { %9231 = vmatprep.subr.bf16.mxu1 %v13205_v45 }
 0xa19   : > { %9232 = vmatpush1.bf16.msra.mxu1 %v13203_v49 }
 0xa1a   : > { %9233 = vmatprep.subr.bf16.mxu1 %v13208_v52 }
 0xa1d   : > { %9234 = vmatpush1.bf16.msra.mxu1 %v13206_v33 }
 0xa1e   : > { %9235 = vmatprep.subr.bf16.mxu1 %v13211_v55 }
 0xa21   : > { %9236 = vmatpush1.bf16.msra.mxu1 %v13209_v61  ;;  %v13276_v61 = vld [vmem:[#allocation21 + $0xc0] sm:$0xff]  }
 0xa22   : > { %9691 = vmatprep.subr.bf16.mxu1 %v13214_v39  ;;  %v13277_v39 = vld [vmem:[#allocation21 + $0x80] sm:$0xff]  }
 0xa24   : > { %9238 = vmatmul.mubr.bf16.vlgmr.msra.gmra.mrb[100].mxu1 %v14564_v46  ;;  %v13227_v46 = vld [vmem:[#allocation18 + $0x6a8] ss:$16 sps:$4 sm:$0xff]  }
 0xa25   : > { %9692 = vmatpush1.bf16.msra.mxu1 %v13212_v13  ;;  %9723 = vmatprep.mubr.bf16.mxu1 %v14568_v21  ;;  %v13278_v13 = vld [vmem:[#allocation21 + $0xc8] sm:$0xff]  }
 0xa26   : > { %9693 = vmatprep.subr.bf16.mxu1 %v13217_v41  ;;  %v13279_v41 = vld [vmem:[#allocation21 + $0x88] sm:$0xff]  }
 0xa29   : > { %9694 = vmatpush1.bf16.msra.mxu1 %v13215_v7  ;;  %v13280_v7 = vld [vmem:[#allocation21 + $0xd0] sm:$0xff]  }
 0xa2a   : > { %9695 = vmatprep.subr.bf16.mxu1 %v13220_v19  ;;  %v13282_v19 = vld [vmem:[#allocation21 + $0xd8] sm:$0xff]  }
 0xa2d   : > { %9696 = vmatpush1.bf16.msra.mxu1 %v13218_v8  ;;  %v13283_v8 = vld [vmem:[#allocation21 + $0x98] sm:$0xff]  }
 0xa2e   : > { %9697 = vmatprep.subr.bf16.mxu1 %v13223_v27  ;;  %v13284_v27 = vld [vmem:[#allocation21 + $0xe0] sm:$0xff]  }
 0xa31   : > { %9698 = vmatpush1.bf16.msra.mxu1 %v13221_v56  ;;  %v13285_v56 = vld [vmem:[#allocation21 + $0xa0] sm:$0xff]  }
 0xa32   : > { %9699 = vmatprep.subr.bf16.mxu1 %v13226_v58  ;;  %v13286_v58 = vld [vmem:[#allocation21 + $0xe8] sm:$0xff]  }
 0xa35   : > { %9700 = vmatpush1.bf16.msra.mxu1 %v13224_v9  ;;  %v9736_v9 = vld [vmem:[#allocation19] sm:$0xf] }
 0xa36   : > { %9701 = vmatprep.subr.bf16.mxu1 %v13229_v1 }
 0xa37   : > { %v8314_v21 = vpop.f32.mrb[88].mxu1  ;;  %v8716_v4 = vpop.f32.mrb[104].mxu0 }
 0xa38   : > { %v8717_v53 = vadd.f32 %v8716_v4, %v8314_v21  ;;  %v8316_v29 = vpop.f32.mrb[89].mxu1  ;;  %v8718_v63 = vpop.f32.mrb[105].mxu0 }
 0xa39   : > { %v8719_v43 = vadd.f32 %v8718_v63, %v8316_v29  ;;  %9702 = vmatpush1.bf16.msra.mxu1 %v13227_v46  ;;  %v8318_v60 = vpop.f32.mrb[90].mxu1  ;;  %v8720_v2 = vpop.f32.mrb[106].mxu0  ;;  %v9741_v46 = vrot.slane %v9736_v9, %v14327_v20  ;;  %v13288_v20 = vld [vmem:[#allocation21 + $0xf0] sm:$0xff]  }
 0xa3a   : > { %v8319_v59 = vpop.f32.mrb[91].mxu1  ;;  %v8721_v62 = vpop.f32.mrb[107].mxu0  ;;  %9703 = vmatprep.subr.bf16.mxu1 %v13232_v34 }
 0xa3d   : > { %9704 = vmatpush1.bf16.msra.mxu1 %v13230_v10 }
 0xa3e   : > { %9705 = vmatprep.subr.bf16.mxu1 %v13235_v6 }
 0xa41   : > { %9706 = vmatpush1.bf16.msra.mxu1 %v13233_v42 }
 0xa42   : > { %9707 = vmatprep.subr.bf16.mxu1 %v13238_v57  ;;  %v13287_v57 = vld [vmem:[#allocation21 + $0xa8] sm:$0xff]  }
 0xa45   : > { %9708 = vmatpush1.bf16.msra.mxu1 %v13236_v22  ;;  %v13290_v22 = vld [vmem:[#allocation21 + $0xf8] sm:$0xff]  }
 0xa46   : > { %9709 = vmatprep.subr.bf16.mxu1 %v13241_v26 }
 0xa49   : > { %9710 = vmatpush1.bf16.msra.mxu1 %v13239_v30 }
 0xa4a   : > { %9711 = vmatprep.subr.bf16.mxu1 %v13244_v3 }
 0xa4d   : > { %9712 = vmatpush1.bf16.msra.mxu1 %v13242_v32 }
 0xa4e   : > { %9713 = vmatprep.subr.bf16.mxu1 %v13247_v35 }
 0xa51   : > { %9714 = vmatpush1.bf16.msra.mxu1 %v13245_v12 }
 0xa52   : > { %9715 = vmatprep.subr.bf16.mxu1 %v13250_v0  ;;  %v9749_v0 = vrot.slane %v9736_v9, %v14300_v23 }
 0xa55   : > { %9716 = vmatpush1.bf16.msra.mxu1 %v13248_v14 }
 0xa56   : > { %9717 = vmatprep.subr.bf16.mxu1 %v13253_v24  ;;  %v9753_v24 = vrot.slane %v9736_v9, %v14303_v28  ;;  %v10108_v28 = vand.u32 127, %v1906_v11 }
 0xa58   : > { %vm10109_vm5 = vcmp.lt.s32.totalorder %v10108_v28, 10 }
 0xa59   : > { %9718 = vmatpush1.bf16.msra.mxu1 %v13251_v37 }
 0xa5a   : > { %9719 = vmatprep.subr.bf16.mxu1 %v13256_v51 }
 0xa5d   : > { %9720 = vmatpush1.bf16.msra.mxu1 %v13254_v31 }
 0xa5e   : > { %9721 = vmatprep.subr.bf16.mxu1 %v13259_v36 }
 0xa61   : > { %9722 = vmatpush1.bf16.msra.mxu1 %v13257_v38 }
 0xa62   : > { %11524 = vmatprep.subr.bf16.mxu1 %v13276_v61  ;;  %v9834_v61 = vld [vmem:[#allocation22] sm:$0x1] }
 0xa64   : > { %9724 = vmatmul.mubr.bf16.vlgmr.msra.gmra.mrb[104].mxu1 %v14574_v47  ;;  %v13281_v47 = vld [vmem:[#allocation21 + $0x90] sm:$0xff]  }
 0xa65   : > { %11525 = vmatpush3.bf16.msra.mxu1 %v13277_v39 }
 0xa66   : > { %11526 = vmatprep.subr.bf16.mxu1 %v13278_v13 }
 0xa69   : > { %11527 = vmatpush3.bf16.msra.mxu1 %v13279_v41 }
 0xa6a   : > { %11528 = vmatprep.subr.bf16.mxu1 %v13280_v7 }
 0xa6d   : > { %11529 = vmatpush3.bf16.msra.mxu1 %v13281_v47 }
 0xa6e   : > { %11530 = vmatprep.subr.bf16.mxu1 %v13282_v19 }
 0xa71   : > { %11531 = vmatpush3.bf16.msra.mxu1 %v13283_v8 }
 0xa72   : > { %11532 = vmatprep.subr.bf16.mxu1 %v13284_v27 }
 0xa75   : > { %11533 = vmatpush3.bf16.msra.mxu1 %v13285_v56 }
 0xa76   : > { %11534 = vmatprep.subr.bf16.mxu1 %v13286_v58 }
 0xa77   : > { %v8355_v16 = vpop.f32.mrb[92].mxu1  ;;  %v9198_v40 = vpop.f32.mrb[108].mxu0 }
 0xa78   : > { %v9246_v48 = vadd.f32 %v9198_v40, %v8717_v53  ;;  %v8357_v15 = vpop.f32.mrb[93].mxu1  ;;  %v9200_v44 = vpop.f32.mrb[109].mxu0  ;;  %v9745_v53 = vrot.slane %v9736_v9, %v14332_v25  ;;  %v13291_v25 = vld [vmem:[#allocation21 + $0xb8] sm:$0xff]  }
 0xa79   : > { %v9247_v45 = vadd.f32 %v9200_v44, %v8719_v43  ;;  %v8359_v49 = vpop.f32.mrb[94].mxu1  ;;  %v9202_v52 = vpop.f32.mrb[110].mxu0  ;;  %11535 = vmatpush3.bf16.msra.mxu1 %v13287_v57 }
 0xa7a   : > { %v8360_v33 = vpop.f32.mrb[95].mxu1  ;;  %v9203_v55 = vpop.f32.mrb[111].mxu0  ;;  %11536 = vmatprep.subr.bf16.mxu1 %v13288_v20 }
 0xa7d   : > { %11537 = vmatpush3.bf16.msra.mxu1 %v13289_v5 }
 0xa7e   : > { %11538 = vmatprep.subr.bf16.mxu1 %v13290_v22 }
 0xa81   : > { %11539 = vmatpush3.bf16.msra.mxu1 %v13291_v25 }
 0xab7   : > { %v8757_v1 = vpop.f32.mrb[96].mxu1 }
 0xab8   : > { %v8758_v34 = vadd.f32 %v8757_v1, %v8355_v16  ;;  %v9684_v21 = vpop.f32.mrb[112].mxu0  ;;  %v8759_v4 = vpop.f32.mrb[97].mxu1 }
 0xab9   : > { %v9732_v29 = vadd.f32 %v9684_v21, %v9246_v48  ;;  %v8760_v63 = vadd.f32 %v8759_v4, %v8357_v15  ;;  %v9686_v43 = vpop.f32.mrb[113].mxu0  ;;  %v8761_v60 = vpop.f32.mrb[98].mxu1 }
 0xaba   : > { %v9733_v2 = vadd.f32 %v9686_v43, %v9247_v45  ;;  %v9688_v10 = vpop.f32.mrb[114].mxu0  ;;  %v8762_v59 = vpop.f32.mrb[99].mxu1 }
 0xabb   : > { %v9758_v62 = vadd.f32 %v9741_v46, %v9732_v29  ;;  %v9689_v6 = vpop.f32.mrb[115].mxu0 }
 0xabc   : > { %v9759_v42 = vadd.f32 %v9745_v53, %v9733_v2 }
 0xabd   : > { %v9762_v17 = vmax.f32 %v9758_v62, 0.0 }
 0xabe   : > { %v9763_v50 = vmax.f32 %v9759_v42, 0.0 }
 0xabf   : > { %v9766_v26 = vpack.c.bf16 %v9762_v17, %v9762_v17 }
 0xac0   : > { %v9767_v18 = vpack.c.bf16 %v9763_v50, %v9763_v50 }
 0xac2   : > { %10059 = vmatprep.mubr.bf16.mxu0 %v9767_v18 }
 0xac3   : > { %10060 = vmatmul.mubr.bf16.vlgmr.msra.gmra.mrb[116].mxu0 %v9766_v26 }
 0xaf7   : > { %v9239_v54 = vpop.f32.mrb[100].mxu1 }
 0xaf8   : > { %v9248_v30 = vadd.f32 %v9239_v54, %v8758_v34  ;;  %v9241_v3 = vpop.f32.mrb[101].mxu1 }
 0xaf9   : > { %v9249_v32 = vadd.f32 %v9241_v3, %v8760_v63  ;;  %v9243_v35 = vpop.f32.mrb[102].mxu1 }
 0xafa   : > { %v9244_v12 = vpop.f32.mrb[103].mxu1 }
 0xb37   : > { %v9725_v14 = vpop.f32.mrb[104].mxu1 }
 0xb38   : > { %v9734_v37 = vadd.f32 %v9725_v14, %v9248_v30  ;;  %v9727_v51 = vpop.f32.mrb[105].mxu1 }
 0xb39   : > { %v9735_v31 = vadd.f32 %v9727_v51, %v9249_v32  ;;  %v9729_v36 = vpop.f32.mrb[106].mxu1 }
 0xb3a   : > { %v9760_v38 = vadd.f32 %v9749_v0, %v9734_v37  ;;  %v9730_v16 = vpop.f32.mrb[107].mxu1 }
 0xb3b   : > { %v9761_v40 = vadd.f32 %v9753_v24, %v9735_v31 }
 0xb3c   : > { %v9764_v48 = vmax.f32 %v9760_v38, 0.0 }
 0xb3d   : > { %v9765_v15 = vmax.f32 %v9761_v40, 0.0 }
 0xb3e   : > { %v9768_v45 = vpack.c.bf16 %v9764_v48, %v9764_v48 }
 0xb3f   : > { %v9769_v44 = vpack.c.bf16 %v9765_v15, %v9765_v15 }
 0xb41   : > { %10099 = vmatprep.mubr.bf16.mxu1 %v9769_v44 }
 0xb42   : > { %10100 = vmatmul.mubr.bf16.vlgmr.msra.gmra.mrb[108].mxu1 %v9768_v45 }
 0xb96   : > { %v11518_v49 = vpop.f32.mrb[116].mxu0 }
 0xb97   : > { %v11519_v52 = vpop.f32.mrb[117].mxu0 }
 0xb98   : > { %v11520_v33 = vadd.f32 %v11519_v52, %v11518_v49  ;;  %v11521_v23 = vpop.f32.mrb[118].mxu0 }
 0xb99   : > { %v11522_v55 = vpop.f32.mrb[119].mxu0 }
 0xb9a   : > { %v10062_v41 = vadd.f32 %v11520_v33, %v9834_v61 }
 0xc15   : > { %v11540_v39 = vpop.f32.mrb[108].mxu1 }
 0xc16   : > { %v11541_v13 = vpop.f32.mrb[109].mxu1 }
 0xc17   : > { %v11542_v7 = vadd.f32 %v11541_v13, %v11540_v39  ;;  %v11543_v47 = vpop.f32.mrb[110].mxu1 }
 0xc18   : > { %v11544_v19 = vpop.f32.mrb[111].mxu1 }
 0xc19   : > { %v10102_v8 = vadd.f32 %v11542_v7, %v10062_v41 }
 0xc1b   : > { %v10110_v27 = vsel %vm10109_vm5, %v10102_v8, -1e+30 }
 0xc1c   : > { %v10112_v56 = vsel %vm10111_vm6, %v10110_v27, -inf }
 0xc1d   : > { %10113 = vmax.xlane.f32.xlu0 %v10112_v56 }
 0xcaa   : > { %v10114_v58 = vpop.xlane.xlu0 %10113 }
 0xcab   : > { %v10115_v9 = vsub.f32 %v10110_v27, %v10114_v58 }
 0xcad   : > { %v10116_v1 = vmul.f32 1.442695, %v10115_v9 }
 0xcaf   : > { %13292 = vpow2.f32 %v10116_v1 }
 0xcb9   : > { %v13293_v46 = vpop.eup %13292 }
 0xcba   : > { %v10118_v11 = vsel %vm10111_vm6, %v13293_v46, 0.0 }
 0xcbb   : > { %10119 = vadd.xlane.f32.xlu0 %v10118_v11 }
 0xd48   : > { %v10120_v34 = vpop.xlane.xlu0 %10119 }
 0xd49   : > { %13294 = vlog2.f32 %v10120_v34 }
 0xd53   : > { %v13295_v21 = vpop.eup %13294 }
 0xd54   : > { %v10122_v4 = vmul.f32 0.6931472, %v13295_v21 }
 0xd56   : > { %v10123_v53 = vsub.f32 %v10115_v9, %v10122_v4 }
 0xd58   : > { %10124 = vst [vmem:[%s597_s2] sm:$0x1] %v10123_v53 }
 0xd59   : > { %13645 = shalt.err (!%p13642_p3)
}
 0xd5a   : > { %s13646_s20 = scalar_lea.hbm %s14592_s14, 16  ;;  %s13650_s25 = scalar_lea.hbm %s14693_s19, 32 }
 0xd5b   : > { %p13647_p4 = scmp.ne.s32.totalorder %s14592_s14, %s13646_s20  ;;  %p13651_p11 = scmp.lt.u32.totalorder %s14592_s14, %s14693_s19 }
 0xd5c   : > { %p13652_p13 = scmp.lt.u32.totalorder %s13650_s25, %s13646_s20  ;;  %p13654_p1 = scmp.lt.u32.totalorder %s13646_s20, %s14592_s14 }
 0xd5d   : > { %p13648_p7 = pnand %p13647_p4, %p14694_p6 }
 0xd5e   : > { %p13653_p0 = por %p13652_p13, %p13651_p11 }
 0xd5f   : > { %p13649_p8 = pneg %p13648_p7 }
 0xd60   : > { %p13655_p5 = por %p13654_p1, %p13653_p0 }
 0xd62   : > { %p13656_p9 = pnand %p13655_p5, %p13649_p8 }
 0xd64   : > { %13659 = shalt.err (!%p13656_p9)
}
 0xd65   : > { %11654 = dma.vmem_to_hbm [thread:$0]  (%p14694_p6), %s14594_s24, 16, %s14592_s14, %s10126_s15  }
 0xd66 PF: > { %s14695_s21 = sld [smem:[#allocation35_spill]]  ;;  %s14696_s2 = sld [smem:[#allocation33_spill]] }
 0xd67   : > { %s14697_s17 = sld [smem:[#allocation38_spill]] }
 0xd6c   : > { %p11721_p12 = scmp.ge.s32.totalorder %s14695_s21, 2  ;;  %s10150_s27 = sand.u32 1, %s14696_s2  }
 0xd6d   : > { %p14698_p10 = scmp.ne.s32.totalorder %s14697_s17, 0  ;;  %s10151_s4 = scalar_lea.sflag [#allocation6], %s10150_s27 }
 0xd6f   : > { %p11694_p2 = pnand %p11721_p12, %p14698_p10 }
 0xd71   : > { %13705 = dma.done.wait (!%p11694_p2), %s10151_s4, 16  }
 0xd72   : > { %13707 = vsyncadd (!%p11694_p2), %s10151_s4, 4294967280  ;;  %s14699_s28 = sld [smem:[#allocation36_spill]]  ;;  %s14700_s29 = sld [smem:[#allocation34_spill]] }
 0xd73   : > { %s14701_s27 = sld [smem:[#allocation37_spill]]  ;;  %s14702_s25 = smov %s13714_s26 }
 0xd78   : > { %p30_p3 = scmp.ge.s32.totalorder %s14699_s28, 4   ;;  %s14703_s26 = smov %s14700_s29 }
 0xd7a   :  { %32 = sbr.rel (!%p30_p3) target bundleno = 14 (0xe), region = 170 }
 0xd81   :  { %10155 = vsyncpa [#allocation5], 1 }
 0xd82   :  { %10157 = vsyncpa [#allocation5 + $0x1], 1 }
 0xd83   :  { %10158 = vsyncpa [#allocation8], 1 }
 0xd84   :  { %10159 = vsyncpa [#allocation11], 1 }
 0xd85   :  { %10160 = vsyncpa [#allocation14], 1 }
 0xd86   :  { %10161 = vsyncpa [#allocation17], 1 }
 0xd87   :  { %10162 = vsyncpa [#allocation20], 1 }
 0xd88   :  { %10163 = vsyncpa [#allocation23], 1 }
 0xd89   :  { %10164 = vsyncpa [#allocation6], 1 }
 0xd8a   :  { %10166 = vsyncpa [#allocation6 + $0x1], 1 }

</bundles_post_ra>
